<compile_context>
chip_gen: v7x
topology: tpu7x:2x2x1
jax: 0.10.0
libtpu: 0.0.40
codegen_flags: <defaults>
</compile_context>

<pallas_src>
import functools

import jax
import jax.numpy as jnp
from jax import lax
from jax.experimental import pallas as pl
from jax.experimental.pallas import tpu as pltpu

EPS = 1e-5  # nn.InstanceNorm2d default eps


def _reflect_pad_into(pad_ref, img, H, W):
    """Write ReflectionPad2d(1)(img) into the (H+2, W+2, C) VMEM scratch."""
    # Interior.
    pad_ref[1:H + 1, 1:W + 1, :] = img
    # Left / right halo columns (reflect: col -1 <- col 1, col W <- col W-2).
    pad_ref[1:H + 1, 0:1, :] = img[:, 1:2, :]
    pad_ref[1:H + 1, W + 1:W + 2, :] = img[:, W - 2:W - 1, :]
    # Top / bottom halo rows copied full-width from the (already complete)
    # rows 2 and H-1, so the corners come along for free.
    pad_ref[0:1, :, :] = pad_ref[2:3, :, :]
    pad_ref[H + 1:H + 2, :, :] = pad_ref[H - 1:H, :, :]


def _conv3x3(pad_ref, w_ref, b_ref, H, W, C):
    """3x3 'VALID' conv over the padded scratch as ONE im2col MXU matmul."""
    xp = pad_ref[...]                                     # (H+2, W+2, C) f32
    taps = [xp[dy:dy + H, dx:dx + W, :]                   # (H, W, C)
            for dy in range(3) for dx in range(3)]
    patches = jnp.concatenate(taps, axis=-1)              # (H, W, 9C)
    patches = patches.reshape(H * W, 9 * C)
    y = jnp.dot(patches.astype(jnp.bfloat16), w_ref[...],  # bf16 x bf16 -> f32
                preferred_element_type=jnp.float32)
    return y + b_ref[...]                                  # (H*W, C) f32


def _instance_norm(y):
    """InstanceNorm2d (affine=False): per-sample, per-channel over H*W."""
    mean = jnp.mean(y, axis=0, keepdims=True)
    var = jnp.mean(jnp.square(y - mean), axis=0, keepdims=True)
    return (y - mean) * lax.rsqrt(var + EPS)


def _resnet_block_kernel(x_ref, w1_ref, b1_ref, w2_ref, b2_ref, out_ref,
                         pad_ref, *, H, W, C):
    x = x_ref[0]                                           # (H, W, C) f32
    # --- stage 1: pad -> conv -> IN -> ReLU (all stays in VMEM) ---
    _reflect_pad_into(pad_ref, x, H, W)
    y = _conv3x3(pad_ref, w1_ref, b1_ref, H, W, C)
    y = jnp.maximum(_instance_norm(y), 0.0)
    # --- stage 2: pad -> conv -> IN ---
    _reflect_pad_into(pad_ref, y.reshape(H, W, C), H, W)
    y = _conv3x3(pad_ref, w2_ref, b2_ref, H, W, C)
    y = _instance_norm(y)
    # --- residual add (x reused from the same VMEM block) ---
    out_ref[0] = x + y.reshape(H, W, C)


@jax.jit
def resnet_block_forward(x_nchw, w1, b1, w2, b2):
    """out = x + conv_block(x).

    x_nchw: (B, C, H, W) f32.  w1/w2: (3, 3, C, C) HWIO (PyTorch OIHW weights
    convert via w.transpose(2, 3, 1, 0)).  b1/b2: (C,).
    """
    B, C, H, W = x_nchw.shape
    assert H >= 3 and W >= 3
    x = jnp.transpose(x_nchw, (0, 2, 3, 1))                # NCHW -> NHWC
    # im2col weights: (dy, dx, ci) flattened -> (9C, C); bf16 for the MXU.
    w1m = w1.reshape(9 * C, C).astype(jnp.bfloat16)
    w2m = w2.reshape(9 * C, C).astype(jnp.bfloat16)
    b1m = b1.reshape(1, C).astype(jnp.float32)
    b2m = b2.reshape(1, C).astype(jnp.float32)

    kernel = functools.partial(_resnet_block_kernel, H=H, W=W, C=C)
    flops = 2 * B * 2 * H * W * 9 * C * C                  # 2 convs, 2 flop/MAC
    bytes_accessed = (2 * x.size * 4                       # x in + out
                      + (w1m.size + w2m.size) * 2          # bf16 weights
                      + (b1m.size + b2m.size) * 4)

    out = pl.pallas_call(
        kernel,
        out_shape=jax.ShapeDtypeStruct((B, H, W, C), jnp.float32),
        grid=(B,),
        in_specs=[
            pl.BlockSpec((1, H, W, C), lambda i: (i, 0, 0, 0)),  # one sample
            pl.BlockSpec((9 * C, C), lambda i: (0, 0)),          # w1 (full)
            pl.BlockSpec((1, C), lambda i: (0, 0)),              # b1
            pl.BlockSpec((9 * C, C), lambda i: (0, 0)),          # w2 (full)
            pl.BlockSpec((1, C), lambda i: (0, 0)),              # b2
        ],
        out_specs=pl.BlockSpec((1, H, W, C), lambda i: (i, 0, 0, 0)),
        scratch_shapes=[pltpu.VMEM((H + 2, W + 2, C), jnp.float32)],
        compiler_params=pltpu.CompilerParams(
            dimension_semantics=("parallel",),
            # Raise the scoped-VMEM cap above the 16/32 MiB defaults while
            # staying safely below v7x's 64 MiB physical VMEM.
            vmem_limit_bytes=48 * 1024 * 1024,
        ),
        cost_estimate=pl.CostEstimate(
            flops=int(flops),
            transcendentals=int(2 * B * C),
            bytes_accessed=int(bytes_accessed),
        ),
    )(x, w1m, b1m, w2m, b2m)
    return jnp.transpose(out, (0, 3, 1, 2))                # NHWC -> NCHW


def ref_forward(x_nchw, w1, b1, w2, b2):
    """Pure-JAX f32 reference (lax.conv) for validation."""
    x = jnp.transpose(x_nchw, (0, 2, 3, 1))

    def conv(inp, w, b):
        inp = jnp.pad(inp, ((0, 0), (1, 1), (1, 1), (0, 0)), mode="reflect")
        y = lax.conv_general_dilated(
            inp, w, (1, 1), "VALID",
            dimension_numbers=("NHWC", "HWIO", "NHWC"),
            precision=lax.Precision.HIGHEST)
        return y + b

    def inorm(y):
        m = jnp.mean(y, axis=(1, 2), keepdims=True)
        v = jnp.mean(jnp.square(y - m), axis=(1, 2), keepdims=True)
        return (y - m) * lax.rsqrt(v + EPS)

    y = jnp.maximum(inorm(conv(x, w1, b1)), 0.0)
    y = inorm(conv(y, w2, b2))
    return jnp.transpose(x + y, (0, 3, 1, 2))


if __name__ == "__main__":
    # The resnet blocks in ImageTranslationBranch run at C = ngf*2^3 = 512;
    # 128 keeps the test small while staying lane-aligned (multiple of 128).
    B, C, H, W = 2, 128, 16, 16
    key = jax.random.PRNGKey(0)
    kx, kw1, kb1, kw2, kb2 = jax.random.split(key, 5)

    x = jax.random.normal(kx, (B, C, H, W), jnp.float32)
    # Conv2d(dim, dim, 3) weights, stored HWIO for the NHWC kernel.
    fan_in = C * 3 * 3
    bound = 1.0 / (fan_in ** 0.5)
    w1 = jax.random.uniform(kw1, (3, 3, C, C), jnp.float32, -bound, bound)
    b1 = jax.random.uniform(kb1, (C,), jnp.float32, -bound, bound)
    w2 = jax.random.uniform(kw2, (3, 3, C, C), jnp.float32, -bound, bound)
    b2 = jax.random.uniform(kb2, (C,), jnp.float32, -bound, bound)

    out = jax.block_until_ready(resnet_block_forward(x, w1, b1, w2, b2))
    ref = jax.block_until_ready(ref_forward(x, w1, b1, w2, b2))

    assert out.shape == (B, C, H, W)
    max_err = float(jnp.max(jnp.abs(out - ref)))
    # bf16 MXU operands with f32 accumulation/stats -> small tolerance.
    assert jnp.allclose(out, ref, atol=3e-2, rtol=3e-2), f"mismatch: {max_err}"
    print("KERNEL_OK")
</pallas_src>

<mosaic_0001>
module attributes {stable_mosaic.version = 11 : i64} {
  func.func @_resnet_block_kernel(%arg0: i32, %arg1: memref<1x16x16x128xf32, #tpu.memory_space<vmem>>, %arg2: memref<1152x128xbf16, #tpu.memory_space<vmem>>, %arg3: memref<1x128xf32, #tpu.memory_space<vmem>>, %arg4: memref<1152x128xbf16, #tpu.memory_space<vmem>>, %arg5: memref<1x128xf32, #tpu.memory_space<vmem>>, %arg6: memref<1x16x16x128xf32, #tpu.memory_space<vmem>>, %arg7: memref<18x18x128xf32, #tpu.memory_space<vmem>>) attributes {dimension_semantics = [#tpu.dimension_semantics<parallel>], iteration_bounds = array<i64: 2>, scalar_prefetch = 0 : i64, scratch_operands = 1 : i64, tpu.core_type = #tpu.core_type<tc>, window_params = [{transform_indices = @transform_0, window_bounds = array<i64: 1, 16, 16, 128>}, {pipeline_mode = #tpu.pipeline_mode<synchronous>, transform_indices = @transform_1, window_bounds = array<i64: 1152, 128>}, {pipeline_mode = #tpu.pipeline_mode<synchronous>, transform_indices = @transform_2, window_bounds = array<i64: 1, 128>}, {pipeline_mode = #tpu.pipeline_mode<synchronous>, transform_indices = @transform_3, window_bounds = array<i64: 1152, 128>}, {pipeline_mode = #tpu.pipeline_mode<synchronous>, transform_indices = @transform_4, window_bounds = array<i64: 1, 128>}, {transform_indices = @transform_5, window_bounds = array<i64: 1, 16, 16, 128>}]} {
    %c0 = arith.constant 0 : index
    %c0_0 = arith.constant 0 : index
    %c0_1 = arith.constant 0 : index
    %c0_2 = arith.constant 0 : index
    %0 = vector.load %arg1[%c0, %c0_0, %c0_1, %c0_2] : memref<1x16x16x128xf32, #tpu.memory_space<vmem>>, vector<1x16x16x128xf32>
    %1 = vector.shape_cast %0 : vector<1x16x16x128xf32> to vector<16x16x128xf32>
    %c1 = arith.constant 1 : index
    %c1_3 = arith.constant 1 : index
    %c0_4 = arith.constant 0 : index
    %2 = vector.load %arg7[%c1, %c1_3, %c0_4] : memref<18x18x128xf32, #tpu.memory_space<vmem>>, vector<16x16x128xf32>
    tpu.vector_store %arg7[%c1, %c1_3, %c0_4], %1 {strides = array<i32>} : memref<18x18x128xf32, #tpu.memory_space<vmem>>, vector<16x16x128xf32>,
    %3 = vector.extract_strided_slice %1 {offsets = [0, 1, 0], sizes = [16, 1, 128], strides = [1, 1, 1]} : vector<16x16x128xf32> to vector<16x1x128xf32>
    %c1_5 = arith.constant 1 : index
    %c0_6 = arith.constant 0 : index
    %c0_7 = arith.constant 0 : index
    %4 = vector.load %arg7[%c1_5, %c0_6, %c0_7] : memref<18x18x128xf32, #tpu.memory_space<vmem>>, vector<16x1x128xf32>
    tpu.vector_store %arg7[%c1_5, %c0_6, %c0_7], %3 {strides = array<i32>} : memref<18x18x128xf32, #tpu.memory_space<vmem>>, vector<16x1x128xf32>,
    %5 = vector.extract_strided_slice %1 {offsets = [0, 14, 0], sizes = [16, 1, 128], strides = [1, 1, 1]} : vector<16x16x128xf32> to vector<16x1x128xf32>
    %c1_8 = arith.constant 1 : index
    %c17 = arith.constant 17 : index
    %c0_9 = arith.constant 0 : index
    %6 = vector.load %arg7[%c1_8, %c17, %c0_9] : memref<18x18x128xf32, #tpu.memory_space<vmem>>, vector<16x1x128xf32>
    tpu.vector_store %arg7[%c1_8, %c17, %c0_9], %5 {strides = array<i32>} : memref<18x18x128xf32, #tpu.memory_space<vmem>>, vector<16x1x128xf32>,
    %c2 = arith.constant 2 : index
    %c0_10 = arith.constant 0 : index
    %c0_11 = arith.constant 0 : index
    %7 = vector.load %arg7[%c2, %c0_10, %c0_11] : memref<18x18x128xf32, #tpu.memory_space<vmem>>, vector<1x18x128xf32>
    %c0_12 = arith.constant 0 : index
    %c0_13 = arith.constant 0 : index
    %c0_14 = arith.constant 0 : index
    %8 = vector.load %arg7[%c0_12, %c0_13, %c0_14] : memref<18x18x128xf32, #tpu.memory_space<vmem>>, vector<1x18x128xf32>
    tpu.vector_store %arg7[%c0_12, %c0_13, %c0_14], %7 {strides = array<i32>} : memref<18x18x128xf32, #tpu.memory_space<vmem>>, vector<1x18x128xf32>,
    %c15 = arith.constant 15 : index
    %c0_15 = arith.constant 0 : index
    %c0_16 = arith.constant 0 : index
    %9 = vector.load %arg7[%c15, %c0_15, %c0_16] : memref<18x18x128xf32, #tpu.memory_space<vmem>>, vector<1x18x128xf32>
    %c17_17 = arith.constant 17 : index
    %c0_18 = arith.constant 0 : index
    %c0_19 = arith.constant 0 : index
    %10 = vector.load %arg7[%c17_17, %c0_18, %c0_19] : memref<18x18x128xf32, #tpu.memory_space<vmem>>, vector<1x18x128xf32>
    tpu.vector_store %arg7[%c17_17, %c0_18, %c0_19], %9 {strides = array<i32>} : memref<18x18x128xf32, #tpu.memory_space<vmem>>, vector<1x18x128xf32>,
    %c0_20 = arith.constant 0 : index
    %c0_21 = arith.constant 0 : index
    %c0_22 = arith.constant 0 : index
    %11 = vector.load %arg7[%c0_20, %c0_21, %c0_22] : memref<18x18x128xf32, #tpu.memory_space<vmem>>, vector<18x18x128xf32>
    %12 = vector.extract_strided_slice %11 {offsets = [0, 0, 0], sizes = [16, 16, 128], strides = [1, 1, 1]} : vector<18x18x128xf32> to vector<16x16x128xf32>
    %13 = vector.extract_strided_slice %11 {offsets = [0, 1, 0], sizes = [16, 16, 128], strides = [1, 1, 1]} : vector<18x18x128xf32> to vector<16x16x128xf32>
    %14 = vector.extract_strided_slice %11 {offsets = [0, 2, 0], sizes = [16, 16, 128], strides = [1, 1, 1]} : vector<18x18x128xf32> to vector<16x16x128xf32>
    %15 = vector.extract_strided_slice %11 {offsets = [1, 0, 0], sizes = [16, 16, 128], strides = [1, 1, 1]} : vector<18x18x128xf32> to vector<16x16x128xf32>
    %16 = vector.extract_strided_slice %11 {offsets = [1, 1, 0], sizes = [16, 16, 128], strides = [1, 1, 1]} : vector<18x18x128xf32> to vector<16x16x128xf32>
    %17 = vector.extract_strided_slice %11 {offsets = [1, 2, 0], sizes = [16, 16, 128], strides = [1, 1, 1]} : vector<18x18x128xf32> to vector<16x16x128xf32>
    %18 = vector.extract_strided_slice %11 {offsets = [2, 0, 0], sizes = [16, 16, 128], strides = [1, 1, 1]} : vector<18x18x128xf32> to vector<16x16x128xf32>
    %19 = vector.extract_strided_slice %11 {offsets = [2, 1, 0], sizes = [16, 16, 128], strides = [1, 1, 1]} : vector<18x18x128xf32> to vector<16x16x128xf32>
    %20 = vector.extract_strided_slice %11 {offsets = [2, 2, 0], sizes = [16, 16, 128], strides = [1, 1, 1]} : vector<18x18x128xf32> to vector<16x16x128xf32>
    %21 = tpu.concatenate %12, %13, %14, %15, %16, %17, %18, %19, %20 in 2 : vector<16x16x128xf32>, vector<16x16x128xf32>, vector<16x16x128xf32>, vector<16x16x128xf32>, vector<16x16x128xf32>, vector<16x16x128xf32>, vector<16x16x128xf32>, vector<16x16x128xf32>, vector<16x16x128xf32> -> vector<16x16x1152xf32>
    %22 = vector.shape_cast %21 : vector<16x16x1152xf32> to vector<256x1152xf32>
    %23 = arith.truncf %22 : vector<256x1152xf32> to vector<256x1152xbf16>
    %c0_23 = arith.constant 0 : index
    %c0_24 = arith.constant 0 : index
    %24 = vector.load %arg2[%c0_23, %c0_24] : memref<1152x128xbf16, #tpu.memory_space<vmem>>, vector<1152x128xbf16>
    %cst = arith.constant dense<0.000000e+00> : vector<256x128xf32>
    %25 = tpu.matmul %23, %24, %cst {dimension_numbers = #tpu.dot_dimension_numbers<[1], [0], [0], [1], [0, 0, 1, 1], [], []>} : vector<256x1152xbf16>, vector<1152x128xbf16>, vector<256x128xf32> -> vector<256x128xf32>
    %c0_25 = arith.constant 0 : index
    %c0_26 = arith.constant 0 : index
    %26 = vector.load %arg3[%c0_25, %c0_26] : memref<1x128xf32, #tpu.memory_space<vmem>>, vector<1x128xf32>
    %27 = vector.broadcast %26 : vector<1x128xf32> to vector<256x128xf32>
    %28 = arith.addf %25, %27 : vector<256x128xf32>
    %cst_27 = arith.constant dense<0.000000e+00> : vector<128xf32>
    %29 = vector.multi_reduction <add>, %28, %cst_27 [0] : vector<256x128xf32> to vector<128xf32>
    %30 = vector.shape_cast %29 : vector<128xf32> to vector<1x128xf32>
    %cst_28 = arith.constant 2.560000e+02 : f32
    %31 = vector.broadcast %cst_28 : f32 to vector<1x128xf32>
    %32 = arith.divf %30, %31 : vector<1x128xf32>
    %33 = vector.broadcast %32 : vector<1x128xf32> to vector<256x128xf32>
    %34 = arith.subf %28, %33 : vector<256x128xf32>
    %35 = arith.mulf %34, %34 : vector<256x128xf32>
    %cst_29 = arith.constant dense<0.000000e+00> : vector<128xf32>
    %36 = vector.multi_reduction <add>, %35, %cst_29 [0] : vector<256x128xf32> to vector<128xf32>
    %37 = vector.shape_cast %36 : vector<128xf32> to vector<1x128xf32>
    %cst_30 = arith.constant 2.560000e+02 : f32
    %38 = vector.broadcast %cst_30 : f32 to vector<1x128xf32>
    %39 = arith.divf %37, %38 : vector<1x128xf32>
    %40 = vector.broadcast %32 : vector<1x128xf32> to vector<256x128xf32>
    %41 = arith.subf %28, %40 : vector<256x128xf32>
    %cst_31 = arith.constant 9.99999974E-6 : f32
    %42 = vector.broadcast %cst_31 : f32 to vector<1x128xf32>
    %43 = arith.addf %39, %42 : vector<1x128xf32>
    %44 = math.rsqrt %43 : vector<1x128xf32>
    %45 = vector.broadcast %44 : vector<1x128xf32> to vector<256x128xf32>
    %46 = arith.mulf %41, %45 : vector<256x128xf32>
    %cst_32 = arith.constant 0.000000e+00 : f32
    %47 = vector.broadcast %cst_32 : f32 to vector<256x128xf32>
    %48 = arith.maximumf %46, %47 : vector<256x128xf32>
    %49 = vector.shape_cast %48 : vector<256x128xf32> to vector<16x16x128xf32>
    %c1_33 = arith.constant 1 : index
    %c1_34 = arith.constant 1 : index
    %c0_35 = arith.constant 0 : index
    %50 = vector.load %arg7[%c1_33, %c1_34, %c0_35] : memref<18x18x128xf32, #tpu.memory_space<vmem>>, vector<16x16x128xf32>
    tpu.vector_store %arg7[%c1_33, %c1_34, %c0_35], %49 {strides = array<i32>} : memref<18x18x128xf32, #tpu.memory_space<vmem>>, vector<16x16x128xf32>,
    %51 = vector.extract_strided_slice %49 {offsets = [0, 1, 0], sizes = [16, 1, 128], strides = [1, 1, 1]} : vector<16x16x128xf32> to vector<16x1x128xf32>
    %c1_36 = arith.constant 1 : index
    %c0_37 = arith.constant 0 : index
    %c0_38 = arith.constant 0 : index
    %52 = vector.load %arg7[%c1_36, %c0_37, %c0_38] : memref<18x18x128xf32, #tpu.memory_space<vmem>>, vector<16x1x128xf32>
    tpu.vector_store %arg7[%c1_36, %c0_37, %c0_38], %51 {strides = array<i32>} : memref<18x18x128xf32, #tpu.memory_space<vmem>>, vector<16x1x128xf32>,
    %53 = vector.extract_strided_slice %49 {offsets = [0, 14, 0], sizes = [16, 1, 128], strides = [1, 1, 1]} : vector<16x16x128xf32> to vector<16x1x128xf32>
    %c1_39 = arith.constant 1 : index
    %c17_40 = arith.constant 17 : index
    %c0_41 = arith.constant 0 : index
    %54 = vector.load %arg7[%c1_39, %c17_40, %c0_41] : memref<18x18x128xf32, #tpu.memory_space<vmem>>, vector<16x1x128xf32>
    tpu.vector_store %arg7[%c1_39, %c17_40, %c0_41], %53 {strides = array<i32>} : memref<18x18x128xf32, #tpu.memory_space<vmem>>, vector<16x1x128xf32>,
    %c2_42 = arith.constant 2 : index
    %c0_43 = arith.constant 0 : index
    %c0_44 = arith.constant 0 : index
    %55 = vector.load %arg7[%c2_42, %c0_43, %c0_44] : memref<18x18x128xf32, #tpu.memory_space<vmem>>, vector<1x18x128xf32>
    %c0_45 = arith.constant 0 : index
    %c0_46 = arith.constant 0 : index
    %c0_47 = arith.constant 0 : index
    %56 = vector.load %arg7[%c0_45, %c0_46, %c0_47] : memref<18x18x128xf32, #tpu.memory_space<vmem>>, vector<1x18x128xf32>
    tpu.vector_store %arg7[%c0_45, %c0_46, %c0_47], %55 {strides = array<i32>} : memref<18x18x128xf32, #tpu.memory_space<vmem>>, vector<1x18x128xf32>,
    %c15_48 = arith.constant 15 : index
    %c0_49 = arith.constant 0 : index
    %c0_50 = arith.constant 0 : index
    %57 = vector.load %arg7[%c15_48, %c0_49, %c0_50] : memref<18x18x128xf32, #tpu.memory_space<vmem>>, vector<1x18x128xf32>
    %c17_51 = arith.constant 17 : index
    %c0_52 = arith.constant 0 : index
    %c0_53 = arith.constant 0 : index
    %58 = vector.load %arg7[%c17_51, %c0_52, %c0_53] : memref<18x18x128xf32, #tpu.memory_space<vmem>>, vector<1x18x128xf32>
    tpu.vector_store %arg7[%c17_51, %c0_52, %c0_53], %57 {strides = array<i32>} : memref<18x18x128xf32, #tpu.memory_space<vmem>>, vector<1x18x128xf32>,
    %c0_54 = arith.constant 0 : index
    %c0_55 = arith.constant 0 : index
    %c0_56 = arith.constant 0 : index
    %59 = vector.load %arg7[%c0_54, %c0_55, %c0_56] : memref<18x18x128xf32, #tpu.memory_space<vmem>>, vector<18x18x128xf32>
    %60 = vector.extract_strided_slice %59 {offsets = [0, 0, 0], sizes = [16, 16, 128], strides = [1, 1, 1]} : vector<18x18x128xf32> to vector<16x16x128xf32>
    %61 = vector.extract_strided_slice %59 {offsets = [0, 1, 0], sizes = [16, 16, 128], strides = [1, 1, 1]} : vector<18x18x128xf32> to vector<16x16x128xf32>
    %62 = vector.extract_strided_slice %59 {offsets = [0, 2, 0], sizes = [16, 16, 128], strides = [1, 1, 1]} : vector<18x18x128xf32> to vector<16x16x128xf32>
    %63 = vector.extract_strided_slice %59 {offsets = [1, 0, 0], sizes = [16, 16, 128], strides = [1, 1, 1]} : vector<18x18x128xf32> to vector<16x16x128xf32>
    %64 = vector.extract_strided_slice %59 {offsets = [1, 1, 0], sizes = [16, 16, 128], strides = [1, 1, 1]} : vector<18x18x128xf32> to vector<16x16x128xf32>
    %65 = vector.extract_strided_slice %59 {offsets = [1, 2, 0], sizes = [16, 16, 128], strides = [1, 1, 1]} : vector<18x18x128xf32> to vector<16x16x128xf32>
    %66 = vector.extract_strided_slice %59 {offsets = [2, 0, 0], sizes = [16, 16, 128], strides = [1, 1, 1]} : vector<18x18x128xf32> to vector<16x16x128xf32>
    %67 = vector.extract_strided_slice %59 {offsets = [2, 1, 0], sizes = [16, 16, 128], strides = [1, 1, 1]} : vector<18x18x128xf32> to vector<16x16x128xf32>
    %68 = vector.extract_strided_slice %59 {offsets = [2, 2, 0], sizes = [16, 16, 128], strides = [1, 1, 1]} : vector<18x18x128xf32> to vector<16x16x128xf32>
    %69 = tpu.concatenate %60, %61, %62, %63, %64, %65, %66, %67, %68 in 2 : vector<16x16x128xf32>, vector<16x16x128xf32>, vector<16x16x128xf32>, vector<16x16x128xf32>, vector<16x16x128xf32>, vector<16x16x128xf32>, vector<16x16x128xf32>, vector<16x16x128xf32>, vector<16x16x128xf32> -> vector<16x16x1152xf32>
    %70 = vector.shape_cast %69 : vector<16x16x1152xf32> to vector<256x1152xf32>
    %71 = arith.truncf %70 : vector<256x1152xf32> to vector<256x1152xbf16>
    %c0_57 = arith.constant 0 : index
    %c0_58 = arith.constant 0 : index
    %72 = vector.load %arg4[%c0_57, %c0_58] : memref<1152x128xbf16, #tpu.memory_space<vmem>>, vector<1152x128xbf16>
    %cst_59 = arith.constant dense<0.000000e+00> : vector<256x128xf32>
    %73 = tpu.matmul %71, %72, %cst_59 {dimension_numbers = #tpu.dot_dimension_numbers<[1], [0], [0], [1], [0, 0, 1, 1], [], []>} : vector<256x1152xbf16>, vector<1152x128xbf16>, vector<256x128xf32> -> vector<256x128xf32>
    %c0_60 = arith.constant 0 : index
    %c0_61 = arith.constant 0 : index
    %74 = vector.load %arg5[%c0_60, %c0_61] : memref<1x128xf32, #tpu.memory_space<vmem>>, vector<1x128xf32>
    %75 = vector.broadcast %74 : vector<1x128xf32> to vector<256x128xf32>
    %76 = arith.addf %73, %75 : vector<256x128xf32>
    %cst_62 = arith.constant dense<0.000000e+00> : vector<128xf32>
    %77 = vector.multi_reduction <add>, %76, %cst_62 [0] : vector<256x128xf32> to vector<128xf32>
    %78 = vector.shape_cast %77 : vector<128xf32> to vector<1x128xf32>
    %cst_63 = arith.constant 2.560000e+02 : f32
    %79 = vector.broadcast %cst_63 : f32 to vector<1x128xf32>
    %80 = arith.divf %78, %79 : vector<1x128xf32>
    %81 = vector.broadcast %80 : vector<1x128xf32> to vector<256x128xf32>
    %82 = arith.subf %76, %81 : vector<256x128xf32>
    %83 = arith.mulf %82, %82 : vector<256x128xf32>
    %cst_64 = arith.constant dense<0.000000e+00> : vector<128xf32>
    %84 = vector.multi_reduction <add>, %83, %cst_64 [0] : vector<256x128xf32> to vector<128xf32>
    %85 = vector.shape_cast %84 : vector<128xf32> to vector<1x128xf32>
    %cst_65 = arith.constant 2.560000e+02 : f32
    %86 = vector.broadcast %cst_65 : f32 to vector<1x128xf32>
    %87 = arith.divf %85, %86 : vector<1x128xf32>
    %88 = vector.broadcast %80 : vector<1x128xf32> to vector<256x128xf32>
    %89 = arith.subf %76, %88 : vector<256x128xf32>
    %cst_66 = arith.constant 9.99999974E-6 : f32
    %90 = vector.broadcast %cst_66 : f32 to vector<1x128xf32>
    %91 = arith.addf %87, %90 : vector<1x128xf32>
    %92 = math.rsqrt %91 : vector<1x128xf32>
    %93 = vector.broadcast %92 : vector<1x128xf32> to vector<256x128xf32>
    %94 = arith.mulf %89, %93 : vector<256x128xf32>
    %95 = vector.shape_cast %94 : vector<256x128xf32> to vector<16x16x128xf32>
    %96 = arith.addf %1, %95 : vector<16x16x128xf32>
    %c0_67 = arith.constant 0 : index
    %c0_68 = arith.constant 0 : index
    %c0_69 = arith.constant 0 : index
    %c0_70 = arith.constant 0 : index
    %97 = vector.load %arg6[%c0_67, %c0_68, %c0_69, %c0_70] : memref<1x16x16x128xf32, #tpu.memory_space<vmem>>, vector<1x16x16x128xf32>
    %98 = vector.shape_cast %97 : vector<1x16x16x128xf32> to vector<16x16x128xf32>
    %99 = vector.shape_cast %96 : vector<16x16x128xf32> to vector<1x16x16x128xf32>
    tpu.vector_store %arg6[%c0_67, %c0_68, %c0_69, %c0_70], %99 {strides = array<i32>} : memref<1x16x16x128xf32, #tpu.memory_space<vmem>>, vector<1x16x16x128xf32>,
    return
  }
  func.func @transform_0(%arg0: i32) -> (i32, i32, i32, i32) {
    %c0_i32 = arith.constant 0 : i32
    %c0_i32_0 = arith.constant 0 : i32
    %c0_i32_1 = arith.constant 0 : i32
    %c0_i32_2 = arith.constant 0 : i32
    return %arg0, %c0_i32, %c0_i32_0, %c0_i32_1 : i32, i32, i32, i32
  }
  func.func @transform_1(%arg0: i32) -> (i32, i32) {
    %c0_i32 = arith.constant 0 : i32
    %c0_i32_0 = arith.constant 0 : i32
    %c0_i32_1 = arith.constant 0 : i32
    return %c0_i32, %c0_i32_0 : i32, i32
  }
  func.func @transform_2(%arg0: i32) -> (i32, i32) {
    %c0_i32 = arith.constant 0 : i32
    %c0_i32_0 = arith.constant 0 : i32
    %c0_i32_1 = arith.constant 0 : i32
    return %c0_i32, %c0_i32_0 : i32, i32
  }
  func.func @transform_3(%arg0: i32) -> (i32, i32) {
    %c0_i32 = arith.constant 0 : i32
    %c0_i32_0 = arith.constant 0 : i32
    %c0_i32_1 = arith.constant 0 : i32
    return %c0_i32, %c0_i32_0 : i32, i32
  }
  func.func @transform_4(%arg0: i32) -> (i32, i32) {
    %c0_i32 = arith.constant 0 : i32
    %c0_i32_0 = arith.constant 0 : i32
    %c0_i32_1 = arith.constant 0 : i32
    return %c0_i32, %c0_i32_0 : i32, i32
  }
  func.func @transform_5(%arg0: i32) -> (i32, i32, i32, i32) {
    %c0_i32 = arith.constant 0 : i32
    %c0_i32_0 = arith.constant 0 : i32
    %c0_i32_1 = arith.constant 0 : i32
    %c0_i32_2 = arith.constant 0 : i32
    return %arg0, %c0_i32, %c0_i32_0, %c0_i32_1 : i32, i32, i32, i32
  }
}

</mosaic_0001>

<bundles_post_ra>
// kernel: resnet_block_forward.1
= control target key start
LH: loop header
LB: loop body
LE: loop exit
PB: predicated region body
PF: predicated region fallthrough
CT: control target
= control target key end

     0   :  { %10 = vsyncpa [#allocation4], 0  ;;  %s8930_s0 = inlined_call_operand.vmem [shape: f32[2,16,16,128], index: 0, kind: input, shape index: {}]   ;;  %s8931_s1 = inlined_call_operand.vmem [shape: bf16[1152,128], index: 1, kind: input, shape index: {}]   ;;  %s8932_s2 = inlined_call_operand.vmem [shape: f32[1,128], index: 2, kind: input, shape index: {}]   ;;  %s8933_s3 = inlined_call_operand.vmem [shape: bf16[1152,128], index: 3, kind: input, shape index: {}]   ;;  %s8934_s4 = inlined_call_operand.vmem [shape: f32[1,128], index: 4, kind: input, shape index: {}]   ;;  %s8935_s5 = inlined_call_operand.hbm [shape: f32[2,16,16,128], index: 5, kind: output, shape index: {}]  }
   0x1   :  { %12 = vsyncpa [#allocation4 + $0x1], 0  ;;  %s6026_s18 = smov 0   ;;  %s6028_s19 = smov 0  }
   0x2   :  { %s6030_s20 = smov 0   ;;  %s6032_s21 = smov 0  }
   0x3 LB: > { %s6047_s22 = sadd.s32 4294967295, %s5991_s21   ;;  %s4539_s23 = sadd.s32 4294967294, %s5991_s21   ;;  %s5991_s21 = sphi %s6032_s21, %s9121_s21   ;;  %s5987_s20 = sphi %s6030_s20, %s9120_s20   ;;  %s5983_s19 = sphi %s6028_s19, %s9119_s19   ;;  %s5979_s18 = sphi %s6026_s18, %s9118_s18  }
   0x4   : > { %s6051_s24 = sadd.s32 1, %s5991_s21   ;;  %s135_s25 = sadd.s32 1, %s5987_s20 }
   0x5   : > { %s132_s26 = ssub.s32 %s5991_s21, %s6051_s24  ;;  %p145_p0 = scmp.ne.s32.totalorder %s5987_s20, %s5983_s19 }
   0x6   : > { %p133_p1 = scmp.eq.s32.totalorder %s132_s26, 0  ;;  %p146_p2 = scmp.eq.s32.totalorder %s6047_s22, 1 }
   0x7   : > { %p151_p3 = scmp.ne.s32.totalorder %s5983_s19, %s5979_s18  ;;  %p152_p4 = scmp.eq.s32.totalorder %s4539_s23, 1 }
   0x8   : > { %s6062_s27 = scalar_select %p133_p1, %s5987_s20, %s135_s25  }
   0x9   : > { %p6064_p5 = por %p146_p2, %p145_p0  ;;  %p6068_p6 = por %p152_p4, %p151_p3 }
   0xa   : > { %p4542_p7 = scmp.ge.s32.totalorder %s5991_s21, 1  ;;  %p190_p8 = scmp.lt.s32.totalorder %s5991_s21, 3 }
   0xc   : > { %p191_p9 = pnand %p4542_p7, %p190_p8 }
   0xe   : > { %194 = sbr.rel (%p191_p9) target bundleno = 1447 (0x5a7), region = 40 }
  0x15   : > { %v5780_v0 = vld [vmem:[%s8931_s1 + $0x40] sm:$0xff]   ;;  %v5784_v4 = vld [vmem:[%s8931_s1 + $0x48] sm:$0xff]   ;;  %v5788_v8 = vld [vmem:[%s8931_s1 + $0x50] sm:$0xff]   ;;  %p218_p10 = scmp.lt.s32.totalorder %s6047_s22, 1  ;;  %vm438_vm0 = vcmask 1046528   ;;  %vm551_vm1 = vcmask 1045504  }
  0x16   : > { %v5781_v1 = vld [vmem:[%s8931_s1] sm:$0xff]   ;;  %4699 = vmatprep.subr.bf16.mxu0 %v5780_v0  ;;  %v5785_v5 = vld [vmem:[%s8931_s1 + $0x8] sm:$0xff]   ;;  %v5789_v9 = vld [vmem:[%s8931_s1 + $0x10] sm:$0xff]   ;;  %s215_s23 = sand.u32 1, %s5983_s19   ;;  %s4698_s30 = sshll.u32 %s6047_s22, 12 }
  0x17   : > { %v5782_v2 = vld [vmem:[%s8931_s1 + $0xc0] sm:$0xff]   ;;  %4700 = vmatpush3.bf16.msra.mxu0 %v5781_v1  ;;  %v5786_v6 = vld [vmem:[%s8931_s1 + $0xc8] sm:$0xff]   ;;  %v5790_v10 = vld [vmem:[%s8931_s1 + $0xd0] sm:$0xff]   ;;  %s219_s17 = scalar_select %p218_p10, %s6047_s22, 1 }
  0x18   : > { %v5783_v3 = vld [vmem:[%s8931_s1 + $0x80] sm:$0xff]   ;;  %4811 = vmatprep.subr.bf16.mxu1 %v5782_v2  ;;  %4701 = vmatprep.subr.bf16.mxu0 %v5784_v4  ;;  %v5787_v7 = vld [vmem:[%s8931_s1 + $0x88] sm:$0xff]   ;;  %v5791_v11 = vld [vmem:[%s8931_s1 + $0x90] sm:$0xff]   ;;  %s4543_s25 = sshll.u32 %s215_s23, 8  ;;  %s8889_s8 = scalar_lea.sflag [#allocation4], %s215_s23 }
  0x19   : > { %4812 = vmatpush3.bf16.msra.mxu1 %v5783_v3  ;;  %v5792_v12 = vld [vmem:[%s8931_s1 + $0x58] sm:$0xff]   ;;  %v5796_v16 = vld [vmem:[%s8931_s1 + $0x60] sm:$0xff]   ;;  %v5800_v20 = vld [vmem:[%s8931_s1 + $0x68] sm:$0xff]   ;;  %s4697_s10 = sshll.u32 %s219_s17, 8  ;;  %s8796_s17 = scalar_lea.vmem [#allocation3], %s4543_s25 }
  0x1a   : > { %4813 = vmatprep.subr.bf16.mxu1 %v5786_v6  ;;  %v5793_v13 = vld [vmem:[%s8931_s1 + $0x18] sm:$0xff]   ;;  %v5797_v17 = vld [vmem:[%s8931_s1 + $0x20] sm:$0xff]   ;;  %v5801_v21 = vld [vmem:[%s8931_s1 + $0x28] sm:$0xff]   ;;  %s6166_s26 = scalar_lea.vmem %s8930_s0, %s4697_s10  ;;  %s4477_s6 = sshll.u32 %s8796_s17, 4  ;;  %s8869_s6 = int_to_ptr.vmem [resolvable:$true] %s4477_s6 }
  0x1b   : > { %4702 = vmatpush3.bf16.msra.mxu0 %v5785_v5  ;;  %v5794_v14 = vld [vmem:[%s8931_s1 + $0xd8] sm:$0xff]   ;;  %v5798_v18 = vld [vmem:[%s8931_s1 + $0xe0] sm:$0xff]   ;;  %v5802_v22 = vld [vmem:[%s8931_s1 + $0xe8] sm:$0xff]   ;;  %s5929_s9 = scalar_lea.vmem %s8869_s6, 4096  ;;  %s5993_s10 = smov [#allocation3]  }
  0x1c   : > { %4703 = vmatprep.subr.bf16.mxu0 %v5788_v8  ;;  %v5795_v15 = vld [vmem:[%s8931_s1 + $0x98] sm:$0xff]   ;;  %v5799_v19 = vld [vmem:[%s8931_s1 + $0xa0] sm:$0xff]   ;;  %v5803_v23 = vld [vmem:[%s8931_s1 + $0xa8] sm:$0xff]   ;;  %p5930_p11 = scmp.ne.s32.totalorder %s8869_s6, %s5929_s9  ;;  %s5933_s11 = sshll.u32 %s5993_s10, 4  ;;  %s5934_s11 = int_to_ptr.vmem [resolvable:$false] %s5933_s11 }
  0x1d   : > { %4814 = vmatpush3.bf16.msra.mxu1 %v5787_v7  ;;  %v5804_v24 = vld [vmem:[%s8931_s1 + $0x70] sm:$0xff]   ;;  %v5808_v28 = vld [vmem:[%s8931_s1 + $0x78] sm:$0xff]   ;;  %v5812_v34 = vld [vmem:[%s8931_s1 + $0x140] sm:$0xff]   ;;  %s5935_s12 = scalar_lea.vmem %s5934_s11, 8192  ;;  %p5936_p0 = scmp.lt.s32.totalorder %s8869_s6, %s5934_s11 }
  0x1e   : > { %4815 = vmatprep.subr.bf16.mxu1 %v5790_v10  ;;  %v5805_v25 = vld [vmem:[%s8931_s1 + $0x30] sm:$0xff]   ;;  %v5809_v29 = vld [vmem:[%s8931_s1 + $0x38] sm:$0xff]   ;;  %v6191_v35 = vld [vmem:[%s6166_s26] sm:$0xff]  ;;  %p5931_p12 = pnand %p5930_p11, %p6064_p5  ;;  %p5937_p1 = scmp.lt.s32.totalorder %s5935_s12, %s5929_s9 }
  0x1f   : > { %4704 = vmatpush3.bf16.msra.mxu0 %v5789_v9  ;;  %v5806_v26 = vld [vmem:[%s8931_s1 + $0xf0] sm:$0xff]   ;;  %v5810_v30 = vld [vmem:[%s8931_s1 + $0xf8] sm:$0xff]   ;;  %8979 = vst [vmem:[#allocation8_spill] sm:$0xff] %v6191_v35  ;;  %v6194_v36 = vld [vmem:[%s6166_s26 + $0x8] sm:$0xff] }
  0x20   : > { %4705 = vmatprep.subr.bf16.mxu0 %v5792_v12  ;;  %v5807_v27 = vld [vmem:[%s8931_s1 + $0xb0] sm:$0xff]   ;;  %v6178_v32 = vld [vmem:[%s6166_s26 + $0x18] sm:$0xff]  ;;  %8980 = vst [vmem:[#allocation9_spill] sm:$0xff] %v6194_v36  ;;  %257 = vst [vmem:[#allocation2 + $0x19] sm:$0xff] %v6191_v35  ;;  %p5932_p13 = pneg %p5931_p12  ;;  %p5938_p2 = por %p5937_p1, %p5936_p0 }
  0x21   : > { %4816 = vmatpush3.bf16.msra.mxu1 %v5791_v11  ;;  %v6175_v31 = vld [vmem:[%s6166_s26 + $0x10] sm:$0xff]  ;;  %8978 = vst [vmem:[#allocation7_spill] sm:$0xff] %v6178_v32  ;;  %260 = vst [vmem:[#allocation2 + $0x39] sm:$0xff] %v6178_v32  ;;  %v5811_v33 = vld [vmem:[%s8931_s1 + $0xb8] sm:$0xff]  }
  0x22   : > { %4817 = vmatprep.subr.bf16.mxu1 %v5794_v14  ;;  %8977 = vst [vmem:[#allocation6_spill] sm:$0xff] %v6175_v31  ;;  %259 = vst [vmem:[#allocation2 + $0x31] sm:$0xff] %v6175_v31  ;;  %v6201_v37 = vld [vmem:[%s6166_s26 + $0x20] sm:$0xff]  ;;  %v6204_v38 = vld [vmem:[%s6166_s26 + $0x28] sm:$0xff]  ;;  %p5939_p3 = pnand %p5938_p2, %p5932_p13 }
  0x23   : > { %4706 = vmatpush3.bf16.msra.mxu0 %v5793_v13  ;;  %290 = vst [vmem:[#allocation2 + $0x2f] sm:$0x2] %v6175_v31  ;;  %306 = vst [vmem:[#allocation2 + $0x3b] sm:$0x40] %v6178_v32  ;;  %v6211_v39 = vld [vmem:[%s6166_s26 + $0x30] sm:$0xff]  ;;  %v6214_v40 = vld [vmem:[%s6166_s26 + $0x38] sm:$0xff] }
  0x24   : > { %4707 = vmatprep.subr.bf16.mxu0 %v5796_v16  ;;  %289 = vst [vmem:[#allocation2 + $0x17] sm:$0x2] %v6191_v35  ;;  %258 = vst [vmem:[#allocation2 + $0x21] sm:$0xff] %v6194_v36  ;;  %v6225_v48 = vld [vmem:[%s6166_s26 + $0x40] sm:$0xff]  ;;  %v6236_v53 = vld [vmem:[%s6166_s26 + $0x48] sm:$0xff] }
  0x25   : > { %4818 = vmatpush3.bf16.msra.mxu1 %v5795_v15  ;;  %305 = vst [vmem:[#allocation2 + $0x23] sm:$0x40] %v6194_v36  ;;  %8981 = vst [vmem:[#allocation10_spill] sm:$0xff] %v6201_v37  ;;  %v6246_v57 = vld [vmem:[%s6166_s26 + $0x50] sm:$0xff]  ;;  %v6249_v58 = vld [vmem:[%s6166_s26 + $0x58] sm:$0xff] }
  0x26   : > { %4819 = vmatprep.subr.bf16.mxu1 %v5798_v18  ;;  %8982 = vst [vmem:[#allocation11_spill] sm:$0xff] %v6204_v38  ;;  %261 = vst [vmem:[#allocation2 + $0x49] sm:$0xff] %v6201_v37  ;;  %v6264_v2 = vld [vmem:[%s6166_s26 + $0x60] sm:$0xff]  ;;  %v6272_v6 = vld [vmem:[%s6166_s26 + $0x68] sm:$0xff] }
  0x27   : > { %4708 = vmatpush3.bf16.msra.mxu0 %v5797_v17  ;;  %262 = vst [vmem:[#allocation2 + $0x51] sm:$0xff] %v6204_v38  ;;  %291 = vst [vmem:[#allocation2 + $0x47] sm:$0x2] %v6201_v37  ;;  %v5813_v12 = vld [vmem:[%s8931_s1 + $0x100] sm:$0xff]   ;;  %v6290_v15 = vld [vmem:[%s6166_s26 + $0x70] sm:$0xff] }
  0x28   : > { %4709 = vmatprep.subr.bf16.mxu0 %v5800_v20  ;;  %307 = vst [vmem:[#allocation2 + $0x53] sm:$0x40] %v6204_v38  ;;  %8983 = vst [vmem:[#allocation12_spill] sm:$0xff] %v6211_v39  ;;  %v5814_v17 = vld [vmem:[%s8931_s1 + $0x148] sm:$0xff]   ;;  %v6297_v18 = vld [vmem:[%s6166_s26 + $0x78] sm:$0xff] }
  0x29   : > { %4820 = vmatpush3.bf16.msra.mxu1 %v5799_v19  ;;  %8984 = vst [vmem:[#allocation13_spill] sm:$0xff] %v6214_v40  ;;  %263 = vst [vmem:[#allocation2 + $0x61] sm:$0xff] %v6211_v39  ;;  %v323_v43 = vld [vmem:[#allocation2 + $0x38] sm:$0xff]  ;;  %v5815_v19 = vld [vmem:[%s8931_s1 + $0x108] sm:$0xff]  }
  0x2a   : > { %4821 = vmatprep.subr.bf16.mxu1 %v5802_v22  ;;  %v322_v41 = vld [vmem:[#allocation2 + $0x30] sm:$0xff]  ;;  %v324_v42 = vld [vmem:[#allocation2 + $0x40] sm:$0x3]  ;;  %264 = vst [vmem:[#allocation2 + $0x69] sm:$0xff] %v6214_v40  ;;  %292 = vst [vmem:[#allocation2 + $0x5f] sm:$0x2] %v6211_v39 }
  0x2b   : > { %4710 = vmatpush3.bf16.msra.mxu0 %v5801_v21  ;;  %308 = vst [vmem:[#allocation2 + $0x6b] sm:$0x40] %v6214_v40  ;;  %327 = vst [vmem:[#allocation2 + $0x10] sm:$0x3] %v324_v42  ;;  %v6220_v44 = vld [vmem:[#allocation2 + $0x18] sm:$0xff]  ;;  %v439_v45 = vrot.slane %v322_v41, 1  ;;  %v6266_v3 = vpack.c.bf16 %v323_v43, %v322_v41 }
  0x2c   : > { %4711 = vmatprep.subr.bf16.mxu0 %v5804_v24  ;;  %v6222_v46 = vld [vmem:[#allocation2 + $0x20] sm:$0xff]  ;;  %v341_v47 = vld [vmem:[#allocation2 + $0x28] sm:$0x3]  ;;  %8985 = vst [vmem:[#allocation14_spill] sm:$0xff] %v6225_v48  ;;  %v6227_v49 = vrot.slane %v323_v43, 1  ;;  %v552_v51 = vrot.slane %v322_v41, 2 }
  0x2d   : > { %4822 = vmatpush3.bf16.msra.mxu1 %v5803_v23  ;;  %v6231_v50 = vpack.c.bf16 %v6222_v46, %v6220_v44  ;;  %v6233_v52 = vrot.slane %v323_v43, 2  ;;  %8986 = vst [vmem:[#allocation15_spill] sm:$0xff] %v6236_v53  ;;  %265 = vst [vmem:[#allocation2 + $0x79] sm:$0xff] %v6225_v48  ;;  %v444_v54 = vrot.slane %v6220_v44, 1  ;;  %v445_v55 = vrot.slane %v6222_v46, 1  ;;  %v5821_v24 = vld [vmem:[%s8931_s1 + $0x1c0] sm:$0xff]  }
  0x2e   : > { %4823 = vmatprep.subr.bf16.mxu1 %v5806_v26  ;;  %293 = vst [vmem:[#allocation2 + $0x77] sm:$0x2] %v6225_v48  ;;  %v447_v56 = vrot.slane %v341_v47, 1  ;;  %266 = vst [vmem:[#allocation2 + $0x81] sm:$0xff] %v6236_v53  ;;  %v441_v60 = vsel %vm438_vm0, %v439_v45, %v6227_v49  ;;  %v557_v4 = vrot.slane %v6220_v44, 2  ;;  %v558_v9 = vrot.slane %v6222_v46, 2 }
  0x2f   : > { %4712 = vmatpush3.bf16.msra.mxu0 %v5805_v25  ;;  %309 = vst [vmem:[#allocation2 + $0x83] sm:$0x40] %v6236_v53  ;;  %1528 = vmatprep.mubr.bf16.mxu1 %v6231_v50  ;;  %8987 = vst [vmem:[#allocation16_spill] sm:$0xff] %v6246_v57  ;;  %v6259_v61 = vsel %vm551_vm1, %v552_v51, %v6233_v52  ;;  %v446_v0 = vsel %vm438_vm0, %v444_v54, %v445_v55  ;;  %v6269_v5 = vld [vmem:[#allocation2 + $0x40] sm:$0x3]  ;;  %v560_v10 = vrot.slane %v341_v47, 2 }
  0x30   : > { %4713 = vmatprep.subr.bf16.mxu0 %v5808_v28  ;;  %8988 = vst [vmem:[#allocation17_spill] sm:$0xff] %v6249_v58  ;;  %267 = vst [vmem:[#allocation2 + $0x91] sm:$0xff] %v6246_v57  ;;  %v448_v1 = vsel %vm438_vm0, %v445_v55, %v447_v56  ;;  %v452_v16 = vrot.slane %v6269_v5, 1  ;;  %v559_v20 = vsel %vm551_vm1, %v557_v4, %v558_v9  ;;  %v6310_v22 = vld [vmem:[#allocation2 + $0x48] sm:$0xff]  ;;  %v6312_v23 = vld [vmem:[#allocation2 + $0x50] sm:$0xff] }
  0x31   : > { %4824 = vmatpush3.bf16.msra.mxu1 %v5807_v27  ;;  %268 = vst [vmem:[#allocation2 + $0x99] sm:$0xff] %v6249_v58  ;;  %294 = vst [vmem:[#allocation2 + $0x8f] sm:$0x2] %v6246_v57  ;;  %v6287_v14 = vpack.c.bf16 %v448_v1, %v446_v0  ;;  %v561_v21 = vsel %vm551_vm1, %v558_v9, %v560_v10  ;;  %v5816_v26 = vld [vmem:[%s8931_s1 + $0x150] sm:$0xff]   ;;  %v6324_v27 = vld [vmem:[%s6166_s26 + $0x80] sm:$0xff]  ;;  %v454_v42 = vrot.slane %v6310_v22, 1 }
  0x32   : > { %4825 = vmatprep.subr.bf16.mxu1 %v5810_v30  ;;  %310 = vst [vmem:[#allocation2 + $0x9b] sm:$0x40] %v6249_v58  ;;  %v338_v59 = vld [vmem:[#allocation2 + $0x10] sm:$0x3]  ;;  %8989 = vst [vmem:[#allocation18_spill] sm:$0xff] %v6264_v2  ;;  %v453_v25 = vsel %vm438_vm0, %v6227_v49, %v452_v16  ;;  %v6327_v28 = vld [vmem:[%s6166_s26 + $0x88] sm:$0xff] }
  0x33   : > { %4714 = vmatpush3.bf16.msra.mxu0 %v5809_v29  ;;  %v442_v62 = vrot.slane %v338_v59, 1  ;;  %v555_v63 = vrot.slane %v338_v59, 2  ;;  %8990 = vst [vmem:[#allocation19_spill] sm:$0xff] %v6272_v6  ;;  %269 = vst [vmem:[#allocation2 + $0xa9] sm:$0xff] %v6264_v2  ;;  %v6329_v29 = vpack.c.bf16 %v561_v21, %v559_v20  ;;  %v6331_v30 = vld [vmem:[#allocation2 + $0x58] sm:$0x3]  ;;  %v6342_v41 = vpack.c.bf16 %v453_v25, %v441_v60 }
  0x34   : > { %4923 = vmatprep.subr.bf16.mxu0 %v5812_v34  ;;  %295 = vst [vmem:[#allocation2 + $0xa7] sm:$0x2] %v6264_v2  ;;  %270 = vst [vmem:[#allocation2 + $0xb1] sm:$0xff] %v6272_v6  ;;  %v565_v34 = vrot.slane %v6269_v5, 2  ;;  %v5817_v43 = vld [vmem:[%s8931_s1 + $0x110] sm:$0xff]   ;;  %v455_v44 = vrot.slane %v6312_v23, 1 }
  0x35   : > { %4826 = vmatpush3.bf16.msra.mxu1 %v5811_v33  ;;  %v443_v7 = vsel %vm438_vm0, %v6227_v49, %v442_v62  ;;  %v556_v8 = vsel %vm551_vm1, %v6233_v52, %v555_v63  ;;  %311 = vst [vmem:[#allocation2 + $0xb3] sm:$0x40] %v6272_v6  ;;  %8991 = vst [vmem:[#allocation20_spill] sm:$0xff] %v6290_v15  ;;  %v6339_v33 = vpack.c.bf16 %v6312_v23, %v6310_v22  ;;  %v5818_v46 = vld [vmem:[%s8931_s1 + $0x158] sm:$0xff]   ;;  %v5823_v47 = vld [vmem:[%s8931_s1 + $0x180] sm:$0xff]  }
  0x36   : > { %v699_v11 = vpack.c.bf16 %v443_v7, %v441_v60  ;;  %v700_v13 = vpack.c.bf16 %v556_v8, %v6259_v61  ;;  %8992 = vst [vmem:[#allocation21_spill] sm:$0xff] %v6297_v18  ;;  %271 = vst [vmem:[#allocation2 + $0xc1] sm:$0xff] %v6290_v15  ;;  %5035 = vmatprep.subr.bf16.mxu1 %v5821_v24  ;;  %v457_v45 = vrot.slane %v6331_v30, 1  ;;  %v6358_v49 = vld [vmem:[%s6166_s26 + $0x90] sm:$0xff]  ;;  %v6361_v51 = vld [vmem:[%s6166_s26 + $0x98] sm:$0xff]  ;;  %v567_v1 = vrot.slane %v6310_v22, 2 }
  0x37   : > { %296 = vst [vmem:[#allocation2 + $0xbf] sm:$0x2] %v6290_v15  ;;  %272 = vst [vmem:[#allocation2 + $0xc9] sm:$0xff] %v6297_v18  ;;  %v566_v54 = vsel %vm551_vm1, %v6233_v52, %v565_v34  ;;  %v6367_v55 = vld [vmem:[#allocation2 + $0x60] sm:$0xff]  ;;  %v6374_v56 = vld [vmem:[#allocation2 + $0x68] sm:$0xff]  ;;  %v456_v52 = vsel %vm438_vm0, %v454_v42, %v455_v44  ;;  %v568_v4 = vrot.slane %v6312_v23, 2 }
  0x38   : > { %1367 = vmatprep.mubr.bf16.mxu0 %v699_v11  ;;  %1529 = vmatmul.mubr.bf16.vlgmr.msra.gmra.mrb[0].mxu1 %v700_v13  ;;  %312 = vst [vmem:[#allocation2 + $0xcb] sm:$0x40] %v6297_v18  ;;  %8993 = vst [vmem:[#allocation22_spill] sm:$0xff] %v6324_v27  ;;  %v458_v59 = vsel %vm438_vm0, %v455_v44, %v457_v45  ;;  %v6381_v60 = vld [vmem:[#allocation2 + $0x70] sm:$0x3]  ;;  %v5820_v62 = vld [vmem:[%s8931_s1 + $0x160] sm:$0xff]   ;;  %v6390_v0 = vpack.c.bf16 %v566_v54, %v6259_v61 }
  0x39   : > { %1368 = vmatmul.mubr.bf16.vlgmr.msra.gmra.mrb[0].mxu0 %v6266_v3  ;;  %1536 = vmatprep.mubr.bf16.mxu1 %v6266_v3  ;;  %8994 = vst [vmem:[#allocation23_spill] sm:$0xff] %v6327_v28  ;;  %273 = vst [vmem:[#allocation2 + $0xd9] sm:$0xff] %v6324_v27  ;;  %v5825_v63 = vld [vmem:[%s8931_s1 + $0x1c8] sm:$0xff]   ;;  %v570_v5 = vrot.slane %v6331_v30, 2  ;;  %v6396_v7 = vld [vmem:[%s6166_s26 + $0xa0] sm:$0xff]  ;;  %v6400_v8 = vpack.c.bf16 %v6374_v56, %v6367_v55  ;;  %v6407_v61 = vpack.c.bf16 %v458_v59, %v456_v52 }
  0x3a   : > { %4924 = vmatpush3.bf16.msra.mxu0 %v5813_v12  ;;  %1375 = vmatprep.mubr.bf16.mxu0 %v6287_v14  ;;  %274 = vst [vmem:[#allocation2 + $0xe1] sm:$0xff] %v6327_v28  ;;  %297 = vst [vmem:[#allocation2 + $0xd7] sm:$0x2] %v6324_v27  ;;  %v6403_v9 = vld [vmem:[%s6166_s26 + $0xa8] sm:$0xff]  ;;  %v459_v10 = vrot.slane %v6367_v55, 1  ;;  %v5822_v11 = vld [vmem:[%s8931_s1 + $0x120] sm:$0xff]  }
  0x3b   : > { %4925 = vmatprep.subr.bf16.mxu0 %v5814_v17  ;;  %313 = vst [vmem:[#allocation2 + $0xe3] sm:$0x40] %v6327_v28  ;;  %8995 = vst [vmem:[#allocation24_spill] sm:$0xff] %v6358_v49  ;;  %5036 = vmatpush3.bf16.msra.mxu1 %v5823_v47  ;;  %v460_v12 = vrot.slane %v6374_v56, 1  ;;  %v462_v13 = vrot.slane %v6381_v60, 1  ;;  %v5824_v16 = vld [vmem:[%s8931_s1 + $0x168] sm:$0xff]   ;;  %v571_v20 = vsel %vm551_vm1, %v568_v4, %v570_v5 }
  0x3c   : > { %8996 = vst [vmem:[#allocation25_spill] sm:$0xff] %v6361_v51  ;;  %275 = vst [vmem:[#allocation2 + $0xf1] sm:$0xff] %v6358_v49  ;;  %5037 = vmatprep.subr.bf16.mxu1 %v5825_v63  ;;  %v5827_v17 = vld [vmem:[%s8931_s1 + $0x188] sm:$0xff]   ;;  %v6426_v21 = vld [vmem:[#allocation2 + $0x78] sm:$0xff]  ;;  %v573_v47 = vrot.slane %v6374_v56, 2  ;;  %v575_v54 = vrot.slane %v6381_v60, 2 }
  0x3d   : > { %276 = vst [vmem:[#allocation2 + $0xf9] sm:$0xff] %v6361_v51  ;;  %298 = vst [vmem:[#allocation2 + $0xef] sm:$0x2] %v6358_v49  ;;  %v6428_v22 = vld [vmem:[#allocation2 + $0x80] sm:$0xff]  ;;  %v6430_v23 = vld [vmem:[#allocation2 + $0x88] sm:$0x3]  ;;  %v461_v34 = vsel %vm438_vm0, %v459_v10, %v460_v12  ;;  %v463_v42 = vsel %vm438_vm0, %v460_v12, %v462_v13 }
  0x3e   : > { %4926 = vmatpush3.bf16.msra.mxu0 %v5815_v19  ;;  %314 = vst [vmem:[#allocation2 + $0xfb] sm:$0x40] %v6361_v51  ;;  %8997 = vst [vmem:[#allocation26_spill] sm:$0xff] %v6396_v7  ;;  %v569_v19 = vsel %vm551_vm1, %v567_v1, %v568_v4  ;;  %v6435_v24 = vld [vmem:[%s6166_s26 + $0xb0] sm:$0xff]  ;;  %v6438_v25 = vld [vmem:[%s6166_s26 + $0xb8] sm:$0xff]  ;;  %v465_v63 = vrot.slane %v6428_v22, 1  ;;  %v6486_v60 = vpack.c.bf16 %v463_v42, %v461_v34 }
  0x3f   : > { %4927 = vmatprep.subr.bf16.mxu0 %v5816_v26  ;;  %8998 = vst [vmem:[#allocation27_spill] sm:$0xff] %v6403_v9  ;;  %277 = vst [vmem:[#allocation2 + $0x109] sm:$0xff] %v6396_v7  ;;  %v5826_v26 = vld [vmem:[%s8931_s1 + $0x128] sm:$0xff]   ;;  %v6448_v30 = vpack.c.bf16 %v571_v20, %v569_v19  ;;  %5038 = vmatpush3.bf16.msra.mxu1 %v5827_v17  ;;  %v5828_v44 = vld [vmem:[%s8931_s1 + $0x170] sm:$0xff]   ;;  %v467_v1 = vrot.slane %v6430_v23, 1 }
  0x40   : > { %1537 = vmatmul.mubr.bf16.gmra.mrb[4].mxu1 %v6329_v29  ;;  %299 = vst [vmem:[#allocation2 + $0x107] sm:$0x2] %v6396_v7  ;;  %278 = vst [vmem:[#allocation2 + $0x111] sm:$0xff] %v6403_v9  ;;  %v5829_v45 = vld [vmem:[%s8931_s1 + $0x1d0] sm:$0xff]   ;;  %v6468_v52 = vld [vmem:[#allocation2 + $0x98] sm:$0xff] }
  0x41   : > { %1376 = vmatmul.mubr.bf16.gmra.mrb[4].mxu0 %v6231_v50  ;;  %1544 = vmatprep.mubr.bf16.mxu1 %v6339_v33  ;;  %v5819_v50 = vld [vmem:[%s8931_s1 + $0x118] sm:$0xff]   ;;  %315 = vst [vmem:[#allocation2 + $0x113] sm:$0x40] %v6403_v9  ;;  %8999 = vst [vmem:[#allocation28_spill] sm:$0xff] %v6435_v24  ;;  %v6471_v59 = vld [vmem:[%s6166_s26 + $0xc0] sm:$0xff]  ;;  %v9011_v9 = vrot.slane %v6468_v52, 1 }
  0x42   : > { %1383 = vmatprep.mubr.bf16.mxu0 %v6342_v41  ;;  %4928 = vmatpush3.bf16.msra.mxu0 %v5817_v43  ;;  %9000 = vst [vmem:[#allocation29_spill] sm:$0xff] %v6438_v25  ;;  %279 = vst [vmem:[#allocation2 + $0x121] sm:$0xff] %v6435_v24  ;;  %v572_v43 = vrot.slane %v6367_v55, 2  ;;  %v464_v55 = vrot.slane %v6426_v21, 1  ;;  %v6480_v5 = vld [vmem:[#allocation2 + $0xa0] sm:$0x3] }
  0x43   : > { %4929 = vmatprep.subr.bf16.mxu0 %v5818_v46  ;;  %280 = vst [vmem:[#allocation2 + $0x129] sm:$0xff] %v6438_v25  ;;  %300 = vst [vmem:[#allocation2 + $0x11f] sm:$0x2] %v6435_v24  ;;  %v6461_v46 = vpack.c.bf16 %v6428_v22, %v6426_v21  ;;  %5039 = vmatprep.subr.bf16.mxu1 %v5829_v45  ;;  %v5830_v12 = vld [vmem:[%s8931_s1 + $0x130] sm:$0xff]   ;;  %v6496_v17 = vld [vmem:[#allocation2 + $0xa8] sm:$0xff] }
  0x44   : > { %316 = vst [vmem:[#allocation2 + $0x12b] sm:$0x40] %v6438_v25  ;;  %9001 = vst [vmem:[#allocation30_spill] sm:$0xff] %v6471_v59  ;;  %v5831_v19 = vld [vmem:[%s8931_s1 + $0x190] sm:$0xff]   ;;  %v6510_v45 = vld [vmem:[%s6166_s26 + $0xd8] sm:$0xff]  ;;  %v466_v4 = vsel %vm438_vm0, %v464_v55, %v465_v63 }
  0x45   : > { %281 = vst [vmem:[#allocation2 + $0x139] sm:$0xff] %v6471_v59  ;;  %301 = vst [vmem:[#allocation2 + $0x137] sm:$0x2] %v6471_v59  ;;  %v6502_v20 = vld [vmem:[%s6166_s26 + $0xd0] sm:$0xff]  ;;  %v6530_v13 = vld [vmem:[#allocation2 + $0xc8] sm:$0xff]  ;;  %5040 = vmatpush3.bf16.msra.mxu1 %v5831_v19  ;;  %v9009_v59 = vrot.slane %v6430_v23, 2 }
  0x46   : > { %4930 = vmatpush3.bf16.msra.mxu0 %v5819_v50  ;;  %v6466_v50 = vld [vmem:[#allocation2 + $0x90] sm:$0xff]  ;;  %9003 = vst [vmem:[#allocation32_spill] sm:$0xff] %v6502_v20  ;;  %9004 = vst [vmem:[#allocation33_spill] sm:$0xff] %v6510_v45  ;;  %v5832_v34 = vld [vmem:[%s8931_s1 + $0x1d8] sm:$0xff]   ;;  %v9013_v23 = vrot.slane %v6480_v5, 1  ;;  %v9029_v58 = vrot.slane %v6530_v13, 1 }
  0x47   : > { %4931 = vmatprep.subr.bf16.mxu0 %v5820_v62  ;;  %v6474_v62 = vld [vmem:[%s6166_s26 + $0xc8] sm:$0xff]  ;;  %v6507_v42 = vld [vmem:[#allocation2 + $0xb0] sm:$0xff]  ;;  %283 = vst [vmem:[#allocation2 + $0x151] sm:$0xff] %v6502_v20  ;;  %302 = vst [vmem:[#allocation2 + $0x14f] sm:$0x2] %v6502_v20  ;;  %5041 = vmatprep.subr.bf16.mxu1 %v5832_v34  ;;  %v9007_v20 = vrot.slane %v6428_v22, 2  ;;  %v9014_v22 = vmov %v9011_v9 }
  0x48   : > { %1545 = vmatmul.mubr.bf16.gmra.mrb[8].mxu1 %v6390_v0  ;;  %9002 = vst [vmem:[#allocation31_spill] sm:$0xff] %v6474_v62  ;;  %282 = vst [vmem:[#allocation2 + $0x141] sm:$0xff] %v6474_v62  ;;  %v6522_v10 = vld [vmem:[#allocation2 + $0xd0] sm:$0x3]  ;;  %v5834_v34 = vld [vmem:[%s8931_s1 + $0x178] sm:$0xff]  }
  0x49   : > { %1384 = vmatmul.mubr.bf16.gmra.mrb[8].mxu0 %v6266_v3  ;;  %1552 = vmatprep.mubr.bf16.mxu1 %v6400_v8  ;;  %317 = vst [vmem:[#allocation2 + $0x143] sm:$0x40] %v6474_v62  ;;  %284 = vst [vmem:[#allocation2 + $0x159] sm:$0xff] %v6510_v45  ;;  %v6566_v56 = vld [vmem:[%s6166_s26 + $0xe0] sm:$0xff]  ;;  %v6569_v62 = vld [vmem:[%s6166_s26 + $0xe8] sm:$0xff] }
  0x4a   : > { %1391 = vmatprep.mubr.bf16.mxu0 %v6407_v61  ;;  %4932 = vmatpush3.bf16.msra.mxu0 %v5822_v11  ;;  %v6489_v11 = vld [vmem:[#allocation2 + $0xb8] sm:$0x3]  ;;  %318 = vst [vmem:[#allocation2 + $0x15b] sm:$0x40] %v6510_v45  ;;  %v6551_v45 = vpack.c.bf16 %v6468_v52, %v6466_v50  ;;  %9005 = vst [vmem:[#allocation34_spill] sm:$0xff] %v6566_v56  ;;  %v5836_v24 = vld [vmem:[%s8931_s1 + $0x1e0] sm:$0xff]  }
  0x4b   : > { %4933 = vmatprep.subr.bf16.mxu0 %v5824_v16  ;;  %v6520_v16 = vld [vmem:[#allocation2 + $0xc0] sm:$0xff]  ;;  %9006 = vst [vmem:[#allocation35_spill] sm:$0xff] %v6569_v62  ;;  %285 = vst [vmem:[#allocation2 + $0x169] sm:$0xff] %v6566_v56  ;;  %v6582_v19 = vld [vmem:[#allocation2 + $0xf8] sm:$0xff] }
  0x4c   : > { %286 = vst [vmem:[#allocation2 + $0x171] sm:$0xff] %v6569_v62  ;;  %303 = vst [vmem:[#allocation2 + $0x167] sm:$0x2] %v6566_v56  ;;  %v5837_v7 = vld [vmem:[%s8931_s1 + $0x1a0] sm:$0xff]   ;;  %v6643_v25 = vld [vmem:[#allocation2 + $0x110] sm:$0xff]  ;;  %v9030_v57 = vrot.slane %v6520_v16, 1 }
  0x4d   : > { %319 = vst [vmem:[#allocation2 + $0x173] sm:$0x40] %v6569_v62  ;;  %v6683_v28 = vld [vmem:[#allocation2 + $0x130] sm:$0x3]  ;;  %v6707_v6 = vld [vmem:[#allocation2 + $0x138] sm:$0xff] }
  0x4e   : > { %4934 = vmatpush3.bf16.msra.mxu0 %v5826_v26  ;;  %v574_v26 = vsel %vm551_vm1, %v572_v43, %v573_v47  ;;  %v6547_v43 = vld [vmem:[#allocation2 + $0xe8] sm:$0x3]  ;;  %v5841_v18 = vld [vmem:[%s8931_s1 + $0x1b0] sm:$0xff]  }
  0x4f   : > { %4935 = vmatprep.subr.bf16.mxu0 %v5828_v44  ;;  %v576_v44 = vsel %vm551_vm1, %v573_v47, %v575_v54  ;;  %v468_v47 = vsel %vm438_vm0, %v465_v63, %v467_v1  ;;  %v6545_v54 = vld [vmem:[#allocation2 + $0xe0] sm:$0xff]  ;;  %v6580_v63 = vld [vmem:[#allocation2 + $0xf0] sm:$0xff]  ;;  %v9008_v1 = vrot.slane %v6426_v21, 2  ;;  %v9012_v21 = vrot.slane %v6466_v50, 1 }
  0x50   : > { %1553 = vmatmul.mubr.bf16.gmra.mrb[12].mxu1 %v6448_v30  ;;  %v6539_v55 = vpack.c.bf16 %v576_v44, %v574_v26  ;;  %v5833_v26 = vld [vmem:[%s8931_s1 + $0x198] sm:$0xff]   ;;  %v6557_v44 = vpack.c.bf16 %v468_v47, %v466_v4  ;;  %v6586_v47 = vld [vmem:[#allocation2 + $0x100] sm:$0x3]  ;;  %v9010_v4 = vmov %v9007_v20  ;;  %v9039_v2 = vrot.slane %v6547_v43, 1 }
  0x51   : > { %1392 = vmatmul.mubr.bf16.gmra.mrb[12].mxu0 %v6339_v33  ;;  %1560 = vmatprep.mubr.bf16.mxu1 %v6461_v46  ;;  %v579_v56 = vsel %vm551_vm1, %v9008_v1, %v9007_v20  ;;  %v471_v20 = vsel %vm438_vm0, %v9012_v21, %v9011_v9  ;;  %v6618_v1 = vld [vmem:[#allocation2 + $0x118] sm:$0x3]  ;;  %v5838_v9 = vld [vmem:[%s8931_s1 + $0x1e8] sm:$0xff]  }
  0x52   : > { %1399 = vmatprep.mubr.bf16.mxu0 %v6486_v60  ;;  %4936 = vmatpush3.bf16.msra.mxu0 %v5830_v12  ;;  %v6543_v12 = vld [vmem:[#allocation2 + $0xd8] sm:$0xff]  ;;  %v9055_v53 = vrot.slane %v6618_v1, 1 }
  0x53   : > { %5042 = vmatpush3.bf16.msra.mxu1 %v5833_v26  ;;  %4937 = vmatprep.subr.bf16.mxu0 %v5834_v34  ;;  %v5835_v26 = vld [vmem:[%s8931_s1 + $0x138] sm:$0xff]   ;;  %v581_v34 = vsel %vm551_vm1, %v9010_v4, %v9009_v59  ;;  %v473_v59 = vsel %vm438_vm0, %v9014_v22, %v9013_v23  ;;  %v6637_v22 = vld [vmem:[#allocation2 + $0x108] sm:$0xff]  ;;  %v6641_v4 = vld [vmem:[%s6166_s26 + $0xf0] sm:$0xff] }
  0x54   : > { %5043 = vmatprep.subr.bf16.mxu1 %v5836_v24  ;;  %v6628_v21 = vpack.c.bf16 %v581_v34, %v579_v56  ;;  %v6630_v51 = vpack.c.bf16 %v473_v59, %v471_v20  ;;  %9015 = vst [vmem:[#allocation36_spill] sm:$0xff] %v6641_v4  ;;  %v5839_v23 = vld [vmem:[%s8931_s1 + $0x1a8] sm:$0xff]   ;;  %287 = vst [vmem:[#allocation2 + $0x181] sm:$0xff] %v6641_v4  ;;  %v6656_v56 = vld [vmem:[#allocation2 + $0x120] sm:$0xff]  ;;  %v9019_v20 = vrot.slane %v6480_v5, 2 }
  0x55   : > { %304 = vst [vmem:[#allocation2 + $0x17f] sm:$0x2] %v6641_v4  ;;  %v6659_v34 = vld [vmem:[%s6166_s26 + $0xf8] sm:$0xff]  ;;  %v6662_v59 = vld [vmem:[#allocation2 + $0x128] sm:$0xff]  ;;  %v5840_v24 = vld [vmem:[%s8931_s1 + $0x1f0] sm:$0xff]   ;;  %v9018_v4 = vrot.slane %v6466_v50, 2  ;;  %s8867_s26 = scalar_lea.hbm %s8935_s5, %s4698_s30 }
  0x56   : > { %4938 = vmatpush3.bf16.msra.mxu0 %v5835_v26  ;;  %v6634_v26 = vpack.c.bf16 %v6507_v42, %v6496_v17  ;;  %9016 = vst [vmem:[#allocation37_spill] sm:$0xff] %v6659_v34  ;;  %288 = vst [vmem:[#allocation2 + $0x189] sm:$0xff] %v6659_v34  ;;  %v9021_v50 = vrot.slane %v6507_v42, 1  ;;  %v9061_v40 = vrot.slane %v6662_v59, 1  ;;  %v9062_v39 = vrot.slane %v6656_v56, 1 }
  0x57   : > { %5044 = vmatpush3.bf16.msra.mxu1 %v5837_v7  ;;  %320 = vst [vmem:[#allocation2 + $0x18b] sm:$0x40] %v6659_v34  ;;  %v9017_v7 = vrot.slane %v6468_v52, 2  ;;  %v9023_v52 = vrot.slane %v6489_v11, 1 }
  0x58   : > { %1561 = vmatmul.mubr.bf16.gmra.mrb[16].mxu1 %v6539_v55  ;;  %5045 = vmatprep.subr.bf16.mxu1 %v5838_v9 }
  0x59   : > { %1400 = vmatmul.mubr.bf16.gmra.mrb[16].mxu0 %v6400_v8  ;;  %1568 = vmatprep.mubr.bf16.mxu1 %v6551_v45  ;;  %v584_v9 = vsel %vm551_vm1, %v9018_v4, %v9017_v7  ;;  %v9020_v49 = vmov %v9017_v7  ;;  %v9022_v4 = vrot.slane %v6496_v17, 1 }
  0x5a   : > { %1407 = vmatprep.mubr.bf16.mxu0 %v6557_v44  ;;  %v586_v34 = vsel %vm551_vm1, %v9020_v49, %v9019_v20  ;;  %v9024_v49 = vmov %v9021_v50 }
  0x5b   : > { %5046 = vmatpush3.bf16.msra.mxu1 %v5839_v23  ;;  %v476_v5 = vsel %vm438_vm0, %v9022_v4, %v9021_v50  ;;  %v478_v20 = vsel %vm438_vm0, %v9024_v49, %v9023_v52  ;;  %v5842_v23 = vld [vmem:[%s8931_s1 + $0x1f8] sm:$0xff]   ;;  %v6704_v27 = vpack.c.bf16 %v586_v34, %v584_v9  ;;  %v6712_v50 = vld [vmem:[%s8931_s1 + $0x200] sm:$0xff]   ;;  %v6716_v4 = vpack.c.bf16 %v6530_v13, %v6520_v16 }
  0x5c   : > { %5047 = vmatprep.subr.bf16.mxu1 %v5840_v24  ;;  %v6718_v24 = vld [vmem:[#allocation2 + $0x148] sm:$0x3]  ;;  %v6720_v52 = vpack.c.bf16 %v478_v20, %v476_v5  ;;  %v5843_v9 = vld [vmem:[%s8931_s1 + $0x1b8] sm:$0xff]   ;;  %5643 = vmatprep.subr.bf16.mxu0 %v6712_v50  ;;  %v6727_v49 = vld [vmem:[#allocation2 + $0x140] sm:$0xff]  ;;  %v9026_v5 = vrot.slane %v6496_v17, 2  ;;  %v9027_v34 = vrot.slane %v6489_v11, 2  ;;  %v481_v17 = vsel %vm438_vm0, %v9030_v57, %v9029_v58 }
  0x5d   : > { %v9032_v11 = vmov %v9029_v58  ;;  %v9033_v57 = vrot.slane %v6530_v13, 2  ;;  %v9034_v58 = vrot.slane %v6520_v16, 2  ;;  %v6893_v38 = vpack.c.bf16 %v6727_v49, %v6707_v6 }
  0x5e   : > { %v9071_v31 = vrot.slane %v6718_v24, 1 }
  0x5f   : > { %5048 = vmatpush3.bf16.msra.mxu1 %v5841_v18  ;;  %v9025_v18 = vrot.slane %v6507_v42, 2 }
  0x60   : > { %1569 = vmatmul.mubr.bf16.gmra.mrb[20].mxu1 %v6628_v21  ;;  %5049 = vmatprep.subr.bf16.mxu1 %v5842_v23 }
  0x61   : > { %1408 = vmatmul.mubr.bf16.gmra.mrb[20].mxu0 %v6461_v46  ;;  %1576 = vmatprep.mubr.bf16.mxu1 %v6634_v26  ;;  %v589_v20 = vsel %vm551_vm1, %v9026_v5, %v9025_v18  ;;  %v9028_v15 = vmov %v9025_v18  ;;  %v9031_v18 = vrot.slane %v6522_v10, 1 }
  0x62   : > { %1415 = vmatprep.mubr.bf16.mxu0 %v6630_v51  ;;  %v591_v7 = vsel %vm551_vm1, %v9028_v15, %v9027_v34  ;;  %v6762_v34 = vpack.c.bf16 %v6545_v54, %v6543_v12 }
  0x63   : > { %5050 = vmatpush3.bf16.msra.mxu1 %v5843_v9  ;;  %v483_v42 = vsel %vm438_vm0, %v9032_v11, %v9031_v18  ;;  %v6758_v15 = vpack.c.bf16 %v591_v7, %v589_v20  ;;  %v594_v9 = vsel %vm551_vm1, %v9034_v58, %v9033_v57  ;;  %v9035_v7 = vrot.slane %v6522_v10, 2 }
  0x64   : > { %v6764_v5 = vpack.c.bf16 %v483_v42, %v481_v17  ;;  %v9036_v20 = vmov %v9033_v57  ;;  %v9037_v17 = vrot.slane %v6545_v54, 1  ;;  %v9038_v11 = vrot.slane %v6543_v12, 1 }
  0x65   : > { %v596_v18 = vsel %vm551_vm1, %v9036_v20, %v9035_v7  ;;  %v6794_v10 = vpack.c.bf16 %v6582_v19, %v6580_v63  ;;  %v9041_v7 = vrot.slane %v6545_v54, 2  ;;  %v9042_v20 = vrot.slane %v6543_v12, 2 }
  0x66   : > { %v486_v42 = vsel %vm438_vm0, %v9038_v11, %v9037_v17  ;;  %v9040_v16 = vmov %v9037_v17  ;;  %v6790_v58 = vpack.c.bf16 %v596_v18, %v594_v9  ;;  %v9043_v9 = vrot.slane %v6547_v43, 2 }
  0x67   : > { %v488_v57 = vsel %vm438_vm0, %v9040_v16, %v9039_v2  ;;  %v599_v2 = vsel %vm551_vm1, %v9042_v20, %v9041_v7  ;;  %v9044_v18 = vmov %v9041_v7  ;;  %v617_v11 = vrot.slane %v6707_v6, 2 }
  0x68   : > { %1577 = vmatmul.mubr.bf16.gmra.mrb[24].mxu1 %v6704_v27  ;;  %v6796_v13 = vpack.c.bf16 %v488_v57, %v486_v42  ;;  %v601_v17 = vsel %vm551_vm1, %v9044_v18, %v9043_v9  ;;  %v618_v42 = vrot.slane %v6727_v49, 2  ;;  %v9045_v16 = vrot.slane %v6582_v19, 1 }
  0x69   : > { %1416 = vmatmul.mubr.bf16.gmra.mrb[24].mxu0 %v6551_v45  ;;  %1584 = vmatprep.mubr.bf16.mxu1 %v6716_v4  ;;  %v9046_v57 = vrot.slane %v6580_v63, 1  ;;  %v9047_v7 = vrot.slane %v6586_v47, 1  ;;  %v6824_v20 = vpack.c.bf16 %v601_v17, %v599_v2  ;;  %v6828_v9 = vpack.c.bf16 %v6643_v25, %v6637_v22 }
  0x6a   : > { %1423 = vmatprep.mubr.bf16.mxu0 %v6720_v52  ;;  %v9048_v43 = vmov %v9045_v16  ;;  %v9051_v2 = vrot.slane %v6586_v47, 2 }
  0x6b   : > { %v491_v12 = vsel %vm438_vm0, %v9046_v57, %v9045_v16  ;;  %v493_v54 = vsel %vm438_vm0, %v9048_v43, %v9047_v7  ;;  %v9049_v16 = vrot.slane %v6582_v19, 2  ;;  %v9050_v57 = vrot.slane %v6580_v63, 2 }
  0x6c   : > { %v6830_v18 = vpack.c.bf16 %v493_v54, %v491_v12  ;;  %v9053_v12 = vrot.slane %v6643_v25, 1  ;;  %v9054_v54 = vrot.slane %v6637_v22, 1  ;;  %v6860_v19 = vpack.c.bf16 %v6662_v59, %v6656_v56 }
  0x6d   : > { %v604_v7 = vsel %vm551_vm1, %v9050_v57, %v9049_v16  ;;  %v9052_v17 = vmov %v9049_v16 }
  0x6e   : > { %v606_v43 = vsel %vm551_vm1, %v9052_v17, %v9051_v2  ;;  %v496_v23 = vsel %vm438_vm0, %v9054_v54, %v9053_v12  ;;  %v9056_v63 = vmov %v9053_v12  ;;  %v378_v2 = vld [vmem:[#allocation2 + $0x150] sm:$0xff]  ;;  %v380_v17 = vld [vmem:[#allocation2 + $0x160] sm:$0x3]  ;;  %v9057_v12 = vrot.slane %v6643_v25, 2 }
  0x6f   : > { %v498_v16 = vsel %vm438_vm0, %v9056_v63, %v9055_v53  ;;  %v6856_v57 = vpack.c.bf16 %v606_v43, %v604_v7  ;;  %v9058_v53 = vrot.slane %v6637_v22, 2  ;;  %v9059_v43 = vrot.slane %v6618_v1, 2  ;;  %v379_v63 = vld [vmem:[#allocation2 + $0x158] sm:$0xff] }
  0x70   : > { %1585 = vmatmul.mubr.bf16.gmra.mrb[28].mxu1 %v6758_v15  ;;  %v6862_v47 = vpack.c.bf16 %v498_v16, %v496_v23  ;;  %v9060_v54 = vmov %v9057_v12  ;;  %v620_v16 = vrot.slane %v6718_v24, 2  ;;  %v509_v48 = vrot.slane %v378_v2, 1 }
  0x71   : > { %1424 = vmatmul.mubr.bf16.gmra.mrb[28].mxu0 %v6634_v26  ;;  %1592 = vmatprep.mubr.bf16.mxu1 %v6762_v34  ;;  %v609_v7 = vsel %vm551_vm1, %v9058_v53, %v9057_v12  ;;  %v611_v23 = vsel %vm551_vm1, %v9060_v54, %v9059_v43  ;;  %v501_v22 = vsel %vm438_vm0, %v9062_v39, %v9061_v40  ;;  %v9063_v12 = vrot.slane %v6683_v28, 1 }
  0x72   : > { %1431 = vmatprep.mubr.bf16.mxu0 %v6764_v5  ;;  %v9064_v1 = vmov %v9061_v40  ;;  %v6889_v53 = vpack.c.bf16 %v611_v23, %v609_v7  ;;  %v510_v43 = vrot.slane %v379_v63, 1  ;;  %v512_v54 = vrot.slane %v380_v17, 1 }
  0x73   : > { %v503_v25 = vsel %vm438_vm0, %v9064_v1, %v9063_v12  ;;  %v9065_v39 = vrot.slane %v6662_v59, 2  ;;  %v9066_v40 = vrot.slane %v6656_v56, 2  ;;  %v9067_v23 = vrot.slane %v6683_v28, 2 }
  0x74   : > { %v6895_v37 = vpack.c.bf16 %v503_v25, %v501_v22  ;;  %v9069_v22 = vrot.slane %v6727_v49, 1  ;;  %v9070_v25 = vrot.slane %v6707_v6, 1  ;;  %v6923_v28 = vpack.c.bf16 %v379_v63, %v378_v2 }
  0x75   : > { %v614_v7 = vsel %vm551_vm1, %v9066_v40, %v9065_v39  ;;  %v9068_v12 = vmov %v9065_v39  ;;  %v619_v6 = vsel %vm551_vm1, %v617_v11, %v618_v42  ;;  %v621_v24 = vsel %vm551_vm1, %v618_v42, %v620_v16 }
  0x76   : > { %v616_v1 = vsel %vm551_vm1, %v9068_v12, %v9067_v23  ;;  %v506_v32 = vsel %vm438_vm0, %v9070_v25, %v9069_v22  ;;  %v9072_v56 = vmov %v9069_v22  ;;  %v381_v23 = vld [vmem:[#allocation2 + $0x168] sm:$0xff]  ;;  %v511_v49 = vsel %vm438_vm0, %v509_v48, %v510_v43  ;;  %v383_v12 = vld [vmem:[#allocation2 + $0x178] sm:$0x3] }
  0x77   : > { %v508_v39 = vsel %vm438_vm0, %v9072_v56, %v9071_v31  ;;  %v6921_v40 = vpack.c.bf16 %v616_v1, %v614_v7  ;;  %v382_v31 = vld [vmem:[#allocation2 + $0x170] sm:$0xff]  ;;  %v513_v7 = vsel %vm438_vm0, %v510_v43, %v512_v54  ;;  %v622_v22 = vrot.slane %v378_v2, 2  ;;  %v6949_v2 = vld [vmem:[#allocation2 + $0x180] sm:$0xff] }
  0x78   : > { %1593 = vmatmul.mubr.bf16.gmra.mrb[32].mxu1 %v6790_v58  ;;  %v6925_v59 = vpack.c.bf16 %v508_v39, %v506_v32  ;;  %v6935_v32 = vpack.c.bf16 %v621_v24, %v619_v6  ;;  %v6937_v1 = vpack.c.bf16 %v382_v31, %v381_v23  ;;  %v623_v25 = vrot.slane %v379_v63, 2  ;;  %v331_v6 = vld [vmem:[#allocation2 + $0x178] sm:$0x3] }
  0x79   : > { %1432 = vmatmul.mubr.bf16.gmra.mrb[32].mxu0 %v6716_v4  ;;  %1600 = vmatprep.mubr.bf16.mxu1 %v6794_v10  ;;  %v625_v56 = vrot.slane %v380_v17, 2  ;;  %v6939_v39 = vpack.c.bf16 %v513_v7, %v511_v49  ;;  %v514_v11 = vrot.slane %v381_v23, 1  ;;  %v6941_v36 = vrot.slane %v382_v31, 1  ;;  %v6951_v17 = vld [vmem:[#allocation2 + $0x188] sm:$0xff]  ;;  %335 = vst [vmem:[#allocation2 + $0x1a8] sm:$0x3] %v331_v6 }
  0x7a   : > { %1439 = vmatprep.mubr.bf16.mxu0 %v6796_v13  ;;  %v517_v42 = vrot.slane %v383_v12, 1  ;;  %v624_v48 = vsel %vm551_vm1, %v622_v22, %v623_v25  ;;  %v6963_v24 = vpack.c.bf16 %v6951_v17, %v6949_v2  ;;  %v627_v49 = vrot.slane %v381_v23, 2 }
  0x7b   : > { %v626_v16 = vsel %vm551_vm1, %v623_v25, %v625_v56  ;;  %v6955_v63 = vsel %vm438_vm0, %v514_v11, %v6941_v36  ;;  %v6965_v7 = vrot.slane %v382_v31, 2  ;;  %v630_v22 = vrot.slane %v383_v12, 2  ;;  %v5845_v12 = vld [vmem:[%s8931_s1 + $0x208] sm:$0xff]   ;;  %v5846_v11 = vld [vmem:[%s8931_s1 + $0x210] sm:$0xff]  }
  0x7c   : > { %v518_v43 = vsel %vm438_vm0, %v6941_v36, %v517_v42  ;;  %v6959_v54 = vpack.c.bf16 %v626_v16, %v624_v48 }
  0x7d   : > { %v6968_v25 = vpack.c.bf16 %v518_v43, %v6955_v63  ;;  %v6975_v56 = vsel %vm551_vm1, %v627_v49, %v6965_v7  ;;  %v631_v23 = vsel %vm551_vm1, %v6965_v7, %v630_v22  ;;  %v667_v22 = vrot.slane %v6949_v2, 1 }
  0x7e   : > { %v6981_v31 = vpack.c.bf16 %v631_v23, %v6975_v56  ;;  %v668_v23 = vrot.slane %v6951_v17, 1 }
  0x80   : > { %1601 = vmatmul.mubr.bf16.gmra.mrb[36].mxu1 %v6824_v20 }
  0x81   : > { %1440 = vmatmul.mubr.bf16.gmra.mrb[36].mxu0 %v6762_v34  ;;  %1608 = vmatprep.mubr.bf16.mxu1 %v6828_v9 }
  0x82   : > { %1447 = vmatprep.mubr.bf16.mxu0 %v6830_v18 }
  0x88   : > { %1609 = vmatmul.mubr.bf16.gmra.mrb[40].mxu1 %v6856_v57 }
  0x89   : > { %1448 = vmatmul.mubr.bf16.gmra.mrb[40].mxu0 %v6794_v10  ;;  %1616 = vmatprep.mubr.bf16.mxu1 %v6860_v19 }
  0x8a   : > { %1455 = vmatprep.mubr.bf16.mxu0 %v6862_v47 }
  0x90   : > { %1617 = vmatmul.mubr.bf16.gmra.mrb[44].mxu1 %v6889_v53 }
  0x91   : > { %1456 = vmatmul.mubr.bf16.gmra.mrb[44].mxu0 %v6828_v9  ;;  %1624 = vmatprep.mubr.bf16.mxu1 %v6893_v38 }
  0x92   : > { %1463 = vmatprep.mubr.bf16.mxu0 %v6895_v37 }
  0x98   : > { %1625 = vmatmul.mubr.bf16.gmra.mrb[48].mxu1 %v6921_v40 }
  0x99   : > { %1464 = vmatmul.mubr.bf16.gmra.mrb[48].mxu0 %v6860_v19  ;;  %1632 = vmatprep.mubr.bf16.mxu1 %v6923_v28 }
  0x9a   : > { %1471 = vmatprep.mubr.bf16.mxu0 %v6925_v59 }
  0xa0   : > { %1633 = vmatmul.mubr.bf16.gmra.mrb[52].mxu1 %v6935_v32 }
  0xa1   : > { %1472 = vmatmul.mubr.bf16.gmra.mrb[52].mxu0 %v6893_v38  ;;  %1640 = vmatprep.mubr.bf16.mxu1 %v6937_v1 }
  0xa2   : > { %1479 = vmatprep.mubr.bf16.mxu0 %v6939_v39 }
  0xa8   : > { %1641 = vmatmul.mubr.bf16.gmra.mrb[56].mxu1 %v6959_v54 }
  0xa9   : > { %1480 = vmatmul.mubr.bf16.gmra.mrb[56].mxu0 %v6923_v28  ;;  %1648 = vmatprep.mubr.bf16.mxu1 %v6963_v24 }
  0xaa   : > { %1487 = vmatprep.mubr.bf16.mxu0 %v6968_v25 }
  0xb0   : > { %1649 = vmatmul.mubr.bf16.gmra.mrb[60].mxu1 %v6981_v31 }
  0xb1   : > { %1488 = vmatmul.mubr.bf16.gmra.mrb[60].mxu0 %v6937_v1  ;;  %1850 = vmatprep.mubr.bf16.mxu1 %v6342_v41 }
  0xb2   : > { %1689 = vmatprep.mubr.bf16.mxu0 %v6329_v29  ;;  %v5847_v29 = vld [vmem:[%s8931_s1 + $0x218] sm:$0xff]  }
  0xb8   : > { %1851 = vmatmul.mubr.bf16.vlgmr.msra.gmra.mrb[64].mxu1 %v6266_v3  ;;  %v5848_v3 = vld [vmem:[%s8931_s1 + $0x220] sm:$0xff]  }
  0xb9   : > { %1690 = vmatmul.mubr.bf16.vlgmr.msra.gmra.mrb[64].mxu0 %v6287_v14  ;;  %1858 = vmatprep.mubr.bf16.mxu1 %v6407_v61  ;;  %v5849_v14 = vld [vmem:[%s8931_s1 + $0x228] sm:$0xff]  }
  0xba   : > { %5644 = vmatpush3.bf16.msra.mxu0 %v6712_v50  ;;  %1697 = vmatprep.mubr.bf16.mxu0 %v6390_v0 }
  0xbb   : > { %5645 = vmatprep.subr.bf16.mxu0 %v5845_v12 }
  0xbe   : > { %5646 = vmatpush3.bf16.msra.mxu0 %v5845_v12 }
  0xbf   : > { %5647 = vmatprep.subr.bf16.mxu0 %v5846_v11 }
  0xc0   : > { %1859 = vmatmul.mubr.bf16.gmra.mrb[68].mxu1 %v6339_v33  ;;  %v5850_v33 = vld [vmem:[%s8931_s1 + $0x230] sm:$0xff]  }
  0xc1   : > { %1698 = vmatmul.mubr.bf16.gmra.mrb[68].mxu0 %v6342_v41  ;;  %1866 = vmatprep.mubr.bf16.mxu1 %v6486_v60  ;;  %v5851_v41 = vld [vmem:[%s8931_s1 + $0x238] sm:$0xff]  }
  0xc2   : > { %1705 = vmatprep.mubr.bf16.mxu0 %v6448_v30  ;;  %5648 = vmatpush3.bf16.msra.mxu0 %v5846_v11 }
  0xc3   : > { %5649 = vmatprep.subr.bf16.mxu0 %v5847_v29 }
  0xc6   : > { %5650 = vmatpush3.bf16.msra.mxu0 %v5847_v29 }
  0xc7   : > { %5651 = vmatprep.subr.bf16.mxu0 %v5848_v3 }
  0xc8   : > { %1867 = vmatmul.mubr.bf16.gmra.mrb[72].mxu1 %v6400_v8 }
  0xc9   : > { %1706 = vmatmul.mubr.bf16.gmra.mrb[72].mxu0 %v6407_v61  ;;  %1874 = vmatprep.mubr.bf16.mxu1 %v6557_v44 }
  0xca   : > { %1713 = vmatprep.mubr.bf16.mxu0 %v6539_v55  ;;  %5652 = vmatpush3.bf16.msra.mxu0 %v5848_v3 }
  0xcb   : > { %5653 = vmatprep.subr.bf16.mxu0 %v5849_v14 }
  0xce   : > { %5654 = vmatpush3.bf16.msra.mxu0 %v5849_v14 }
  0xcf   : > { %5655 = vmatprep.subr.bf16.mxu0 %v5850_v33 }
  0xd0   : > { %1875 = vmatmul.mubr.bf16.gmra.mrb[76].mxu1 %v6461_v46  ;;  %v7056_v46 = vld [vmem:[%s8932_s2] ss:$0 sm:$0xff] }
  0xd1   : > { %1714 = vmatmul.mubr.bf16.gmra.mrb[76].mxu0 %v6486_v60  ;;  %1882 = vmatprep.mubr.bf16.mxu1 %v6630_v51 }
  0xd2   : > { %1721 = vmatprep.mubr.bf16.mxu0 %v6628_v21  ;;  %5656 = vmatpush3.bf16.msra.mxu0 %v5850_v33 }
  0xd3   : > { %5657 = vmatprep.subr.bf16.mxu0 %v5851_v41 }
  0xd6   : > { %5658 = vmatpush3.bf16.msra.mxu0 %v5851_v41  ;;  %v669_v41 = vsel %vm438_vm0, %v667_v22, %v668_v23 }
  0xd8   : > { %1883 = vmatmul.mubr.bf16.gmra.mrb[80].mxu1 %v6551_v45 }
  0xd9   : > { %1722 = vmatmul.mubr.bf16.gmra.mrb[80].mxu0 %v6557_v44  ;;  %1890 = vmatprep.mubr.bf16.mxu1 %v6720_v52 }
  0xda   : > { %1729 = vmatprep.mubr.bf16.mxu0 %v6704_v27 }
  0xe0   : > { %1891 = vmatmul.mubr.bf16.gmra.mrb[84].mxu1 %v6634_v26 }
  0xe1   : > { %1730 = vmatmul.mubr.bf16.gmra.mrb[84].mxu0 %v6630_v51  ;;  %1898 = vmatprep.mubr.bf16.mxu1 %v6764_v5 }
  0xe2   : > { %1737 = vmatprep.mubr.bf16.mxu0 %v6758_v15 }
  0xe8   : > { %1899 = vmatmul.mubr.bf16.gmra.mrb[88].mxu1 %v6716_v4 }
  0xe9   : > { %1738 = vmatmul.mubr.bf16.gmra.mrb[88].mxu0 %v6720_v52  ;;  %1906 = vmatprep.mubr.bf16.mxu1 %v6796_v13 }
  0xea   : > { %1745 = vmatprep.mubr.bf16.mxu0 %v6790_v58 }
  0xf0   : > { %1907 = vmatmul.mubr.bf16.gmra.mrb[92].mxu1 %v6762_v34 }
  0xf1   : > { %1746 = vmatmul.mubr.bf16.gmra.mrb[92].mxu0 %v6764_v5  ;;  %1914 = vmatprep.mubr.bf16.mxu1 %v6830_v18 }
  0xf2   : > { %1753 = vmatprep.mubr.bf16.mxu0 %v6824_v20 }
  0xf8   : > { %1915 = vmatmul.mubr.bf16.gmra.mrb[96].mxu1 %v6794_v10 }
  0xf9   : > { %1754 = vmatmul.mubr.bf16.gmra.mrb[96].mxu0 %v6796_v13  ;;  %1922 = vmatprep.mubr.bf16.mxu1 %v6862_v47 }
  0xfa   : > { %1761 = vmatprep.mubr.bf16.mxu0 %v6856_v57 }
 0x100   : > { %1923 = vmatmul.mubr.bf16.gmra.mrb[100].mxu1 %v6828_v9 }
 0x101   : > { %1762 = vmatmul.mubr.bf16.gmra.mrb[100].mxu0 %v6830_v18  ;;  %1930 = vmatprep.mubr.bf16.mxu1 %v6895_v37 }
 0x102   : > { %1769 = vmatprep.mubr.bf16.mxu0 %v6889_v53 }
 0x108   : > { %1931 = vmatmul.mubr.bf16.gmra.mrb[104].mxu1 %v6860_v19  ;;  %v386_v19 = vld [vmem:[#allocation2 + $0x190] sm:$0x3] }
 0x109   : > { %1770 = vmatmul.mubr.bf16.gmra.mrb[104].mxu0 %v6862_v47  ;;  %1938 = vmatprep.mubr.bf16.mxu1 %v6925_v59  ;;  %v670_v12 = vrot.slane %v386_v19, 1 }
 0x10a   : > { %1777 = vmatprep.mubr.bf16.mxu0 %v6921_v40 }
 0x10b   : > { %v4827_v51 = vpop.f32.mrb[0].mxu1 }
 0x10c   : > { %v4715_v8 = vpop.f32.mrb[0].mxu0  ;;  %v4828_v61 = vpop.f32.mrb[1].mxu1 }
 0x10d   : > { %v4716_v60 = vpop.f32.mrb[1].mxu0  ;;  %v4829_v45 = vadd.f32 %v4828_v61, %v4827_v51  ;;  %v4830_v44 = vpop.f32.mrb[2].mxu1  ;;  %v671_v51 = vsel %vm438_vm0, %v668_v23, %v670_v12 }
 0x10e   : > { %v4717_v26 = vadd.f32 %v4716_v60, %v4715_v8  ;;  %v4718_v50 = vpop.f32.mrb[2].mxu0  ;;  %v4831_v4 = vpop.f32.mrb[3].mxu1  ;;  %v7080_v60 = vld [vmem:[#allocation2 + $0x1a8] sm:$0x3] }
 0x10f   : > { %v4719_v52 = vpop.f32.mrb[3].mxu0  ;;  %v4832_v34 = vadd.f32 %v4831_v4, %v4830_v44  ;;  %v747_v4 = vpack.c.bf16 %v671_v51, %v669_v41 }
 0x110   : > { %v1370_v5 = vadd.f32 %v4717_v26, %v7056_v46  ;;  %v4720_v10 = vadd.f32 %v4719_v52, %v4718_v50  ;;  %1939 = vmatmul.mubr.bf16.gmra.mrb[108].mxu1 %v6893_v38 }
 0x111   : > { %1778 = vmatmul.mubr.bf16.gmra.mrb[108].mxu0 %v6895_v37  ;;  %1946 = vmatprep.mubr.bf16.mxu1 %v6939_v39 }
 0x112   : > { %v1373_v13 = vadd.f32 %v4720_v10, %v7056_v46  ;;  %1785 = vmatprep.mubr.bf16.mxu0 %v6935_v32  ;;  %v7064_v9 = vadd.f32 %v4829_v45, %v1370_v5  ;;  %v687_v10 = vrot.slane %v7080_v60, 1 }
 0x113   : > { %v4833_v18 = vpop.f32.mrb[4].mxu1 }
 0x114   : > { %v4721_v47 = vpop.f32.mrb[4].mxu0  ;;  %v4834_v42 = vpop.f32.mrb[5].mxu1  ;;  %v7066_v48 = vadd.f32 %v4832_v34, %v1373_v13 }
 0x115   : > { %v4722_v16 = vpop.f32.mrb[5].mxu0  ;;  %v4835_v43 = vadd.f32 %v4834_v42, %v4833_v18  ;;  %v4836_v6 = vpop.f32.mrb[6].mxu1  ;;  %v675_v42 = vrot.slane %v6951_v17, 2 }
 0x116   : > { %v4723_v38 = vadd.f32 %v4722_v16, %v4721_v47  ;;  %v4724_v49 = vpop.f32.mrb[6].mxu0  ;;  %v4837_v37 = vpop.f32.mrb[7].mxu1  ;;  %v674_v47 = vrot.slane %v6949_v2, 2  ;;  %v677_v16 = vrot.slane %v386_v19, 2 }
 0x117   : > { %v4725_v11 = vpop.f32.mrb[7].mxu0  ;;  %v4838_v29 = vadd.f32 %v4837_v37, %v4836_v6 }
 0x118   : > { %v1378_v3 = vadd.f32 %v4723_v38, %v7056_v46  ;;  %v4726_v14 = vadd.f32 %v4725_v11, %v4724_v49  ;;  %1947 = vmatmul.mubr.bf16.gmra.mrb[112].mxu1 %v6923_v28  ;;  %v688_v49 = vsel %vm438_vm0, %v6941_v36, %v687_v10  ;;  %v676_v17 = vsel %vm551_vm1, %v674_v47, %v675_v42 }
 0x119   : > { %1786 = vmatmul.mubr.bf16.gmra.mrb[112].mxu0 %v6925_v59  ;;  %1954 = vmatprep.mubr.bf16.mxu1 %v6968_v25  ;;  %v678_v19 = vsel %vm551_vm1, %v675_v42, %v677_v16 }
 0x11a   : > { %v1381_v33 = vadd.f32 %v4726_v14, %v7056_v46  ;;  %1793 = vmatprep.mubr.bf16.mxu0 %v6959_v54  ;;  %v7078_v8 = vadd.f32 %v4835_v43, %v1378_v3  ;;  %v750_v3 = vpack.c.bf16 %v688_v49, %v6955_v63  ;;  %v7101_v36 = vpack.c.bf16 %v678_v19, %v676_v17 }
 0x11b   : > { %v4839_v61 = vpop.f32.mrb[8].mxu1 }
 0x11c   : > { %v4727_v45 = vpop.f32.mrb[8].mxu0  ;;  %v4840_v44 = vpop.f32.mrb[9].mxu1  ;;  %v7082_v28 = vadd.f32 %v4838_v29, %v1381_v33 }
 0x11d   : > { %v4728_v59 = vpop.f32.mrb[9].mxu0  ;;  %v4841_v26 = vadd.f32 %v4840_v44, %v4839_v61  ;;  %v4842_v50 = vpop.f32.mrb[10].mxu1 }
 0x11e   : > { %v4729_v52 = vadd.f32 %v4728_v59, %v4727_v45  ;;  %v4730_v34 = vpop.f32.mrb[10].mxu0  ;;  %v4843_v5 = vpop.f32.mrb[11].mxu1 }
 0x11f   : > { %v4731_v13 = vpop.f32.mrb[11].mxu0  ;;  %v4844_v18 = vadd.f32 %v4843_v5, %v4842_v50 }
 0x120   : > { %v1386_v43 = vadd.f32 %v4729_v52, %v7056_v46  ;;  %v4732_v6 = vadd.f32 %v4731_v13, %v4730_v34  ;;  %1955 = vmatmul.mubr.bf16.gmra.mrb[116].mxu1 %v6937_v1 }
 0x121   : > { %1794 = vmatmul.mubr.bf16.gmra.mrb[116].mxu0 %v6939_v39  ;;  %1962 = vmatprep.mubr.bf16.mxu1 %v747_v4 }
 0x122   : > { %v1389_v38 = vadd.f32 %v4732_v6, %v7056_v46  ;;  %1801 = vmatprep.mubr.bf16.mxu0 %v6981_v31  ;;  %v7094_v37 = vadd.f32 %v4841_v26, %v1386_v43 }
 0x123   : > { %v4845_v2 = vpop.f32.mrb[12].mxu1 }
 0x124   : > { %v4733_v22 = vpop.f32.mrb[12].mxu0  ;;  %v4846_v23 = vpop.f32.mrb[13].mxu1  ;;  %v7098_v12 = vadd.f32 %v4844_v18, %v1389_v38 }
 0x125   : > { %v4734_v39 = vpop.f32.mrb[13].mxu0  ;;  %v4847_v11 = vadd.f32 %v4846_v23, %v4845_v2  ;;  %v4848_v29 = vpop.f32.mrb[14].mxu1 }
 0x126   : > { %v4735_v14 = vadd.f32 %v4734_v39, %v4733_v22  ;;  %v4736_v33 = vpop.f32.mrb[14].mxu0  ;;  %v4849_v41 = vpop.f32.mrb[15].mxu1 }
 0x127   : > { %v4737_v51 = vpop.f32.mrb[15].mxu0  ;;  %v4850_v61 = vadd.f32 %v4849_v41, %v4848_v29 }
 0x128   : > { %v1394_v45 = vadd.f32 %v4735_v14, %v7056_v46  ;;  %v4738_v44 = vadd.f32 %v4737_v51, %v4736_v33  ;;  %1963 = vmatmul.mubr.bf16.gmra.mrb[120].mxu1 %v6963_v24 }
 0x129   : > { %1802 = vmatmul.mubr.bf16.gmra.mrb[120].mxu0 %v6968_v25  ;;  %1970 = vmatprep.mubr.bf16.mxu1 %v750_v3 }
 0x12a   : > { %v1397_v59 = vadd.f32 %v4738_v44, %v7056_v46  ;;  %1809 = vmatprep.mubr.bf16.mxu0 %v7101_v36  ;;  %v7108_v63 = vadd.f32 %v4847_v11, %v1394_v45 }
 0x12b   : > { %v4851_v26 = vpop.f32.mrb[16].mxu1 }
 0x12c   : > { %v4739_v50 = vpop.f32.mrb[16].mxu0  ;;  %v4852_v52 = vpop.f32.mrb[17].mxu1  ;;  %v7110_v34 = vadd.f32 %v4850_v61, %v1397_v59 }
 0x12d   : > { %v4740_v5 = vpop.f32.mrb[17].mxu0  ;;  %v4853_v10 = vadd.f32 %v4852_v52, %v4851_v26  ;;  %v4854_v13 = vpop.f32.mrb[18].mxu1 }
 0x12e   : > { %v4741_v18 = vadd.f32 %v4740_v5, %v4739_v50  ;;  %v4742_v47 = vpop.f32.mrb[18].mxu0  ;;  %v4855_v24 = vpop.f32.mrb[19].mxu1 }
 0x12f   : > { %v4743_v42 = vpop.f32.mrb[19].mxu0  ;;  %v4856_v25 = vadd.f32 %v4855_v24, %v4854_v13 }
 0x130   : > { %v1402_v16 = vadd.f32 %v4741_v18, %v7056_v46  ;;  %v4744_v43 = vadd.f32 %v4743_v42, %v4742_v47  ;;  %1971 = vmatmul.mubr.bf16.gmra.mrb[124].mxu1 %v6937_v1 }
 0x131   : > { %1810 = vmatmul.mubr.bf16.gmra.mrb[124].mxu0 %v747_v4 }
 0x132   : > { %v1405_v6 = vadd.f32 %v4744_v43, %v7056_v46  ;;  %5659 = vmatprep.mubr.bf16.mxu0 %v6390_v0  ;;  %v7116_v38 = vadd.f32 %v4853_v10, %v1402_v16 }
 0x133   : > { %v4857_v49 = vpop.f32.mrb[20].mxu1 }
 0x134   : > { %v4745_v2 = vpop.f32.mrb[20].mxu0  ;;  %v4858_v17 = vpop.f32.mrb[21].mxu1  ;;  %v7118_v19 = vadd.f32 %v4856_v25, %v1405_v6 }
 0x135   : > { %v4746_v22 = vpop.f32.mrb[21].mxu0  ;;  %v4859_v23 = vadd.f32 %v4858_v17, %v4857_v49  ;;  %v4860_v39 = vpop.f32.mrb[22].mxu1 }
 0x136   : > { %v4747_v11 = vadd.f32 %v4746_v22, %v4745_v2  ;;  %v4748_v29 = vpop.f32.mrb[22].mxu0  ;;  %v4861_v3 = vpop.f32.mrb[23].mxu1 }
 0x137   : > { %v4749_v14 = vpop.f32.mrb[23].mxu0  ;;  %v4862_v1 = vadd.f32 %v4861_v3, %v4860_v39 }
 0x138   : > { %v1410_v4 = vadd.f32 %v4747_v11, %v7056_v46  ;;  %v4750_v33 = vadd.f32 %v4749_v14, %v4748_v29 }
 0x139   : > { %5660 = vmatmul.mubr.bf16.vlgmr.msra.gmra.mrb[128].mxu0 %v6448_v30 }
 0x13a   : > { %v1413_v0 = vadd.f32 %v4750_v33, %v7056_v46  ;;  %5663 = vmatprep.mubr.bf16.mxu0 %v6539_v55  ;;  %v7124_v41 = vadd.f32 %v4859_v23, %v1410_v4 }
 0x13b   : > { %v4863_v51 = vpop.f32.mrb[24].mxu1 }
 0x13c   : > { %v4751_v61 = vpop.f32.mrb[24].mxu0  ;;  %v4864_v45 = vpop.f32.mrb[25].mxu1  ;;  %v7126_v44 = vadd.f32 %v4862_v1, %v1413_v0 }
 0x13d   : > { %v4752_v59 = vpop.f32.mrb[25].mxu0  ;;  %v4865_v26 = vadd.f32 %v4864_v45, %v4863_v51  ;;  %v4866_v50 = vpop.f32.mrb[26].mxu1 }
 0x13e   : > { %v4753_v52 = vadd.f32 %v4752_v59, %v4751_v61  ;;  %v4754_v5 = vpop.f32.mrb[26].mxu0  ;;  %v4867_v10 = vpop.f32.mrb[27].mxu1 }
 0x13f   : > { %v4755_v13 = vpop.f32.mrb[27].mxu0  ;;  %v4868_v18 = vadd.f32 %v4867_v10, %v4866_v50 }
 0x140   : > { %v1418_v30 = vadd.f32 %v4753_v52, %v7056_v46  ;;  %v4756_v47 = vadd.f32 %v4755_v13, %v4754_v5 }
 0x141   : > { %5664 = vmatmul.mubr.bf16.gmra.mrb[132].mxu0 %v6628_v21 }
 0x142   : > { %v1421_v55 = vadd.f32 %v4756_v47, %v7056_v46  ;;  %5667 = vmatprep.mubr.bf16.mxu0 %v6704_v27  ;;  %v7132_v24 = vadd.f32 %v4865_v26, %v1418_v30 }
 0x143   : > { %v4869_v42 = vpop.f32.mrb[28].mxu1 }
 0x144   : > { %v4757_v25 = vpop.f32.mrb[28].mxu0  ;;  %v4870_v16 = vpop.f32.mrb[29].mxu1  ;;  %v7134_v43 = vadd.f32 %v4868_v18, %v1421_v55 }
 0x145   : > { %v4758_v6 = vpop.f32.mrb[29].mxu0  ;;  %v4871_v49 = vadd.f32 %v4870_v16, %v4869_v42  ;;  %v4872_v2 = vpop.f32.mrb[30].mxu1 }
 0x146   : > { %v4759_v17 = vadd.f32 %v4758_v6, %v4757_v25  ;;  %v4760_v22 = vpop.f32.mrb[30].mxu0  ;;  %v4873_v23 = vpop.f32.mrb[31].mxu1 }
 0x147   : > { %v4761_v39 = vpop.f32.mrb[31].mxu0  ;;  %v4874_v11 = vadd.f32 %v4873_v23, %v4872_v2 }
 0x148   : > { %v1426_v21 = vadd.f32 %v4759_v17, %v7056_v46  ;;  %v4762_v29 = vadd.f32 %v4761_v39, %v4760_v22 }
 0x149   : > { %5668 = vmatmul.mubr.bf16.gmra.mrb[136].mxu0 %v6758_v15 }
 0x14a   : > { %v1429_v27 = vadd.f32 %v4762_v29, %v7056_v46  ;;  %5671 = vmatprep.mubr.bf16.mxu0 %v6790_v58  ;;  %v7140_v3 = vadd.f32 %v4871_v49, %v1426_v21 }
 0x14b   : > { %v4875_v14 = vpop.f32.mrb[32].mxu1 }
 0x14c   : > { %v4763_v1 = vpop.f32.mrb[32].mxu0  ;;  %v4876_v4 = vpop.f32.mrb[33].mxu1  ;;  %v7142_v33 = vadd.f32 %v4874_v11, %v1429_v27 }
 0x14d   : > { %v4764_v0 = vpop.f32.mrb[33].mxu0  ;;  %v4877_v51 = vadd.f32 %v4876_v4, %v4875_v14  ;;  %v4878_v61 = vpop.f32.mrb[34].mxu1 }
 0x14e   : > { %v4765_v45 = vadd.f32 %v4764_v0, %v4763_v1  ;;  %v4766_v59 = vpop.f32.mrb[34].mxu0  ;;  %v4879_v26 = vpop.f32.mrb[35].mxu1 }
 0x14f   : > { %v4767_v50 = vpop.f32.mrb[35].mxu0  ;;  %v4880_v52 = vadd.f32 %v4879_v26, %v4878_v61 }
 0x150   : > { %v1434_v15 = vadd.f32 %v4765_v45, %v7056_v46  ;;  %v4768_v5 = vadd.f32 %v4767_v50, %v4766_v59 }
 0x151   : > { %5672 = vmatmul.mubr.bf16.gmra.mrb[140].mxu0 %v6824_v20 }
 0x152   : > { %v1437_v58 = vadd.f32 %v4768_v5, %v7056_v46  ;;  %v7147_v10 = vadd.f32 %v4877_v51, %v1434_v15  ;;  %5675 = vmatprep.mubr.bf16.mxu0 %v6856_v57 }
 0x153   : > { %v4881_v13 = vpop.f32.mrb[36].mxu1 }
 0x154   : > { %v7150_v18 = vadd.f32 %v4880_v52, %v1437_v58  ;;  %v4769_v30 = vpop.f32.mrb[36].mxu0  ;;  %v4882_v47 = vpop.f32.mrb[37].mxu1 }
 0x155   : > { %v4770_v55 = vpop.f32.mrb[37].mxu0  ;;  %v4883_v42 = vadd.f32 %v4882_v47, %v4881_v13  ;;  %v4884_v25 = vpop.f32.mrb[38].mxu1 }
 0x156   : > { %v4771_v16 = vadd.f32 %v4770_v55, %v4769_v30  ;;  %v4772_v6 = vpop.f32.mrb[38].mxu0  ;;  %v4885_v49 = vpop.f32.mrb[39].mxu1 }
 0x157   : > { %v4773_v2 = vpop.f32.mrb[39].mxu0  ;;  %v4886_v17 = vadd.f32 %v4885_v49, %v4884_v25  ;;  %v694_v25 = vrot.slane %v7080_v60, 2 }
 0x158   : > { %v1442_v20 = vadd.f32 %v4771_v16, %v7056_v46  ;;  %v4774_v22 = vadd.f32 %v4773_v2, %v4772_v6 }
 0x159   : > { %5676 = vmatmul.mubr.bf16.gmra.mrb[144].mxu0 %v6889_v53 }
 0x15a   : > { %v1445_v57 = vadd.f32 %v4774_v22, %v7056_v46  ;;  %v7155_v23 = vadd.f32 %v4883_v42, %v1442_v20  ;;  %5679 = vmatprep.mubr.bf16.mxu0 %v6921_v40 }
 0x15b   : > { %v4887_v39 = vpop.f32.mrb[40].mxu1 }
 0x15c   : > { %v7158_v11 = vadd.f32 %v4886_v17, %v1445_v57  ;;  %v4775_v21 = vpop.f32.mrb[40].mxu0  ;;  %v4888_v29 = vpop.f32.mrb[41].mxu1  ;;  %v695_v17 = vsel %vm551_vm1, %v6965_v7, %v694_v25 }
 0x15d   : > { %v4776_v27 = vpop.f32.mrb[41].mxu0  ;;  %v4889_v14 = vadd.f32 %v4888_v29, %v4887_v39  ;;  %v4890_v1 = vpop.f32.mrb[42].mxu1 }
 0x15e   : > { %v4777_v4 = vadd.f32 %v4776_v27, %v4775_v21  ;;  %v4778_v0 = vpop.f32.mrb[42].mxu0  ;;  %v4891_v51 = vpop.f32.mrb[43].mxu1  ;;  %v751_v27 = vpack.c.bf16 %v695_v17, %v6975_v56 }
 0x15f   : > { %v4779_v61 = vpop.f32.mrb[43].mxu0  ;;  %v4892_v45 = vadd.f32 %v4891_v51, %v4890_v1 }
 0x160   : > { %v1450_v53 = vadd.f32 %v4777_v4, %v7056_v46  ;;  %v4780_v59 = vadd.f32 %v4779_v61, %v4778_v0 }
 0x161   : > { %5680 = vmatmul.mubr.bf16.gmra.mrb[148].mxu0 %v6935_v32 }
 0x162   : > { %v1453_v40 = vadd.f32 %v4780_v59, %v7056_v46  ;;  %v7163_v26 = vadd.f32 %v4889_v14, %v1450_v53  ;;  %5683 = vmatprep.mubr.bf16.mxu0 %v6959_v54 }
 0x163   : > { %v4893_v50 = vpop.f32.mrb[44].mxu1 }
 0x164   : > { %v7166_v52 = vadd.f32 %v4892_v45, %v1453_v40  ;;  %v4781_v15 = vpop.f32.mrb[44].mxu0  ;;  %v4894_v5 = vpop.f32.mrb[45].mxu1 }
 0x165   : > { %v4782_v58 = vpop.f32.mrb[45].mxu0  ;;  %v4895_v13 = vadd.f32 %v4894_v5, %v4893_v50  ;;  %v4896_v30 = vpop.f32.mrb[46].mxu1 }
 0x166   : > { %v4783_v47 = vadd.f32 %v4782_v58, %v4781_v15  ;;  %v4784_v55 = vpop.f32.mrb[46].mxu0  ;;  %v4897_v42 = vpop.f32.mrb[47].mxu1 }
 0x167   : > { %v4785_v32 = vpop.f32.mrb[47].mxu0  ;;  %v4898_v16 = vadd.f32 %v4897_v42, %v4896_v30 }
 0x168   : > { %v1458_v6 = vadd.f32 %v4783_v47, %v7056_v46  ;;  %v4786_v49 = vadd.f32 %v4785_v32, %v4784_v55 }
 0x169   : > { %5684 = vmatmul.mubr.bf16.gmra.mrb[152].mxu0 %v6981_v31 }
 0x16a   : > { %v1461_v54 = vadd.f32 %v4786_v49, %v7056_v46  ;;  %v7172_v2 = vadd.f32 %v4895_v13, %v1458_v6  ;;  %5687 = vmatprep.mubr.bf16.mxu0 %v7101_v36 }
 0x16b   : > { %v4899_v20 = vpop.f32.mrb[48].mxu1 }
 0x16c   : > { %v7177_v22 = vadd.f32 %v4898_v16, %v1461_v54  ;;  %v4787_v60 = vpop.f32.mrb[48].mxu0  ;;  %v4900_v57 = vpop.f32.mrb[49].mxu1 }
 0x16d   : > { %v4788_v39 = vpop.f32.mrb[49].mxu0  ;;  %v4901_v21 = vadd.f32 %v4900_v57, %v4899_v20  ;;  %v4902_v29 = vpop.f32.mrb[50].mxu1 }
 0x16e   : > { %v4789_v31 = vadd.f32 %v4788_v39, %v4787_v60  ;;  %v4790_v14 = vpop.f32.mrb[50].mxu0  ;;  %v4903_v1 = vpop.f32.mrb[51].mxu1 }
 0x16f   : > { %v4791_v4 = vpop.f32.mrb[51].mxu0  ;;  %v4904_v0 = vadd.f32 %v4903_v1, %v4902_v29 }
 0x170   : > { %v1466_v36 = vadd.f32 %v4789_v31, %v7056_v46  ;;  %v4792_v51 = vadd.f32 %v4791_v4, %v4790_v14 }
 0x171   : > { %5688 = vmatmul.mubr.bf16.gmra.mrb[156].mxu0 %v751_v27 }
 0x172   : > { %v1469_v7 = vadd.f32 %v4792_v51, %v7056_v46  ;;  %v7182_v61 = vadd.f32 %v4901_v21, %v1466_v36 }
 0x173   : > { %v4905_v45 = vpop.f32.mrb[52].mxu1 }
 0x174   : > { %v7184_v53 = vadd.f32 %v4904_v0, %v1469_v7  ;;  %v4793_v59 = vpop.f32.mrb[52].mxu0  ;;  %v4906_v40 = vpop.f32.mrb[53].mxu1 }
 0x175   : > { %v4794_v50 = vpop.f32.mrb[53].mxu0  ;;  %v4907_v56 = vadd.f32 %v4906_v40, %v4905_v45  ;;  %v4908_v15 = vpop.f32.mrb[54].mxu1 }
 0x176   : > { %v4795_v5 = vadd.f32 %v4794_v50, %v4793_v59  ;;  %v4796_v58 = vpop.f32.mrb[54].mxu0  ;;  %v4909_v13 = vpop.f32.mrb[55].mxu1 }
 0x177   : > { %v4797_v30 = vpop.f32.mrb[55].mxu0  ;;  %v4910_v47 = vadd.f32 %v4909_v13, %v4908_v15 }
 0x178   : > { %v1474_v55 = vadd.f32 %v4795_v5, %v7056_v46  ;;  %v4798_v42 = vadd.f32 %v4797_v30, %v4796_v58 }
 0x17a   : > { %v1477_v25 = vadd.f32 %v4798_v42, %v7056_v46  ;;  %v7188_v32 = vadd.f32 %v4907_v56, %v1474_v55 }
 0x17b   : > { %v4911_v16 = vpop.f32.mrb[56].mxu1 }
 0x17c   : > { %v7190_v6 = vadd.f32 %v4910_v47, %v1477_v25  ;;  %v4799_v49 = vpop.f32.mrb[56].mxu0  ;;  %v4912_v54 = vpop.f32.mrb[57].mxu1 }
 0x17d   : > { %v4800_v17 = vpop.f32.mrb[57].mxu0  ;;  %v4913_v20 = vadd.f32 %v4912_v54, %v4911_v16  ;;  %v4914_v60 = vpop.f32.mrb[58].mxu1 }
 0x17e   : > { %v4801_v57 = vadd.f32 %v4800_v17, %v4799_v49  ;;  %v4802_v39 = vpop.f32.mrb[58].mxu0  ;;  %v4915_v21 = vpop.f32.mrb[59].mxu1 }
 0x17f   : > { %v4803_v29 = vpop.f32.mrb[59].mxu0  ;;  %v4916_v27 = vadd.f32 %v4915_v21, %v4914_v60 }
 0x180   : > { %v1482_v31 = vadd.f32 %v4801_v57, %v7056_v46  ;;  %v4804_v14 = vadd.f32 %v4803_v29, %v4802_v39 }
 0x182   : > { %v1485_v1 = vadd.f32 %v4804_v14, %v7056_v46  ;;  %v7194_v4 = vadd.f32 %v4913_v20, %v1482_v31 }
 0x183   : > { %v4917_v0 = vpop.f32.mrb[60].mxu1 }
 0x184   : > { %v7196_v36 = vadd.f32 %v4916_v27, %v1485_v1  ;;  %v4805_v51 = vpop.f32.mrb[60].mxu0  ;;  %v4918_v7 = vpop.f32.mrb[61].mxu1 }
 0x185   : > { %v4806_v45 = vpop.f32.mrb[61].mxu0  ;;  %v4919_v59 = vadd.f32 %v4918_v7, %v4917_v0  ;;  %v4920_v40 = vpop.f32.mrb[62].mxu1 }
 0x186   : > { %v4807_v50 = vadd.f32 %v4806_v45, %v4805_v51  ;;  %v4808_v56 = vpop.f32.mrb[62].mxu0  ;;  %v4921_v15 = vpop.f32.mrb[63].mxu1 }
 0x187   : > { %v4809_v5 = vpop.f32.mrb[63].mxu0  ;;  %v4922_v58 = vadd.f32 %v4921_v15, %v4920_v40 }
 0x188   : > { %v1490_v13 = vadd.f32 %v4807_v50, %v7056_v46  ;;  %v4810_v30 = vadd.f32 %v4809_v5, %v4808_v56 }
 0x18a   : > { %v1493_v47 = vadd.f32 %v4810_v30, %v7056_v46  ;;  %v7200_v55 = vadd.f32 %v4919_v59, %v1490_v13 }
 0x18b   : > { %v5051_v42 = vpop.f32.mrb[64].mxu1 }
 0x18c   : > { %v7202_v25 = vadd.f32 %v4922_v58, %v1493_v47  ;;  %v4939_v16 = vpop.f32.mrb[64].mxu0  ;;  %v5052_v49 = vpop.f32.mrb[65].mxu1 }
 0x18d   : > { %v4940_v54 = vpop.f32.mrb[65].mxu0  ;;  %v5053_v17 = vadd.f32 %v5052_v49, %v5051_v42  ;;  %v5054_v20 = vpop.f32.mrb[66].mxu1 }
 0x18e   : > { %v4941_v60 = vadd.f32 %v4940_v54, %v4939_v16  ;;  %v4942_v57 = vpop.f32.mrb[66].mxu0  ;;  %v5055_v39 = vpop.f32.mrb[67].mxu1 }
 0x18f   : > { %v4943_v21 = vpop.f32.mrb[67].mxu0  ;;  %v5056_v29 = vadd.f32 %v5055_v39, %v5054_v20 }
 0x190   : > { %v1692_v27 = vadd.f32 %v4941_v60, %v7064_v9  ;;  %v4944_v31 = vadd.f32 %v4943_v21, %v4942_v57 }
 0x192   : > { %v1695_v46 = vadd.f32 %v4944_v31, %v7066_v48  ;;  %v7206_v14 = vadd.f32 %v5053_v17, %v1692_v27 }
 0x193   : > { %v5057_v1 = vpop.f32.mrb[68].mxu1 }
 0x194   : > { %v4945_v0 = vpop.f32.mrb[68].mxu0  ;;  %v5058_v51 = vpop.f32.mrb[69].mxu1  ;;  %v7208_v7 = vadd.f32 %v5056_v29, %v1695_v46 }
 0x195   : > { %v4946_v45 = vpop.f32.mrb[69].mxu0  ;;  %v5059_v59 = vadd.f32 %v5058_v51, %v5057_v1  ;;  %v5060_v40 = vpop.f32.mrb[70].mxu1 }
 0x196   : > { %v4947_v50 = vadd.f32 %v4946_v45, %v4945_v0  ;;  %v4948_v56 = vpop.f32.mrb[70].mxu0  ;;  %v5061_v15 = vpop.f32.mrb[71].mxu1 }
 0x197   : > { %v4949_v5 = vpop.f32.mrb[71].mxu0  ;;  %v5062_v58 = vadd.f32 %v5061_v15, %v5060_v40 }
 0x198   : > { %v1700_v9 = vadd.f32 %v4947_v50, %v7078_v8  ;;  %v4950_v13 = vadd.f32 %v4949_v5, %v4948_v56 }
 0x19a   : > { %v1703_v48 = vadd.f32 %v4950_v13, %v7082_v28  ;;  %v7212_v30 = vadd.f32 %v5059_v59, %v1700_v9 }
 0x19b   : > { %v5063_v47 = vpop.f32.mrb[72].mxu1 }
 0x19c   : > { %v4951_v42 = vpop.f32.mrb[72].mxu0  ;;  %v5064_v16 = vpop.f32.mrb[73].mxu1  ;;  %v7214_v49 = vadd.f32 %v5062_v58, %v1703_v48 }
 0x19d   : > { %v4952_v54 = vpop.f32.mrb[73].mxu0  ;;  %v5065_v17 = vadd.f32 %v5064_v16, %v5063_v47  ;;  %v5066_v20 = vpop.f32.mrb[74].mxu1 }
 0x19e   : > { %v4953_v60 = vadd.f32 %v4952_v54, %v4951_v42  ;;  %v4954_v57 = vpop.f32.mrb[74].mxu0  ;;  %v5067_v39 = vpop.f32.mrb[75].mxu1 }
 0x19f   : > { %v4955_v21 = vpop.f32.mrb[75].mxu0  ;;  %v5068_v29 = vadd.f32 %v5067_v39, %v5066_v20 }
 0x1a0   : > { %v1708_v8 = vadd.f32 %v4953_v60, %v7094_v37  ;;  %v4956_v27 = vadd.f32 %v4955_v21, %v4954_v57 }
 0x1a2   : > { %v1711_v28 = vadd.f32 %v4956_v27, %v7098_v12  ;;  %v7218_v31 = vadd.f32 %v5065_v17, %v1708_v8 }
 0x1a3   : > { %v5069_v46 = vpop.f32.mrb[76].mxu1 }
 0x1a4   : > { %v4957_v1 = vpop.f32.mrb[76].mxu0  ;;  %v5070_v0 = vpop.f32.mrb[77].mxu1  ;;  %v7220_v51 = vadd.f32 %v5068_v29, %v1711_v28 }
 0x1a5   : > { %v4958_v45 = vpop.f32.mrb[77].mxu0  ;;  %v5071_v59 = vadd.f32 %v5070_v0, %v5069_v46  ;;  %v5072_v40 = vpop.f32.mrb[78].mxu1 }
 0x1a6   : > { %v4959_v50 = vadd.f32 %v4958_v45, %v4957_v1  ;;  %v4960_v56 = vpop.f32.mrb[78].mxu0  ;;  %v5073_v15 = vpop.f32.mrb[79].mxu1 }
 0x1a7   : > { %v4961_v5 = vpop.f32.mrb[79].mxu0  ;;  %v5074_v58 = vadd.f32 %v5073_v15, %v5072_v40 }
 0x1a8   : > { %v1716_v37 = vadd.f32 %v4959_v50, %v7108_v63  ;;  %v4962_v9 = vadd.f32 %v4961_v5, %v4960_v56 }
 0x1aa   : > { %v1719_v12 = vadd.f32 %v4962_v9, %v7110_v34  ;;  %v7224_v13 = vadd.f32 %v5071_v59, %v1716_v37 }
 0x1ab   : > { %v5075_v48 = vpop.f32.mrb[80].mxu1 }
 0x1ac   : > { %v4963_v47 = vpop.f32.mrb[80].mxu0  ;;  %v5076_v42 = vpop.f32.mrb[81].mxu1  ;;  %v7226_v16 = vadd.f32 %v5074_v58, %v1719_v12 }
 0x1ad   : > { %v4964_v54 = vpop.f32.mrb[81].mxu0  ;;  %v5077_v17 = vadd.f32 %v5076_v42, %v5075_v48  ;;  %v5078_v20 = vpop.f32.mrb[82].mxu1 }
 0x1ae   : > { %v4965_v60 = vadd.f32 %v4964_v54, %v4963_v47  ;;  %v4966_v57 = vpop.f32.mrb[82].mxu0  ;;  %v5079_v39 = vpop.f32.mrb[83].mxu1 }
 0x1af   : > { %v4967_v21 = vpop.f32.mrb[83].mxu0  ;;  %v5080_v29 = vadd.f32 %v5079_v39, %v5078_v20 }
 0x1b0   : > { %v1724_v63 = vadd.f32 %v4965_v60, %v7116_v38  ;;  %v4968_v8 = vadd.f32 %v4967_v21, %v4966_v57 }
 0x1b2   : > { %v1727_v34 = vadd.f32 %v4968_v8, %v7118_v19  ;;  %v7230_v27 = vadd.f32 %v5077_v17, %v1724_v63 }
 0x1b3   : > { %v5081_v28 = vpop.f32.mrb[84].mxu1 }
 0x1b4   : > { %v4969_v46 = vpop.f32.mrb[84].mxu0  ;;  %v5082_v1 = vpop.f32.mrb[85].mxu1  ;;  %v7232_v0 = vadd.f32 %v5080_v29, %v1727_v34 }
 0x1b5   : > { %v4970_v45 = vpop.f32.mrb[85].mxu0  ;;  %v5083_v59 = vadd.f32 %v5082_v1, %v5081_v28  ;;  %v5084_v40 = vpop.f32.mrb[86].mxu1 }
 0x1b6   : > { %v4971_v50 = vadd.f32 %v4970_v45, %v4969_v46  ;;  %v4972_v56 = vpop.f32.mrb[86].mxu0  ;;  %v5085_v15 = vpop.f32.mrb[87].mxu1 }
 0x1b7   : > { %v4973_v5 = vpop.f32.mrb[87].mxu0  ;;  %v5086_v58 = vadd.f32 %v5085_v15, %v5084_v40 }
 0x1b8   : > { %v1732_v38 = vadd.f32 %v4971_v50, %v7124_v41  ;;  %v4974_v37 = vadd.f32 %v4973_v5, %v4972_v56 }
 0x1ba   : > { %v1735_v19 = vadd.f32 %v4974_v37, %v7126_v44  ;;  %v7236_v9 = vadd.f32 %v5083_v59, %v1732_v38 }
 0x1bb   : > { %v5087_v12 = vpop.f32.mrb[88].mxu1 }
 0x1bc   : > { %v4975_v48 = vpop.f32.mrb[88].mxu0  ;;  %v5088_v47 = vpop.f32.mrb[89].mxu1  ;;  %v7238_v42 = vadd.f32 %v5086_v58, %v1735_v19 }
 0x1bd   : > { %v4976_v54 = vpop.f32.mrb[89].mxu0  ;;  %v5089_v17 = vadd.f32 %v5088_v47, %v5087_v12  ;;  %v5090_v20 = vpop.f32.mrb[90].mxu1 }
 0x1be   : > { %v4977_v60 = vadd.f32 %v4976_v54, %v4975_v48  ;;  %v4978_v57 = vpop.f32.mrb[90].mxu0  ;;  %v5091_v39 = vpop.f32.mrb[91].mxu1 }
 0x1bf   : > { %v4979_v21 = vpop.f32.mrb[91].mxu0  ;;  %v5092_v29 = vadd.f32 %v5091_v39, %v5090_v20 }
 0x1c0   : > { %v1740_v41 = vadd.f32 %v4977_v60, %v7132_v24  ;;  %v4980_v63 = vadd.f32 %v4979_v21, %v4978_v57 }
 0x1c2   : > { %v1743_v44 = vadd.f32 %v4980_v63, %v7134_v43  ;;  %v7242_v8 = vadd.f32 %v5089_v17, %v1740_v41 }
 0x1c3   : > { %v5093_v34 = vpop.f32.mrb[92].mxu1 }
 0x1c4   : > { %v4981_v28 = vpop.f32.mrb[92].mxu0  ;;  %v5094_v46 = vpop.f32.mrb[93].mxu1  ;;  %v7244_v1 = vadd.f32 %v5092_v29, %v1743_v44 }
 0x1c5   : > { %v4982_v45 = vpop.f32.mrb[93].mxu0  ;;  %v5095_v59 = vadd.f32 %v5094_v46, %v5093_v34  ;;  %v5096_v40 = vpop.f32.mrb[94].mxu1 }
 0x1c6   : > { %v4983_v50 = vadd.f32 %v4982_v45, %v4981_v28  ;;  %v4984_v56 = vpop.f32.mrb[94].mxu0  ;;  %v5097_v15 = vpop.f32.mrb[95].mxu1 }
 0x1c7   : > { %v4985_v5 = vpop.f32.mrb[95].mxu0  ;;  %v5098_v58 = vadd.f32 %v5097_v15, %v5096_v40 }
 0x1c8   : > { %v1748_v24 = vadd.f32 %v4983_v50, %v7140_v3  ;;  %v4986_v38 = vadd.f32 %v4985_v5, %v4984_v56 }
 0x1ca   : > { %v1751_v43 = vadd.f32 %v4986_v38, %v7142_v33  ;;  %v7248_v37 = vadd.f32 %v5095_v59, %v1748_v24 }
 0x1cb   : > { %v5099_v19 = vpop.f32.mrb[96].mxu1 }
 0x1cc   : > { %v4987_v12 = vpop.f32.mrb[96].mxu0  ;;  %v5100_v48 = vpop.f32.mrb[97].mxu1  ;;  %v7250_v47 = vadd.f32 %v5098_v58, %v1751_v43 }
 0x1cd   : > { %v4988_v54 = vpop.f32.mrb[97].mxu0  ;;  %v5101_v17 = vadd.f32 %v5100_v48, %v5099_v19  ;;  %v5102_v20 = vpop.f32.mrb[98].mxu1 }
 0x1ce   : > { %v4989_v60 = vadd.f32 %v4988_v54, %v4987_v12  ;;  %v4990_v57 = vpop.f32.mrb[98].mxu0  ;;  %v5103_v39 = vpop.f32.mrb[99].mxu1 }
 0x1cf   : > { %v4991_v21 = vpop.f32.mrb[99].mxu0  ;;  %v5104_v29 = vadd.f32 %v5103_v39, %v5102_v20 }
 0x1d0   : > { %v1756_v3 = vadd.f32 %v4989_v60, %v7147_v10  ;;  %v4992_v41 = vadd.f32 %v4991_v21, %v4990_v57 }
 0x1d2   : > { %v1759_v33 = vadd.f32 %v4992_v41, %v7150_v18  ;;  %v7254_v63 = vadd.f32 %v5101_v17, %v1756_v3 }
 0x1d3   : > { %v5105_v44 = vpop.f32.mrb[100].mxu1 }
 0x1d4   : > { %v4993_v34 = vpop.f32.mrb[100].mxu0  ;;  %v5106_v28 = vpop.f32.mrb[101].mxu1  ;;  %v7256_v46 = vadd.f32 %v5104_v29, %v1759_v33 }
 0x1d5   : > { %v4994_v45 = vpop.f32.mrb[101].mxu0  ;;  %v5107_v59 = vadd.f32 %v5106_v28, %v5105_v44  ;;  %v5108_v40 = vpop.f32.mrb[102].mxu1 }
 0x1d6   : > { %v4995_v50 = vadd.f32 %v4994_v45, %v4993_v34  ;;  %v4996_v56 = vpop.f32.mrb[102].mxu0  ;;  %v5109_v15 = vpop.f32.mrb[103].mxu1 }
 0x1d7   : > { %v4997_v5 = vpop.f32.mrb[103].mxu0  ;;  %v5110_v58 = vadd.f32 %v5109_v15, %v5108_v40 }
 0x1d8   : > { %v1764_v10 = vadd.f32 %v4995_v50, %v7155_v23  ;;  %v4998_v24 = vadd.f32 %v4997_v5, %v4996_v56 }
 0x1da   : > { %v1767_v18 = vadd.f32 %v4998_v24, %v7158_v11  ;;  %v7260_v38 = vadd.f32 %v5107_v59, %v1764_v10 }
 0x1db   : > { %v5111_v43 = vpop.f32.mrb[104].mxu1 }
 0x1dc   : > { %v4999_v19 = vpop.f32.mrb[104].mxu0  ;;  %v5112_v12 = vpop.f32.mrb[105].mxu1  ;;  %v7262_v48 = vadd.f32 %v5110_v58, %v1767_v18 }
 0x1dd   : > { %v5000_v54 = vpop.f32.mrb[105].mxu0  ;;  %v5113_v17 = vadd.f32 %v5112_v12, %v5111_v43  ;;  %v5114_v20 = vpop.f32.mrb[106].mxu1 }
 0x1de   : > { %v5001_v60 = vadd.f32 %v5000_v54, %v4999_v19  ;;  %v5002_v57 = vpop.f32.mrb[106].mxu0  ;;  %v5115_v39 = vpop.f32.mrb[107].mxu1 }
 0x1df   : > { %v5003_v21 = vpop.f32.mrb[107].mxu0  ;;  %v5116_v29 = vadd.f32 %v5115_v39, %v5114_v20 }
 0x1e0   : > { %v1772_v23 = vadd.f32 %v5001_v60, %v7163_v26  ;;  %v5004_v3 = vadd.f32 %v5003_v21, %v5002_v57 }
 0x1e2   : > { %v1775_v11 = vadd.f32 %v5004_v3, %v7166_v52  ;;  %v7266_v41 = vadd.f32 %v5113_v17, %v1772_v23 }
 0x1e3   : > { %v5117_v33 = vpop.f32.mrb[108].mxu1 }
 0x1e4   : > { %v5005_v44 = vpop.f32.mrb[108].mxu0  ;;  %v5118_v34 = vpop.f32.mrb[109].mxu1  ;;  %v7268_v28 = vadd.f32 %v5116_v29, %v1775_v11 }
 0x1e5   : > { %v5006_v45 = vpop.f32.mrb[109].mxu0  ;;  %v5119_v59 = vadd.f32 %v5118_v34, %v5117_v33  ;;  %v5120_v40 = vpop.f32.mrb[110].mxu1 }
 0x1e6   : > { %v5007_v50 = vadd.f32 %v5006_v45, %v5005_v44  ;;  %v5008_v56 = vpop.f32.mrb[110].mxu0  ;;  %v5121_v15 = vpop.f32.mrb[111].mxu1 }
 0x1e7   : > { %v5009_v5 = vpop.f32.mrb[111].mxu0  ;;  %v5122_v58 = vadd.f32 %v5121_v15, %v5120_v40 }
 0x1e8   : > { %v1780_v26 = vadd.f32 %v5007_v50, %v7172_v2  ;;  %v5010_v10 = vadd.f32 %v5009_v5, %v5008_v56 }
 0x1ea   : > { %v1783_v52 = vadd.f32 %v5010_v10, %v7177_v22  ;;  %v7272_v24 = vadd.f32 %v5119_v59, %v1780_v26 }
 0x1eb   : > { %v5123_v18 = vpop.f32.mrb[112].mxu1 }
 0x1ec   : > { %v5011_v43 = vpop.f32.mrb[112].mxu0  ;;  %v5124_v19 = vpop.f32.mrb[113].mxu1  ;;  %v7274_v12 = vadd.f32 %v5122_v58, %v1783_v52 }
 0x1ed   : > { %v5012_v54 = vpop.f32.mrb[113].mxu0  ;;  %v5125_v17 = vadd.f32 %v5124_v19, %v5123_v18  ;;  %v5126_v20 = vpop.f32.mrb[114].mxu1 }
 0x1ee   : > { %v5013_v60 = vadd.f32 %v5012_v54, %v5011_v43  ;;  %v5014_v57 = vpop.f32.mrb[114].mxu0  ;;  %v5127_v39 = vpop.f32.mrb[115].mxu1 }
 0x1ef   : > { %v5015_v21 = vpop.f32.mrb[115].mxu0  ;;  %v5128_v29 = vadd.f32 %v5127_v39, %v5126_v20 }
 0x1f0   : > { %v1788_v2 = vadd.f32 %v5013_v60, %v7182_v61  ;;  %v5016_v23 = vadd.f32 %v5015_v21, %v5014_v57 }
 0x1f2   : > { %v1791_v22 = vadd.f32 %v5016_v23, %v7184_v53  ;;  %v7278_v3 = vadd.f32 %v5125_v17, %v1788_v2 }
 0x1f3   : > { %v5129_v11 = vpop.f32.mrb[116].mxu1 }
 0x1f4   : > { %v5017_v33 = vpop.f32.mrb[116].mxu0  ;;  %v5130_v44 = vpop.f32.mrb[117].mxu1  ;;  %v7280_v34 = vadd.f32 %v5128_v29, %v1791_v22 }
 0x1f5   : > { %v5018_v45 = vpop.f32.mrb[117].mxu0  ;;  %v5131_v59 = vadd.f32 %v5130_v44, %v5129_v11  ;;  %v5132_v40 = vpop.f32.mrb[118].mxu1 }
 0x1f6   : > { %v5019_v50 = vadd.f32 %v5018_v45, %v5017_v33  ;;  %v5020_v56 = vpop.f32.mrb[118].mxu0  ;;  %v5133_v15 = vpop.f32.mrb[119].mxu1 }
 0x1f7   : > { %v5021_v5 = vpop.f32.mrb[119].mxu0  ;;  %v5134_v58 = vadd.f32 %v5133_v15, %v5132_v40 }
 0x1f8   : > { %v1796_v61 = vadd.f32 %v5019_v50, %v7188_v32  ;;  %v5022_v26 = vadd.f32 %v5021_v5, %v5020_v56 }
 0x1fa   : > { %v1799_v53 = vadd.f32 %v5022_v26, %v7190_v6  ;;  %v7284_v10 = vadd.f32 %v5131_v59, %v1796_v61 }
 0x1fb   : > { %v5135_v52 = vpop.f32.mrb[120].mxu1 }
 0x1fc   : > { %v5023_v18 = vpop.f32.mrb[120].mxu0  ;;  %v5136_v43 = vpop.f32.mrb[121].mxu1  ;;  %v7286_v19 = vadd.f32 %v5134_v58, %v1799_v53 }
 0x1fd   : > { %v5024_v54 = vpop.f32.mrb[121].mxu0  ;;  %v5137_v17 = vadd.f32 %v5136_v43, %v5135_v52  ;;  %v5138_v20 = vpop.f32.mrb[122].mxu1 }
 0x1fe   : > { %v5025_v60 = vadd.f32 %v5024_v54, %v5023_v18  ;;  %v5026_v57 = vpop.f32.mrb[122].mxu0  ;;  %v5139_v39 = vpop.f32.mrb[123].mxu1 }
 0x1ff   : > { %v5027_v21 = vpop.f32.mrb[123].mxu0  ;;  %v5140_v29 = vadd.f32 %v5139_v39, %v5138_v20 }
 0x200   : > { %v1804_v32 = vadd.f32 %v5025_v60, %v7194_v4  ;;  %v5028_v2 = vadd.f32 %v5027_v21, %v5026_v57 }
 0x202   : > { %v1807_v6 = vadd.f32 %v5028_v2, %v7196_v36  ;;  %v7290_v23 = vadd.f32 %v5137_v17, %v1804_v32 }
 0x203   : > { %v5141_v22 = vpop.f32.mrb[124].mxu1 }
 0x204   : > { %v5029_v11 = vpop.f32.mrb[124].mxu0  ;;  %v5142_v33 = vpop.f32.mrb[125].mxu1  ;;  %v7292_v44 = vadd.f32 %v5140_v29, %v1807_v6 }
 0x205   : > { %v5030_v45 = vpop.f32.mrb[125].mxu0  ;;  %v5143_v59 = vadd.f32 %v5142_v33, %v5141_v22  ;;  %v5144_v40 = vpop.f32.mrb[126].mxu1 }
 0x206   : > { %v5031_v50 = vadd.f32 %v5030_v45, %v5029_v11  ;;  %v5032_v56 = vpop.f32.mrb[126].mxu0  ;;  %v5145_v15 = vpop.f32.mrb[127].mxu1 }
 0x207   : > { %v5033_v5 = vpop.f32.mrb[127].mxu0  ;;  %v5146_v58 = vadd.f32 %v5145_v15, %v5144_v40 }
 0x208   : > { %v1812_v4 = vadd.f32 %v5031_v50, %v7200_v55  ;;  %v5034_v61 = vadd.f32 %v5033_v5, %v5032_v56 }
 0x20a   : > { %v1815_v36 = vadd.f32 %v5034_v61, %v7202_v25  ;;  %v7296_v26 = vadd.f32 %v5143_v59, %v1812_v4 }
 0x20c   : > { %v5661_v53 = vpop.f32.mrb[128].mxu0  ;;  %v7298_v52 = vadd.f32 %v5146_v58, %v1815_v36 }
 0x20d   : > { %v7301_v18 = vadd.f32 %v5661_v53, %v7212_v30  ;;  %v2013_v43 = vpop.f32.mrb[129].mxu0 }
 0x20e   : > { %v7304_v54 = vadd.f32 %v2013_v43, %v7206_v14  ;;  %v5662_v17 = vpop.f32.mrb[130].mxu0 }
 0x20f   : > { %v7307_v20 = vadd.f32 %v5662_v17, %v7214_v49  ;;  %v2016_v55 = vpop.f32.mrb[131].mxu0 }
 0x210   : > { %v7310_v60 = vadd.f32 %v2016_v55, %v7208_v7 }
 0x212   : > { %v2140_v25 = vadd.f32 %v7310_v60, %v7304_v54 }
 0x214   : > { %v2141_v57 = vadd.f32 %v2140_v25, %v7301_v18  ;;  %v5665_v39 = vpop.f32.mrb[132].mxu0 }
 0x215   : > { %v7316_v30 = vadd.f32 %v5665_v39, %v7224_v13  ;;  %v2029_v21 = vpop.f32.mrb[133].mxu0 }
 0x216   : > { %v7319_v14 = vadd.f32 %v2029_v21, %v7218_v31  ;;  %v2142_v49 = vadd.f32 %v2141_v57, %v7307_v20  ;;  %v5666_v29 = vpop.f32.mrb[134].mxu0 }
 0x217   : > { %v7323_v32 = vadd.f32 %v5666_v29, %v7226_v16  ;;  %v2032_v7 = vpop.f32.mrb[135].mxu0 }
 0x218   : > { %v2143_v2 = vadd.f32 %v2142_v49, %v7319_v14  ;;  %v7327_v6 = vadd.f32 %v2032_v7, %v7220_v51 }
 0x21a   : > { %v2144_v22 = vadd.f32 %v2143_v2, %v7327_v6 }
 0x21c   : > { %v2145_v13 = vadd.f32 %v2144_v22, %v7316_v30  ;;  %v5669_v11 = vpop.f32.mrb[136].mxu0 }
 0x21d   : > { %v7332_v31 = vadd.f32 %v5669_v11, %v7236_v9  ;;  %v2045_v33 = vpop.f32.mrb[137].mxu0 }
 0x21e   : > { %v7335_v45 = vadd.f32 %v2045_v33, %v7230_v27  ;;  %v2146_v16 = vadd.f32 %v2145_v13, %v7323_v32  ;;  %v5670_v59 = vpop.f32.mrb[138].mxu0 }
 0x21f   : > { %v7339_v40 = vadd.f32 %v5670_v59, %v7238_v42  ;;  %v2048_v51 = vpop.f32.mrb[139].mxu0 }
 0x220   : > { %v2147_v50 = vadd.f32 %v2146_v16, %v7335_v45  ;;  %v7343_v56 = vadd.f32 %v2048_v51, %v7232_v0 }
 0x222   : > { %v2148_v15 = vadd.f32 %v2147_v50, %v7343_v56 }
 0x224   : > { %v2149_v9 = vadd.f32 %v2148_v15, %v7332_v31  ;;  %v5673_v5 = vpop.f32.mrb[140].mxu0 }
 0x225   : > { %v7348_v27 = vadd.f32 %v5673_v5, %v7248_v37  ;;  %v2061_v58 = vpop.f32.mrb[141].mxu0 }
 0x226   : > { %v7351_v4 = vadd.f32 %v2061_v58, %v7242_v8  ;;  %v2150_v42 = vadd.f32 %v2149_v9, %v7339_v40  ;;  %v5674_v61 = vpop.f32.mrb[142].mxu0 }
 0x227   : > { %v7355_v36 = vadd.f32 %v5674_v61, %v7250_v47  ;;  %v2064_v0 = vpop.f32.mrb[143].mxu0 }
 0x228   : > { %v2151_v53 = vadd.f32 %v2150_v42, %v7351_v4  ;;  %v7359_v43 = vadd.f32 %v2064_v0, %v7244_v1 }
 0x22a   : > { %v2152_v17 = vadd.f32 %v2151_v53, %v7359_v43 }
 0x22c   : > { %v2153_v37 = vadd.f32 %v2152_v17, %v7348_v27  ;;  %v5677_v55 = vpop.f32.mrb[144].mxu0 }
 0x22d   : > { %v7364_v8 = vadd.f32 %v5677_v55, %v7260_v38  ;;  %v2077_v25 = vpop.f32.mrb[145].mxu0 }
 0x22e   : > { %v7367_v57 = vadd.f32 %v2077_v25, %v7254_v63  ;;  %v2154_v47 = vadd.f32 %v2153_v37, %v7355_v36  ;;  %v5678_v39 = vpop.f32.mrb[146].mxu0 }
 0x22f   : > { %v7371_v21 = vadd.f32 %v5678_v39, %v7262_v48  ;;  %v2080_v1 = vpop.f32.mrb[147].mxu0 }
 0x230   : > { %v2155_v49 = vadd.f32 %v2154_v47, %v7367_v57  ;;  %v7375_v29 = vadd.f32 %v2080_v1, %v7256_v46 }
 0x232   : > { %v2156_v7 = vadd.f32 %v2155_v49, %v7375_v29  ;;  %v5852_v49 = vld [vmem:[%s8933_s3 + $0x40] sm:$0xff]  }
 0x233   : > { %5171 = vmatprep.subr.bf16.mxu1 %v5852_v49 }
 0x234   : > { %v2157_v38 = vadd.f32 %v2156_v7, %v7364_v8  ;;  %v5681_v2 = vpop.f32.mrb[148].mxu0 }
 0x235   : > { %v7380_v63 = vadd.f32 %v5681_v2, %v7272_v24  ;;  %v2093_v22 = vpop.f32.mrb[149].mxu0 }
 0x236   : > { %v7383_v13 = vadd.f32 %v2093_v22, %v7266_v41  ;;  %v2158_v48 = vadd.f32 %v2157_v38, %v7371_v21  ;;  %v5682_v11 = vpop.f32.mrb[150].mxu0  ;;  %v5868_v38 = vld [vmem:[%s8933_s3 + $0xc8] sm:$0xff]  }
 0x237   : > { %v7387_v33 = vadd.f32 %v5682_v11, %v7274_v12  ;;  %v2096_v46 = vpop.f32.mrb[151].mxu0  ;;  %v5854_v22 = vld [vmem:[%s8933_s3 + $0x48] sm:$0xff]  }
 0x238   : > { %v2159_v16 = vadd.f32 %v2158_v48, %v7383_v13  ;;  %v7391_v59 = vadd.f32 %v2096_v46, %v7268_v28  ;;  %v5869_v48 = vld [vmem:[%s8933_s3 + $0x88] sm:$0xff]  }
 0x239   : > { %v5855_v11 = vld [vmem:[%s8933_s3 + $0x8] sm:$0xff]  }
 0x23a   : > { %v2160_v51 = vadd.f32 %v2159_v16, %v7391_v59  ;;  %v5870_v16 = vld [vmem:[%s8933_s3 + $0xd0] sm:$0xff]  }
 0x23c   : > { %v2161_v24 = vadd.f32 %v2160_v51, %v7380_v63  ;;  %v5685_v50 = vpop.f32.mrb[152].mxu0 }
 0x23d   : > { %v7396_v41 = vadd.f32 %v5685_v50, %v7284_v10  ;;  %v2109_v15 = vpop.f32.mrb[153].mxu0  ;;  %v5871_v50 = vld [vmem:[%s8933_s3 + $0x90] sm:$0xff]  }
 0x23e   : > { %v7399_v9 = vadd.f32 %v2109_v15, %v7278_v3  ;;  %v2162_v12 = vadd.f32 %v2161_v24, %v7387_v33  ;;  %v5686_v5 = vpop.f32.mrb[154].mxu0  ;;  %v5856_v24 = vld [vmem:[%s8933_s3 + $0x50] sm:$0xff]  }
 0x23f   : > { %v7403_v58 = vadd.f32 %v5686_v5, %v7286_v19  ;;  %v2112_v28 = vpop.f32.mrb[155].mxu0  ;;  %v5857_v15 = vld [vmem:[%s8933_s3 + $0x10] sm:$0xff]   ;;  %v5872_v5 = vld [vmem:[%s8933_s3 + $0xd8] sm:$0xff]  }
 0x240   : > { %v2163_v42 = vadd.f32 %v2162_v12, %v7399_v9  ;;  %v7407_v61 = vadd.f32 %v2112_v28, %v7280_v34 }
 0x242   : > { %v2164_v0 = vadd.f32 %v2163_v42, %v7407_v61  ;;  %v5858_v42 = vld [vmem:[%s8933_s3 + $0x58] sm:$0xff]  }
 0x244   : > { %v2165_v10 = vadd.f32 %v2164_v0, %v7396_v41  ;;  %v5689_v53 = vpop.f32.mrb[156].mxu0  ;;  %v5873_v0 = vld [vmem:[%s8933_s3 + $0x98] sm:$0xff]  }
 0x245   : > { %v7412_v3 = vadd.f32 %v5689_v53, %v7296_v26  ;;  %v2125_v17 = vpop.f32.mrb[157].mxu0  ;;  %v5864_v26 = vld [vmem:[%s8933_s3 + $0xc0] sm:$0xff]  }
 0x246   : > { %v7415_v37 = vadd.f32 %v2125_v17, %v7290_v23  ;;  %v2166_v19 = vadd.f32 %v2165_v10, %v7403_v58  ;;  %v5690_v55 = vpop.f32.mrb[158].mxu0  ;;  %5283 = vmatprep.subr.bf16.mxu0 %v5864_v26  ;;  %v5859_v10 = vld [vmem:[%s8933_s3 + $0x18] sm:$0xff]   ;;  %v5874_v17 = vld [vmem:[%s8933_s3 + $0xe0] sm:$0xff]  }
 0x247   : > { %v7419_v25 = vadd.f32 %v5690_v55, %v7298_v52  ;;  %v2128_v34 = vpop.f32.mrb[159].mxu0  ;;  %v5866_v52 = vld [vmem:[%s8933_s3 + $0x80] sm:$0xff]  }
 0x248   : > { %v2167_v47 = vadd.f32 %v2166_v19, %v7415_v37  ;;  %v7423_v39 = vadd.f32 %v2128_v34, %v7292_v44  ;;  %v5853_v44 = vld [vmem:[%s8933_s3] sm:$0xff]   ;;  %5284 = vmatpush3.bf16.msra.mxu0 %v5866_v52 }
 0x249   : > { %5172 = vmatpush3.bf16.msra.mxu1 %v5853_v44  ;;  %5285 = vmatprep.subr.bf16.mxu0 %v5868_v38  ;;  %v5860_v55 = vld [vmem:[%s8933_s3 + $0x60] sm:$0xff]   ;;  %v5862_v44 = vld [vmem:[%s8933_s3 + $0x68] sm:$0xff]  }
 0x24a   : > { %v2168_v1 = vadd.f32 %v2167_v47, %v7423_v39  ;;  %5173 = vmatprep.subr.bf16.mxu1 %v5854_v22  ;;  %v5876_v34 = vld [vmem:[%s8933_s3 + $0xa0] sm:$0xff]  }
 0x24b   : > { %v5861_v47 = vld [vmem:[%s8933_s3 + $0x20] sm:$0xff]  }
 0x24c   : > { %v2169_v23 = vadd.f32 %v2168_v1, %v7412_v3  ;;  %5286 = vmatpush3.bf16.msra.mxu0 %v5869_v48  ;;  %v5878_v1 = vld [vmem:[%s8933_s3 + $0xe8] sm:$0xff]   ;;  %v5867_v48 = vld [vmem:[%s8933_s3 + $0x30] sm:$0xff]  }
 0x24d   : > { %5174 = vmatpush3.bf16.msra.mxu1 %v5855_v11  ;;  %5287 = vmatprep.subr.bf16.mxu0 %v5870_v16  ;;  %v5875_v11 = vld [vmem:[%s8933_s3 + $0x78] sm:$0xff]  }
 0x24e   : > { %v2170_v7 = vadd.f32 %v2169_v23, %v7419_v25  ;;  %5175 = vmatprep.subr.bf16.mxu1 %v5856_v24 }
 0x250   : > { %v2171_v2 = vrot.slane %v2170_v7, 4  ;;  %5288 = vmatpush3.bf16.msra.mxu0 %v5871_v50 }
 0x251   : > { %5176 = vmatpush3.bf16.msra.mxu1 %v5857_v15  ;;  %5289 = vmatprep.subr.bf16.mxu0 %v5872_v5 }
 0x252   : > { %v2172_v46 = vadd.f32 %v2171_v2, %v2170_v7  ;;  %5177 = vmatprep.subr.bf16.mxu1 %v5858_v42 }
 0x254   : > { %v2173_v51 = vrot.slane %v2172_v46, 2  ;;  %5290 = vmatpush3.bf16.msra.mxu0 %v5873_v0 }
 0x255   : > { %5178 = vmatpush3.bf16.msra.mxu1 %v5859_v10  ;;  %5291 = vmatprep.subr.bf16.mxu0 %v5874_v17 }
 0x256   : > { %v2174_v12 = vadd.f32 %v2173_v51, %v2172_v46  ;;  %5179 = vmatprep.subr.bf16.mxu1 %v5860_v55  ;;  %v5881_v46 = vld [vmem:[%s8933_s3 + $0xb0] sm:$0xff]  }
 0x258   : > { %v2175_v28 = vrot.slane %v2174_v12, 1  ;;  %5292 = vmatpush3.bf16.msra.mxu0 %v5876_v34 }
 0x259   : > { %5180 = vmatpush3.bf16.msra.mxu1 %v5861_v47  ;;  %5293 = vmatprep.subr.bf16.mxu0 %v5878_v1 }
 0x25a   : > { %v2176_v53 = vadd.f32 %v2175_v28, %v2174_v12  ;;  %5181 = vmatprep.subr.bf16.mxu1 %v5862_v44 }
 0x25c   : > { %v7479_v19 = vmul.f32 0.00390625, %v2176_v53 }
 0x25e   : > { %v7495_v26 = vsub.f32 %v7335_v45, %v7479_v19  ;;  %v7499_v23 = vsub.f32 %v7343_v56, %v7479_v19  ;;  %v7503_v49 = vsub.f32 %v7332_v31, %v7479_v19  ;;  %v7507_v52 = vsub.f32 %v7339_v40, %v7479_v19  ;;  %v5863_v45 = vld [vmem:[%s8933_s3 + $0x28] sm:$0xff]   ;;  %v5865_v56 = vld [vmem:[%s8933_s3 + $0x70] sm:$0xff]  }
 0x25f   : > { %v7520_v31 = vsub.f32 %v7351_v4, %v7479_v19  ;;  %v7524_v40 = vsub.f32 %v7359_v43, %v7479_v19  ;;  %v7528_v7 = vsub.f32 %v7348_v27, %v7479_v19  ;;  %v7532_v38 = vsub.f32 %v7355_v36, %v7479_v19  ;;  %v5879_v36 = vld [vmem:[%s8933_s3 + $0xa8] sm:$0xff]   ;;  %5182 = vmatpush3.bf16.msra.mxu1 %v5863_v45 }
 0x260   : > { %v7536_v2 = vsub.f32 %v7367_v57, %v7479_v19  ;;  %v7540_v4 = vsub.f32 %v7375_v29, %v7479_v19  ;;  %v7544_v43 = vsub.f32 %v7364_v8, %v7479_v19  ;;  %v7548_v27 = vsub.f32 %v7371_v21, %v7479_v19  ;;  %v5880_v57 = vld [vmem:[%s8933_s3 + $0xf0] sm:$0xff]   ;;  %5183 = vmatprep.subr.bf16.mxu1 %v5865_v56 }
 0x261   : > { %v7558_v29 = vsub.f32 %v7383_v13, %v7479_v19  ;;  %v7562_v8 = vsub.f32 %v7391_v59, %v7479_v19  ;;  %v7566_v21 = vsub.f32 %v7380_v63, %v7479_v19  ;;  %v7570_v22 = vsub.f32 %v7387_v33, %v7479_v19  ;;  %5294 = vmatpush3.bf16.msra.mxu0 %v5879_v36 }
 0x262   : > { %v7577_v13 = vsub.f32 %v7399_v9, %v7479_v19  ;;  %v7581_v59 = vsub.f32 %v7407_v61, %v7479_v19  ;;  %v7585_v63 = vsub.f32 %v7396_v41, %v7479_v19  ;;  %v7589_v33 = vsub.f32 %v7403_v58, %v7479_v19  ;;  %5295 = vmatprep.subr.bf16.mxu0 %v5880_v57 }
 0x263   : > { %v7596_v9 = vsub.f32 %v7415_v37, %v7479_v19  ;;  %v7600_v61 = vsub.f32 %v7423_v39, %v7479_v19  ;;  %v7604_v41 = vsub.f32 %v7412_v3, %v7479_v19  ;;  %v7608_v58 = vsub.f32 %v7419_v25, %v7479_v19  ;;  %v5882_v3 = vld [vmem:[%s8933_s3 + $0xf8] sm:$0xff]   ;;  %5184 = vmatpush3.bf16.msra.mxu1 %v5867_v48 }
 0x264   : > { %v7615_v37 = vsub.f32 %v7304_v54, %v7479_v19  ;;  %v7619_v39 = vsub.f32 %v7310_v60, %v7479_v19  ;;  %v5877_v25 = vld [vmem:[%s8933_s3 + $0x38] sm:$0xff]   ;;  %5185 = vmatprep.subr.bf16.mxu1 %v5875_v11  ;;  %v5884_v60 = vld [vmem:[%s8933_s3 + $0x140] sm:$0xff]   ;;  %v7635_v16 = vsub.f32 %v7301_v18, %v7479_v19  ;;  %v7643_v50 = vsub.f32 %v7307_v20, %v7479_v19 }
 0x265   : > { %5296 = vmatpush3.bf16.msra.mxu0 %v5881_v46  ;;  %v5883_v54 = vld [vmem:[%s8933_s3 + $0xb8] sm:$0xff]   ;;  %v7647_v15 = vsub.f32 %v7319_v14, %v7479_v19  ;;  %v7653_v5 = vsub.f32 %v7327_v6, %v7479_v19  ;;  %v7659_v20 = vsub.f32 %v7316_v30, %v7479_v19  ;;  %v7665_v10 = vsub.f32 %v7323_v32, %v7479_v19 }
 0x266   : > { %v2211_v51 = vmul.f32 %v7615_v37, %v7615_v37  ;;  %v2212_v24 = vmul.f32 %v7619_v39, %v7619_v39  ;;  %5297 = vmatprep.subr.bf16.mxu0 %v5882_v3  ;;  %v2213_v18 = vmul.f32 %v7635_v16, %v7635_v16  ;;  %v2214_v28 = vmul.f32 %v7643_v50, %v7643_v50 }
 0x267   : > { %5186 = vmatpush3.bf16.msra.mxu1 %v5877_v25  ;;  %v2215_v14 = vmul.f32 %v7647_v15, %v7647_v15  ;;  %v2216_v6 = vmul.f32 %v7653_v5, %v7653_v5  ;;  %v2217_v17 = vmul.f32 %v7659_v20, %v7659_v20  ;;  %v2218_v30 = vmul.f32 %v7665_v10, %v7665_v10 }
 0x268   : > { %5395 = vmatprep.subr.bf16.mxu1 %v5884_v60  ;;  %v2243_v12 = vadd.f32 %v2212_v24, %v2211_v51  ;;  %v2219_v47 = vmul.f32 %v7495_v26, %v7495_v26  ;;  %v2220_v32 = vmul.f32 %v7499_v23, %v7499_v23  ;;  %v2221_v44 = vmul.f32 %v7503_v49, %v7503_v49 }
 0x269   : > { %5298 = vmatpush3.bf16.msra.mxu0 %v5883_v54  ;;  %v2222_v56 = vmul.f32 %v7507_v52, %v7507_v52  ;;  %v2223_v57 = vmul.f32 %v7520_v31, %v7520_v31  ;;  %v2224_v11 = vmul.f32 %v7524_v40, %v7524_v40  ;;  %v2225_v3 = vmul.f32 %v7528_v7, %v7528_v7 }
 0x26a   : > { %v2244_v42 = vadd.f32 %v2243_v12, %v2213_v18  ;;  %v2226_v54 = vmul.f32 %v7532_v38, %v7532_v38  ;;  %v2227_v51 = vmul.f32 %v7536_v2, %v7536_v2  ;;  %v2228_v18 = vmul.f32 %v7540_v4, %v7540_v4 }
 0x26c   : > { %v2245_v0 = vadd.f32 %v2244_v42, %v2214_v28  ;;  %v2229_v28 = vmul.f32 %v7544_v43, %v7544_v43 }
 0x26e   : > { %v2246_v53 = vadd.f32 %v2245_v0, %v2215_v14  ;;  %v2230_v14 = vmul.f32 %v7548_v27, %v7548_v27 }
 0x270   : > { %v2247_v55 = vadd.f32 %v2246_v53, %v2216_v6  ;;  %v2231_v6 = vmul.f32 %v7558_v29, %v7558_v29 }
 0x272   : > { %v2248_v34 = vadd.f32 %v2247_v55, %v2217_v17  ;;  %v2232_v17 = vmul.f32 %v7562_v8, %v7562_v8 }
 0x274   : > { %v2249_v1 = vadd.f32 %v2248_v34, %v2218_v30  ;;  %v2233_v30 = vmul.f32 %v7566_v21, %v7566_v21 }
 0x276   : > { %v2250_v19 = vadd.f32 %v2249_v1, %v2219_v47  ;;  %v2234_v47 = vmul.f32 %v7570_v22, %v7570_v22 }
 0x278   : > { %v2251_v45 = vadd.f32 %v2250_v19, %v2220_v32  ;;  %v2235_v32 = vmul.f32 %v7577_v13, %v7577_v13 }
 0x27a   : > { %v2252_v36 = vadd.f32 %v2251_v45, %v2221_v44  ;;  %v2236_v44 = vmul.f32 %v7581_v59, %v7581_v59 }
 0x27c   : > { %v2253_v48 = vadd.f32 %v2252_v36, %v2222_v56  ;;  %v2237_v56 = vmul.f32 %v7585_v63, %v7585_v63 }
 0x27e   : > { %v2254_v46 = vadd.f32 %v2253_v48, %v2223_v57  ;;  %v2238_v57 = vmul.f32 %v7589_v33, %v7589_v33 }
 0x280   : > { %v2255_v25 = vadd.f32 %v2254_v46, %v2224_v11  ;;  %v2239_v11 = vmul.f32 %v7596_v9, %v7596_v9 }
 0x282   : > { %v2256_v60 = vadd.f32 %v2255_v25, %v2225_v3  ;;  %v2240_v3 = vmul.f32 %v7600_v61, %v7600_v61 }
 0x284   : > { %v2257_v24 = vadd.f32 %v2256_v60, %v2226_v54  ;;  %v2241_v54 = vmul.f32 %v7604_v41, %v7604_v41 }
 0x286   : > { %v2258_v12 = vadd.f32 %v2257_v24, %v2227_v51  ;;  %v2242_v51 = vmul.f32 %v7608_v58, %v7608_v58 }
 0x288   : > { %v2259_v42 = vadd.f32 %v2258_v12, %v2228_v18  ;;  %v5893_v18 = vld [vmem:[%s8933_s3 + $0x1c0] sm:$0xff]  }
 0x289   : > { %5507 = vmatprep.subr.bf16.mxu0 %v5893_v18 }
 0x28a   : > { %v2260_v0 = vadd.f32 %v2259_v42, %v2229_v28 }
 0x28c   : > { %v2261_v53 = vadd.f32 %v2260_v0, %v2230_v14 }
 0x28e   : > { %v2262_v55 = vadd.f32 %v2261_v53, %v2231_v6 }
 0x290   : > { %v2263_v34 = vadd.f32 %v2262_v55, %v2232_v17 }
 0x292   : > { %v2264_v1 = vadd.f32 %v2263_v34, %v2233_v30 }
 0x294   : > { %v2265_v19 = vadd.f32 %v2264_v1, %v2234_v47 }
 0x296   : > { %v2266_v45 = vadd.f32 %v2265_v19, %v2235_v32 }
 0x298   : > { %v2267_v36 = vadd.f32 %v2266_v45, %v2236_v44 }
 0x29a   : > { %v2268_v48 = vadd.f32 %v2267_v36, %v2237_v56 }
 0x29c   : > { %v2269_v46 = vadd.f32 %v2268_v48, %v2238_v57 }
 0x29e   : > { %v2270_v25 = vadd.f32 %v2269_v46, %v2239_v11 }
 0x2a0   : > { %v2271_v60 = vadd.f32 %v2270_v25, %v2240_v3 }
 0x2a2   : > { %v2272_v24 = vadd.f32 %v2271_v60, %v2241_v54 }
 0x2a4   : > { %v2273_v12 = vadd.f32 %v2272_v24, %v2242_v51 }
 0x2a6   : > { %v2274_v28 = vrot.slane %v2273_v12, 4 }
 0x2a8   : > { %v2275_v42 = vadd.f32 %v2274_v28, %v2273_v12 }
 0x2aa   : > { %v2276_v14 = vrot.slane %v2275_v42, 2 }
 0x2ac   : > { %v2277_v0 = vadd.f32 %v2276_v14, %v2275_v42 }
 0x2ae   : > { %v2278_v6 = vrot.slane %v2277_v0, 1 }
 0x2b0   : > { %v2279_v53 = vadd.f32 %v2278_v6, %v2277_v0 }
 0x2b2   : > { %v2280_v17 = vmul.f32 0.00390625, %v2279_v53 }
 0x2b4   : > { %v2281_v55 = vadd.f32 1e-05, %v2280_v17 }
 0x2b6   : > { %5924 = vrsqrt.f32 %v2281_v55 }
 0x2c0   : > { %v5925_v30 = vpop.eup %5924 }
 0x2c1   : > { %v2312_v34 = vmul.f32 %v5925_v30, %v7600_v61  ;;  %v2283_v47 = vmul.f32 %v5925_v30, %v7615_v37  ;;  %v2284_v1 = vmul.f32 %v5925_v30, %v7619_v39  ;;  %v2285_v32 = vmul.f32 %v5925_v30, %v7635_v16 }
 0x2c2   : > { %v2286_v19 = vmul.f32 %v5925_v30, %v7643_v50  ;;  %v2287_v44 = vmul.f32 %v5925_v30, %v7647_v15  ;;  %v2288_v45 = vmul.f32 %v5925_v30, %v7653_v5  ;;  %v2289_v56 = vmul.f32 %v5925_v30, %v7659_v20 }
 0x2c3   : > { %v2344_v36 = vmax.f32 %v2312_v34, 0.0  ;;  %v7733_v57 = vmul.f32 %v5925_v30, %v7665_v10  ;;  %v2291_v61 = vmul.f32 %v5925_v30, %v7495_v26  ;;  %v7737_v37 = vmul.f32 %v5925_v30, %v7499_v23 }
 0x2c4   : > { %v2293_v39 = vmul.f32 %v5925_v30, %v7503_v49  ;;  %v7741_v16 = vmul.f32 %v5925_v30, %v7507_v52  ;;  %v7744_v50 = vmul.f32 %v5925_v30, %v7520_v31  ;;  %v7747_v15 = vmul.f32 %v5925_v30, %v7524_v40 }
 0x2c5   : > { %2376 = vst [vmem:[#allocation2 + $0x171] sm:$0xff] %v2344_v36  ;;  %2409 = vst [vmem:[#allocation2 + $0x173] sm:$0x40] %v2344_v36  ;;  %v7750_v5 = vmul.f32 %v5925_v30, %v7528_v7  ;;  %v7753_v26 = vmul.f32 %v5925_v30, %v7532_v38  ;;  %v7756_v23 = vmul.f32 %v5925_v30, %v7536_v2  ;;  %v2316_v20 = vmax.f32 %v2284_v1, 0.0 }
 0x2c6   : > { %v7759_v49 = vmul.f32 %v5925_v30, %v7540_v4  ;;  %v7762_v52 = vmul.f32 %v5925_v30, %v7544_v43  ;;  %v7765_v31 = vmul.f32 %v5925_v30, %v7548_v27  ;;  %v7768_v40 = vmul.f32 %v5925_v30, %v7558_v29 }
 0x2c7   : > { %v7771_v7 = vmul.f32 %v5925_v30, %v7562_v8  ;;  %v7774_v38 = vmul.f32 %v5925_v30, %v7566_v21  ;;  %v7777_v2 = vmul.f32 %v5925_v30, %v7570_v22  ;;  %v7780_v4 = vmul.f32 %v5925_v30, %v7577_v13  ;;  %2348 = vst [vmem:[#allocation2 + $0x21] sm:$0xff] %v2316_v20 }
 0x2c8   : > { %v7783_v43 = vmul.f32 %v5925_v30, %v7581_v59  ;;  %v7786_v27 = vmul.f32 %v5925_v30, %v7585_v63  ;;  %v7789_v29 = vmul.f32 %v5925_v30, %v7589_v33  ;;  %v7792_v8 = vmul.f32 %v5925_v30, %v7596_v9  ;;  %2395 = vst [vmem:[#allocation2 + $0x23] sm:$0x40] %v2316_v20 }
 0x2c9   : > { %v7795_v21 = vmul.f32 %v5925_v30, %v7604_v41  ;;  %v7798_v22 = vmul.f32 %v5925_v30, %v7608_v58  ;;  %v2315_v13 = vmax.f32 %v2283_v47, 0.0  ;;  %v2317_v10 = vmax.f32 %v2285_v32, 0.0 }
 0x2ca   : > { %v2318_v59 = vmax.f32 %v2286_v19, 0.0  ;;  %v2319_v48 = vmax.f32 %v2287_v44, 0.0  ;;  %v2320_v11 = vmax.f32 %v2288_v45, 0.0  ;;  %v2321_v63 = vmax.f32 %v2289_v56, 0.0 }
 0x2cb   : > { %v2322_v46 = vmax.f32 %v7733_v57, 0.0  ;;  %v2323_v33 = vmax.f32 %v2291_v61, 0.0  ;;  %v2324_v3 = vmax.f32 %v7737_v37, 0.0  ;;  %v2325_v9 = vmax.f32 %v2293_v39, 0.0  ;;  %2347 = vst [vmem:[#allocation2 + $0x19] sm:$0xff] %v2315_v13  ;;  %2349 = vst [vmem:[#allocation2 + $0x31] sm:$0xff] %v2317_v10 }
 0x2cc   : > { %2379 = vst [vmem:[#allocation2 + $0x17] sm:$0x2] %v2315_v13  ;;  %2380 = vst [vmem:[#allocation2 + $0x2f] sm:$0x2] %v2317_v10  ;;  %v2326_v41 = vmax.f32 %v7741_v16, 0.0  ;;  %v2327_v58 = vmax.f32 %v7744_v50, 0.0 }
 0x2cd   : > { %v2328_v25 = vmax.f32 %v7747_v15, 0.0  ;;  %v2329_v54 = vmax.f32 %v7750_v5, 0.0  ;;  %2350 = vst [vmem:[#allocation2 + $0x39] sm:$0xff] %v2318_v59  ;;  %2351 = vst [vmem:[#allocation2 + $0x49] sm:$0xff] %v2319_v48  ;;  %v2330_v60 = vmax.f32 %v7753_v26, 0.0  ;;  %v2331_v51 = vmax.f32 %v7756_v23, 0.0 }
 0x2ce   : > { %2352 = vst [vmem:[#allocation2 + $0x51] sm:$0xff] %v2320_v11  ;;  %2353 = vst [vmem:[#allocation2 + $0x61] sm:$0xff] %v2321_v63  ;;  %v2332_v24 = vmax.f32 %v7759_v49, 0.0  ;;  %v2333_v18 = vmax.f32 %v7762_v52, 0.0  ;;  %v2334_v12 = vmax.f32 %v7765_v31, 0.0  ;;  %v2335_v28 = vmax.f32 %v7768_v40, 0.0 }
 0x2cf   : > { %2381 = vst [vmem:[#allocation2 + $0x47] sm:$0x2] %v2319_v48  ;;  %2382 = vst [vmem:[#allocation2 + $0x5f] sm:$0x2] %v2321_v63  ;;  %v2336_v42 = vmax.f32 %v7771_v7, 0.0  ;;  %v2337_v14 = vmax.f32 %v7774_v38, 0.0 }
 0x2d0   : > { %2396 = vst [vmem:[#allocation2 + $0x3b] sm:$0x40] %v2318_v59  ;;  %2397 = vst [vmem:[#allocation2 + $0x53] sm:$0x40] %v2320_v11  ;;  %v2419_v0 = vld [vmem:[#allocation2 + $0x178] sm:$0x3] }
 0x2d1   : > { %2354 = vst [vmem:[#allocation2 + $0x69] sm:$0xff] %v2322_v46  ;;  %2355 = vst [vmem:[#allocation2 + $0x79] sm:$0xff] %v2323_v33  ;;  %v2338_v6 = vmax.f32 %v7777_v2, 0.0  ;;  %v2339_v53 = vmax.f32 %v7780_v4, 0.0  ;;  %v2340_v17 = vmax.f32 %v7783_v43, 0.0  ;;  %v2341_v55 = vmax.f32 %v7786_v27, 0.0 }
 0x2d2   : > { %2356 = vst [vmem:[#allocation2 + $0x81] sm:$0xff] %v2324_v3  ;;  %2357 = vst [vmem:[#allocation2 + $0x91] sm:$0xff] %v2325_v9  ;;  %v2342_v30 = vmax.f32 %v7789_v29, 0.0  ;;  %v2343_v34 = vmax.f32 %v7792_v8, 0.0  ;;  %v2345_v47 = vmax.f32 %v7795_v21, 0.0  ;;  %v2346_v1 = vmax.f32 %v7798_v22, 0.0 }
 0x2d3   : > { %2383 = vst [vmem:[#allocation2 + $0x77] sm:$0x2] %v2323_v33  ;;  %2384 = vst [vmem:[#allocation2 + $0x8f] sm:$0x2] %v2325_v9  ;;  %v2411_v32 = vld [vmem:[#allocation2 + $0x30] sm:$0xff]  ;;  %v2426_v19 = vld [vmem:[#allocation2 + $0x18] sm:$0xff] }
 0x2d4   : > { %2398 = vst [vmem:[#allocation2 + $0x6b] sm:$0x40] %v2322_v46  ;;  %2399 = vst [vmem:[#allocation2 + $0x83] sm:$0x40] %v2324_v3  ;;  %v2427_v44 = vld [vmem:[#allocation2 + $0x20] sm:$0xff]  ;;  %v2412_v45 = vld [vmem:[#allocation2 + $0x38] sm:$0xff] }
 0x2d5   : > { %2358 = vst [vmem:[#allocation2 + $0x99] sm:$0xff] %v2326_v41  ;;  %2359 = vst [vmem:[#allocation2 + $0xa9] sm:$0xff] %v2327_v58  ;;  %v7822_v56 = vpack.c.bf16 %v2427_v44, %v2426_v19  ;;  %v2428_v57 = vld [vmem:[#allocation2 + $0x28] sm:$0x3]  ;;  %v2530_v37 = vrot.slane %v2426_v19, 1  ;;  %v2531_v39 = vrot.slane %v2427_v44, 1  ;;  %v7844_v13 = vpack.c.bf16 %v2412_v45, %v2411_v32 }
 0x2d6   : > { %2360 = vst [vmem:[#allocation2 + $0xb1] sm:$0xff] %v2328_v25  ;;  %2361 = vst [vmem:[#allocation2 + $0xc1] sm:$0xff] %v2329_v54  ;;  %v2525_v16 = vrot.slane %v2411_v32, 1  ;;  %v2526_v50 = vrot.slane %v2412_v45, 1  ;;  %v2637_v15 = vrot.slane %v2411_v32, 2  ;;  %v7828_v5 = vrot.slane %v2412_v45, 2 }
 0x2d7   : > { %2385 = vst [vmem:[#allocation2 + $0xa7] sm:$0x2] %v2327_v58  ;;  %2386 = vst [vmem:[#allocation2 + $0xbf] sm:$0x2] %v2329_v54  ;;  %v2413_v36 = vld [vmem:[#allocation2 + $0x40] sm:$0x3]  ;;  %3613 = vmatprep.mubr.bf16.mxu0 %v7822_v56  ;;  %v2532_v40 = vsel %vm438_vm0, %v2530_v37, %v2531_v39 }
 0x2d8   : > { %2400 = vst [vmem:[#allocation2 + $0x9b] sm:$0x40] %v2326_v41  ;;  %2401 = vst [vmem:[#allocation2 + $0xb3] sm:$0x40] %v2328_v25  ;;  %v2533_v26 = vrot.slane %v2428_v57, 1  ;;  %v2527_v31 = vsel %vm438_vm0, %v2525_v16, %v2526_v50  ;;  %v7835_v38 = vsel %vm551_vm1, %v2637_v15, %v7828_v5  ;;  %v5885_v29 = vld [vmem:[%s8933_s3 + $0x100] sm:$0xff]  }
 0x2d9   : > { %2362 = vst [vmem:[#allocation2 + $0xc9] sm:$0xff] %v2330_v60  ;;  %2363 = vst [vmem:[#allocation2 + $0xd9] sm:$0xff] %v2331_v51  ;;  %v2431_v8 = vld [vmem:[#allocation2 + $0x40] sm:$0x3]  ;;  %v2642_v21 = vrot.slane %v2426_v19, 2  ;;  %v2643_v22 = vrot.slane %v2427_v44, 2 }
 0x2da   : > { %2364 = vst [vmem:[#allocation2 + $0xe1] sm:$0xff] %v2332_v24  ;;  %2365 = vst [vmem:[#allocation2 + $0xf1] sm:$0xff] %v2333_v18  ;;  %v2534_v4 = vsel %vm438_vm0, %v2531_v39, %v2533_v26  ;;  %v2645_v20 = vrot.slane %v2428_v57, 2  ;;  %v5886_v10 = vld [vmem:[%s8933_s3 + $0x148] sm:$0xff]   ;;  %v5895_v59 = vld [vmem:[%s8933_s3 + $0x180] sm:$0xff]   ;;  %v2538_v46 = vrot.slane %v2431_v8, 1 }
 0x2db   : > { %2387 = vst [vmem:[#allocation2 + $0xd7] sm:$0x2] %v2331_v51  ;;  %2388 = vst [vmem:[#allocation2 + $0xef] sm:$0x2] %v2333_v18  ;;  %v7852_v48 = vpack.c.bf16 %v2534_v4, %v2532_v40  ;;  %v5897_v11 = vld [vmem:[%s8933_s3 + $0x1c8] sm:$0xff]   ;;  %v2644_v3 = vsel %vm551_vm1, %v2642_v21, %v2643_v22  ;;  %v5888_v41 = vld [vmem:[%s8933_s3 + $0x150] sm:$0xff]  }
 0x2dc   : > { %2402 = vst [vmem:[#allocation2 + $0xcb] sm:$0x40] %v2330_v60  ;;  %2403 = vst [vmem:[#allocation2 + $0xe3] sm:$0x40] %v2332_v24  ;;  %v5887_v33 = vld [vmem:[%s8933_s3 + $0x108] sm:$0xff]   ;;  %v2646_v9 = vsel %vm551_vm1, %v2643_v22, %v2645_v20  ;;  %v7876_v54 = vld [vmem:[#allocation2 + $0x50] sm:$0xff]  ;;  %v2539_v51 = vsel %vm438_vm0, %v2526_v50, %v2538_v46 }
 0x2dd   : > { %2422 = vst [vmem:[#allocation2 + $0x1a8] sm:$0x3] %v2419_v0  ;;  %2366 = vst [vmem:[#allocation2 + $0xf9] sm:$0xff] %v2334_v12  ;;  %v5899_v58 = vld [vmem:[%s8933_s3 + $0x188] sm:$0xff]   ;;  %v5901_v60 = vld [vmem:[%s8933_s3 + $0x1d0] sm:$0xff]   ;;  %v7882_v24 = vpack.c.bf16 %v2646_v9, %v2644_v3 }
 0x2de   : > { %2367 = vst [vmem:[#allocation2 + $0x109] sm:$0xff] %v2335_v28  ;;  %2368 = vst [vmem:[#allocation2 + $0x111] sm:$0xff] %v2336_v42  ;;  %v7874_v25 = vld [vmem:[#allocation2 + $0x48] sm:$0xff]  ;;  %v2434_v18 = vld [vmem:[#allocation2 + $0x58] sm:$0x3] }
 0x2df   : > { %2369 = vst [vmem:[#allocation2 + $0x121] sm:$0xff] %v2337_v14  ;;  %2389 = vst [vmem:[#allocation2 + $0x107] sm:$0x2] %v2335_v28  ;;  %v7889_v28 = vpack.c.bf16 %v7876_v54, %v7874_v25  ;;  %v5903_v0 = vld [vmem:[%s8933_s3 + $0x190] sm:$0xff]   ;;  %v5905_v32 = vld [vmem:[%s8933_s3 + $0x198] sm:$0xff]   ;;  %v2652_v16 = vrot.slane %v7874_v25, 2 }
 0x2e0   : > { %2390 = vst [vmem:[#allocation2 + $0x11f] sm:$0x2] %v2337_v14  ;;  %2404 = vst [vmem:[#allocation2 + $0xfb] sm:$0x40] %v2334_v12  ;;  %v5889_v12 = vld [vmem:[%s8933_s3 + $0x110] sm:$0xff]   ;;  %v5890_v14 = vld [vmem:[%s8933_s3 + $0x158] sm:$0xff]  }
 0x2e1   : > { %2405 = vst [vmem:[#allocation2 + $0x113] sm:$0x40] %v2336_v42  ;;  %2370 = vst [vmem:[#allocation2 + $0x129] sm:$0xff] %v2338_v6  ;;  %v2650_v42 = vrot.slane %v2431_v8, 2  ;;  %v7919_v19 = vld [vmem:[#allocation2 + $0x60] sm:$0xff]  ;;  %v7921_v44 = vld [vmem:[#allocation2 + $0x68] sm:$0xff] }
 0x2e2   : > { %2371 = vst [vmem:[#allocation2 + $0x139] sm:$0xff] %v2339_v53  ;;  %2372 = vst [vmem:[#allocation2 + $0x141] sm:$0xff] %v2340_v17  ;;  %v5906_v45 = vld [vmem:[%s8933_s3 + $0x1e0] sm:$0xff]   ;;  %v7931_v37 = vld [vmem:[#allocation2 + $0x70] sm:$0x3]  ;;  %v7940_v15 = vpack.c.bf16 %v7921_v44, %v7919_v19  ;;  %v2546_v40 = vrot.slane %v7921_v44, 1 }
 0x2e3   : > { %2373 = vst [vmem:[#allocation2 + $0x151] sm:$0xff] %v2341_v55  ;;  %2391 = vst [vmem:[#allocation2 + $0x137] sm:$0x2] %v2339_v53  ;;  %v5904_v53 = vld [vmem:[%s8933_s3 + $0x1d8] sm:$0xff]   ;;  %v5894_v39 = vld [vmem:[%s8933_s3 + $0x120] sm:$0xff]   ;;  %v2657_v46 = vrot.slane %v7919_v19, 2 }
 0x2e4   : > { %2392 = vst [vmem:[#allocation2 + $0x14f] sm:$0x2] %v2341_v55  ;;  %2406 = vst [vmem:[#allocation2 + $0x12b] sm:$0x40] %v2338_v6  ;;  %v7898_v6 = vpack.c.bf16 %v2539_v51, %v2527_v31  ;;  %v2541_v55 = vrot.slane %v7876_v54, 1  ;;  %v5896_v26 = vld [vmem:[%s8933_s3 + $0x168] sm:$0xff]  }
 0x2e5   : > { %2407 = vst [vmem:[#allocation2 + $0x143] sm:$0x40] %v2340_v17  ;;  %2374 = vst [vmem:[#allocation2 + $0x159] sm:$0xff] %v2342_v30  ;;  %v2540_v17 = vrot.slane %v7874_v25, 1  ;;  %v7973_v8 = vld [vmem:[#allocation2 + $0x80] sm:$0xff]  ;;  %v5912_v21 = vld [vmem:[%s8933_s3 + $0x1f0] sm:$0xff]  }
 0x2e6   : > { %2375 = vst [vmem:[#allocation2 + $0x169] sm:$0xff] %v2343_v34  ;;  %2377 = vst [vmem:[#allocation2 + $0x181] sm:$0xff] %v2345_v47  ;;  %v2660_v9 = vrot.slane %v7931_v37, 2  ;;  %v5913_v25 = vld [vmem:[%s8933_s3 + $0x1b0] sm:$0xff]  }
 0x2e7   : > { %2378 = vst [vmem:[#allocation2 + $0x189] sm:$0xff] %v2346_v1  ;;  %2393 = vst [vmem:[#allocation2 + $0x167] sm:$0x2] %v2343_v34  ;;  %v5891_v34 = vld [vmem:[%s8933_s3 + $0x118] sm:$0xff]  }
 0x2e8   : > { %2394 = vst [vmem:[#allocation2 + $0x17f] sm:$0x2] %v2345_v47  ;;  %2408 = vst [vmem:[#allocation2 + $0x15b] sm:$0x40] %v2342_v30  ;;  %v2543_v30 = vrot.slane %v2434_v18, 1  ;;  %v2651_v47 = vsel %vm551_vm1, %v7828_v5, %v2650_v42  ;;  %v5909_v42 = vld [vmem:[%s8933_s3 + $0x138] sm:$0xff]  }
 0x2e9   : > { %2410 = vst [vmem:[#allocation2 + $0x18b] sm:$0x40] %v2346_v1  ;;  %2416 = vst [vmem:[#allocation2 + $0x10] sm:$0x3] %v2413_v36  ;;  %v5892_v1 = vld [vmem:[%s8933_s3 + $0x160] sm:$0xff]   ;;  %v7929_v57 = vpack.c.bf16 %v2651_v47, %v7835_v38 }
 0x2ea   : > { %v2544_v36 = vsel %vm438_vm0, %v2541_v55, %v2543_v30  ;;  %v8024_v30 = vld [vmem:[#allocation2 + $0x90] sm:$0xff] }
 0x2ed   : > { %v7857_v63 = vld [vmem:[#allocation2 + $0x170] sm:$0xff] }
 0x2ee   : > { %v7825_v61 = vld [vmem:[#allocation2 + $0x168] sm:$0xff]  ;;  %2421 = vst [vmem:[#allocation2 + $0x1a0] sm:$0xff] %v7857_v63 }
 0x2ef   : > { %2420 = vst [vmem:[#allocation2 + $0x198] sm:$0xff] %v7825_v61 }
 0x2f0   : > { %v2425_v23 = vld [vmem:[#allocation2 + $0x10] sm:$0x3] }
 0x2f1   : > { %v2528_v49 = vrot.slane %v2425_v23, 1  ;;  %v2640_v52 = vrot.slane %v2425_v23, 2  ;;  %v5908_v23 = vld [vmem:[%s8933_s3 + $0x1a0] sm:$0xff]  }
 0x2f3   : > { %v2529_v7 = vsel %vm438_vm0, %v2526_v50, %v2528_v49  ;;  %v2641_v2 = vsel %vm551_vm1, %v7828_v5, %v2640_v52  ;;  %v2653_v50 = vrot.slane %v7876_v54, 2  ;;  %v2655_v5 = vrot.slane %v2434_v18, 2  ;;  %v5910_v52 = vld [vmem:[%s8933_s3 + $0x1e8] sm:$0xff]   ;;  %v2470_v18 = vld [vmem:[#allocation2 + $0x178] sm:$0x3] }
 0x2f4   : > { %v2784_v43 = vpack.c.bf16 %v2529_v7, %v2527_v31  ;;  %v2785_v27 = vpack.c.bf16 %v2641_v2, %v7835_v38  ;;  %v2545_v31 = vrot.slane %v7919_v19, 1  ;;  %v2548_v7 = vrot.slane %v7931_v37, 1  ;;  %v5898_v38 = vld [vmem:[%s8933_s3 + $0x128] sm:$0xff]   ;;  %v8040_v37 = vld [vmem:[#allocation2 + $0xa0] sm:$0x3] }
 0x2f5   : > { %v2654_v2 = vsel %vm551_vm1, %v2652_v16, %v2653_v50  ;;  %v2656_v4 = vsel %vm551_vm1, %v2653_v50, %v2655_v5  ;;  %v2603_v47 = vrot.slane %v2470_v18, 1  ;;  %v2600_v19 = vrot.slane %v7825_v61, 1 }
 0x2f6   : > { %3452 = vmatprep.mubr.bf16.mxu1 %v2784_v43  ;;  %3614 = vmatmul.mubr.bf16.vlgmr.msra.gmra.mrb[160].mxu0 %v2785_v27  ;;  %v5900_v43 = vld [vmem:[%s8933_s3 + $0x170] sm:$0xff]   ;;  %v5911_v27 = vld [vmem:[%s8933_s3 + $0x1a8] sm:$0xff]   ;;  %v2547_v22 = vsel %vm438_vm0, %v2545_v31, %v2546_v40  ;;  %v2549_v20 = vsel %vm438_vm0, %v2546_v40, %v2548_v7  ;;  %v2713_v16 = vrot.slane %v7857_v63, 2  ;;  %v8046_v50 = vpack.c.bf16 %v7857_v63, %v7825_v61  ;;  %v5915_v31 = vld [vmem:[%s8933_s3 + $0x1b8] sm:$0xff]  }
 0x2f7   : > { %3453 = vmatmul.mubr.bf16.vlgmr.msra.gmra.mrb[128].mxu1 %v7844_v13  ;;  %3621 = vmatprep.mubr.bf16.mxu0 %v7844_v13  ;;  %v2555_v5 = vrot.slane %v8024_v30, 1 }
 0x2f8   : > { %3460 = vmatprep.mubr.bf16.mxu1 %v7852_v48  ;;  %5396 = vmatpush3.bf16.msra.mxu1 %v5885_v29  ;;  %v7971_v29 = vld [vmem:[#allocation2 + $0x78] sm:$0xff] }
 0x2f9   : > { %5397 = vmatprep.subr.bf16.mxu1 %v5886_v10  ;;  %5508 = vmatpush3.bf16.msra.mxu0 %v5895_v59  ;;  %v7980_v10 = vpack.c.bf16 %v2656_v4, %v2654_v2  ;;  %v7982_v59 = vld [vmem:[#allocation2 + $0x88] sm:$0x3]  ;;  %v7991_v3 = vpack.c.bf16 %v7973_v8, %v7971_v29  ;;  %v2550_v54 = vrot.slane %v7971_v29, 1 }
 0x2fa   : > { %5509 = vmatprep.subr.bf16.mxu0 %v5897_v11  ;;  %v5902_v11 = vld [vmem:[%s8933_s3 + $0x130] sm:$0xff]   ;;  %v2553_v51 = vrot.slane %v7982_v59, 1 }
 0x2fc   : > { %5398 = vmatpush3.bf16.msra.mxu1 %v5887_v33  ;;  %v2658_v33 = vrot.slane %v7921_v44, 2  ;;  %v8032_v44 = vrot.slane %v7857_v63, 1 }
 0x2fd   : > { %5399 = vmatprep.subr.bf16.mxu1 %v5888_v41  ;;  %5510 = vmatpush3.bf16.msra.mxu0 %v5899_v58  ;;  %v5907_v41 = vld [vmem:[%s8933_s3 + $0x178] sm:$0xff]   ;;  %v7998_v58 = vpack.c.bf16 %v2549_v20, %v2547_v22 }
 0x2fe   : > { %3622 = vmatmul.mubr.bf16.gmra.mrb[164].mxu0 %v7882_v24  ;;  %5511 = vmatprep.subr.bf16.mxu0 %v5901_v60  ;;  %v2551_v60 = vrot.slane %v7973_v8, 1  ;;  %9073 = vst [vmem:[#allocation38_spill] sm:$0xff] %v8032_v44  ;;  %v8077_v20 = vld [vmem:[#allocation2 + $0x198] sm:$0xff] }
 0x2ff   : > { %3461 = vmatmul.mubr.bf16.gmra.mrb[132].mxu1 %v7822_v56  ;;  %3629 = vmatprep.mubr.bf16.mxu0 %v7889_v28  ;;  %v2542_v56 = vsel %vm438_vm0, %v2540_v17, %v2541_v55  ;;  %v2662_v17 = vrot.slane %v7971_v29, 2  ;;  %v2663_v55 = vrot.slane %v7973_v8, 2  ;;  %v2667_v29 = vrot.slane %v8024_v30, 2 }
 0x300   : > { %3468 = vmatprep.mubr.bf16.mxu1 %v7898_v6  ;;  %5400 = vmatpush3.bf16.msra.mxu1 %v5889_v12  ;;  %v7949_v49 = vpack.c.bf16 %v2544_v36, %v2542_v56  ;;  %v5914_v12 = vld [vmem:[%s8933_s3 + $0x1f8] sm:$0xff]   ;;  %v8036_v56 = vld [vmem:[#allocation2 + $0x188] sm:$0xff] }
 0x301   : > { %5401 = vmatprep.subr.bf16.mxu1 %v5890_v14  ;;  %5512 = vmatpush3.bf16.msra.mxu0 %v5903_v0  ;;  %v2659_v14 = vsel %vm551_vm1, %v2657_v46, %v2658_v33  ;;  %v2661_v0 = vsel %vm551_vm1, %v2658_v33, %v2660_v9  ;;  %v2753_v7 = vrot.slane %v8036_v56, 1  ;;  %v2760_v4 = vrot.slane %v8036_v56, 2  ;;  %v2444_v46 = vld [vmem:[#allocation2 + $0xa8] sm:$0xff]  ;;  %v2445_v33 = vld [vmem:[#allocation2 + $0xb0] sm:$0xff] }
 0x302   : > { %5513 = vmatprep.subr.bf16.mxu0 %v5904_v53  ;;  %v8020_v53 = vld [vmem:[%s8933_s3 + $0x200] sm:$0xff]   ;;  %v8038_v36 = vpack.c.bf16 %v2661_v0, %v2659_v14  ;;  %v2664_v8 = vsel %vm551_vm1, %v2662_v17, %v2663_v55 }
 0x304   : > { %5402 = vmatpush3.bf16.msra.mxu1 %v5891_v34  ;;  %v8026_v34 = vld [vmem:[#allocation2 + $0x98] sm:$0xff] }
 0x305   : > { %5403 = vmatprep.subr.bf16.mxu1 %v5892_v1  ;;  %5514 = vmatpush3.bf16.msra.mxu0 %v5905_v32  ;;  %v2552_v1 = vsel %vm438_vm0, %v2550_v54, %v2551_v60  ;;  %v2554_v32 = vsel %vm438_vm0, %v2551_v60, %v2553_v51  ;;  %v2668_v54 = vrot.slane %v8026_v34, 2 }
 0x306   : > { %3630 = vmatmul.mubr.bf16.gmra.mrb[168].mxu0 %v7929_v57  ;;  %5515 = vmatprep.subr.bf16.mxu0 %v5906_v45  ;;  %v8034_v45 = vld [vmem:[#allocation2 + $0x180] sm:$0xff]  ;;  %v8060_v63 = vpack.c.bf16 %v2554_v32, %v2552_v1  ;;  %v2670_v1 = vrot.slane %v8040_v37, 2 }
 0x307   : > { %3469 = vmatmul.mubr.bf16.gmra.mrb[136].mxu1 %v7844_v13  ;;  %3637 = vmatprep.mubr.bf16.mxu0 %v7940_v15  ;;  %v2752_v40 = vrot.slane %v8034_v45, 1  ;;  %v2759_v2 = vrot.slane %v8034_v45, 2 }
 0x308   : > { %3476 = vmatprep.mubr.bf16.mxu1 %v7949_v49  ;;  %5404 = vmatpush3.bf16.msra.mxu1 %v5894_v39  ;;  %v2712_v39 = vrot.slane %v7825_v61, 2  ;;  %v2556_v61 = vrot.slane %v8026_v34, 1 }
 0x309   : > { %5405 = vmatprep.subr.bf16.mxu1 %v5896_v26  ;;  %5516 = vmatpush3.bf16.msra.mxu0 %v5908_v23  ;;  %v8051_v26 = vpack.c.bf16 %v8026_v34, %v8024_v30  ;;  %v2665_v23 = vrot.slane %v7982_v59, 2  ;;  %v8079_v59 = vld [vmem:[#allocation2 + $0x1a8] sm:$0x3]  ;;  %v2761_v0 = vsel %vm551_vm1, %v2759_v2, %v2760_v4  ;;  %v2446_v30 = vld [vmem:[#allocation2 + $0xb8] sm:$0x3] }
 0x30a   : > { %5517 = vmatprep.subr.bf16.mxu0 %v5910_v52  ;;  %v2715_v52 = vrot.slane %v2470_v18, 2  ;;  %v2714_v22 = vsel %vm551_vm1, %v2712_v39, %v2713_v16  ;;  %9074 = vst [vmem:[#allocation39_spill] sm:$0xff] %v8079_v59  ;;  %v2557_v60 = vsel %vm438_vm0, %v2555_v5, %v2556_v61  ;;  %v2779_v14 = vrot.slane %v8079_v59, 2  ;;  %v2448_v2 = vld [vmem:[#allocation2 + $0xc8] sm:$0xff] }
 0x30c   : > { %5406 = vmatpush3.bf16.msra.mxu1 %v5898_v38  ;;  %v2558_v38 = vrot.slane %v8040_v37, 1  ;;  %v8106_v39 = vsel %vm551_vm1, %v2713_v16, %v2779_v14  ;;  %v2560_v37 = vrot.slane %v2444_v46, 1 }
 0x30d   : > { %5407 = vmatprep.subr.bf16.mxu1 %v5900_v43  ;;  %5518 = vmatpush3.bf16.msra.mxu0 %v5911_v27  ;;  %v2602_v43 = vsel %vm438_vm0, %v2600_v19, %v8032_v44  ;;  %v2473_v27 = vld [vmem:[#allocation2 + $0x190] sm:$0x3]  ;;  %9077 = vst [vmem:[#allocation42_spill] sm:$0xff] %v8106_v39 }
 0x30e   : > { %3638 = vmatmul.mubr.bf16.gmra.mrb[172].mxu0 %v7980_v10  ;;  %5519 = vmatprep.subr.bf16.mxu0 %v5912_v21  ;;  %v2604_v21 = vsel %vm438_vm0, %v8032_v44, %v2603_v47  ;;  %v2755_v18 = vrot.slane %v2473_v27, 1  ;;  %v2762_v47 = vrot.slane %v2473_v27, 2 }
 0x30f   : > { %3477 = vmatmul.mubr.bf16.gmra.mrb[140].mxu1 %v7889_v28  ;;  %3645 = vmatprep.mubr.bf16.mxu0 %v7991_v3  ;;  %v8082_v9 = vpack.c.bf16 %v2604_v21, %v2602_v43  ;;  %v2672_v21 = vrot.slane %v2444_v46, 2 }
 0x310   : > { %3484 = vmatprep.mubr.bf16.mxu1 %v7998_v58  ;;  %5408 = vmatpush3.bf16.msra.mxu1 %v5902_v11  ;;  %v2666_v11 = vsel %vm551_vm1, %v2663_v55, %v2665_v23  ;;  %v8096_v55 = vpack.c.bf16 %v2445_v33, %v2444_v46  ;;  %v2756_v34 = vsel %vm438_vm0, %v2753_v7, %v2755_v18 }
 0x311   : > { %5409 = vmatprep.subr.bf16.mxu1 %v5907_v41  ;;  %5520 = vmatpush3.bf16.msra.mxu0 %v5913_v25  ;;  %v2716_v41 = vsel %vm551_vm1, %v2713_v16, %v2715_v52  ;;  %v2754_v25 = vsel %vm438_vm0, %v2752_v40, %v2753_v7  ;;  %v8094_v17 = vpack.c.bf16 %v2666_v11, %v2664_v8  ;;  %v2449_v8 = vld [vmem:[#allocation2 + $0xd0] sm:$0x3] }
 0x312   : > { %5521 = vmatprep.subr.bf16.mxu0 %v5914_v12  ;;  %v8088_v51 = vpack.c.bf16 %v2716_v41, %v2714_v22  ;;  %v2559_v12 = vsel %vm438_vm0, %v2556_v61, %v2558_v38  ;;  %v8100_v32 = vpack.c.bf16 %v2756_v34, %v2754_v25  ;;  %v2763_v52 = vsel %vm551_vm1, %v2760_v4, %v2762_v47  ;;  %v2447_v38 = vld [vmem:[#allocation2 + $0xc0] sm:$0xff] }
 0x313   : > { %v8109_v5 = vpack.c.bf16 %v2559_v12, %v2557_v60  ;;  %v2563_v61 = vrot.slane %v2446_v30, 1  ;;  %v8116_v40 = vpack.c.bf16 %v2763_v52, %v2761_v0  ;;  %v2671_v7 = vsel %vm551_vm1, %v2668_v54, %v2670_v1  ;;  %v2451_v12 = vld [vmem:[#allocation2 + $0xe0] sm:$0xff] }
 0x314   : > { %5410 = vmatpush3.bf16.msra.mxu1 %v5909_v42  ;;  %v2776_v42 = vrot.slane %v8077_v20, 2  ;;  %9075 = vst [vmem:[#allocation40_spill] sm:$0xff] %v8100_v32  ;;  %v2673_v22 = vrot.slane %v2445_v33, 2  ;;  %v8125_v11 = vpack.c.bf16 %v2448_v2, %v2447_v38  ;;  %v2675_v41 = vrot.slane %v2446_v30, 2  ;;  %v2452_v30 = vld [vmem:[#allocation2 + $0xe8] sm:$0x3] }
 0x315   : > { %5691 = vmatprep.subr.bf16.mxu1 %v8020_v53  ;;  %5522 = vmatpush3.bf16.msra.mxu0 %v5915_v31  ;;  %v2561_v31 = vrot.slane %v2445_v33, 1  ;;  %9078 = vst [vmem:[#allocation43_spill] sm:$0xff] %v8116_v40  ;;  %v2568_v60 = vrot.slane %v2449_v8, 1  ;;  %v2450_v33 = vld [vmem:[#allocation2 + $0xd8] sm:$0xff]  ;;  %v2677_v34 = vrot.slane %v2447_v38, 2  ;;  %v2678_v47 = vrot.slane %v2448_v2, 2 }
 0x316   : > { %3646 = vmatmul.mubr.bf16.gmra.mrb[176].mxu0 %v8038_v36  ;;  %v8103_v19 = vsel %vm551_vm1, %v2776_v42, %v2713_v16  ;;  %v2669_v16 = vsel %vm551_vm1, %v2667_v29, %v2668_v54  ;;  %v2565_v29 = vrot.slane %v2447_v38, 1  ;;  %v2566_v54 = vrot.slane %v2448_v2, 1  ;;  %v2453_v2 = vld [vmem:[#allocation2 + $0xf0] sm:$0xff] }
 0x317   : > { %3485 = vmatmul.mubr.bf16.gmra.mrb[144].mxu1 %v7940_v15  ;;  %3653 = vmatprep.mubr.bf16.mxu0 %v8051_v26  ;;  %9076 = vst [vmem:[#allocation41_spill] sm:$0xff] %v8103_v19  ;;  %v2562_v43 = vsel %vm438_vm0, %v2560_v37, %v2561_v31  ;;  %v2564_v4 = vsel %vm438_vm0, %v2561_v31, %v2563_v61  ;;  %v2680_v52 = vrot.slane %v2449_v8, 2  ;;  %v2570_v31 = vrot.slane %v2450_v33, 1 }
 0x318   : > { %3492 = vmatprep.mubr.bf16.mxu1 %v8060_v63  ;;  %v8123_v27 = vpack.c.bf16 %v2671_v7, %v2669_v16  ;;  %v8128_v25 = vpack.c.bf16 %v2564_v4, %v2562_v43  ;;  %v2674_v18 = vsel %vm551_vm1, %v2672_v21, %v2673_v22  ;;  %v2676_v46 = vsel %vm551_vm1, %v2673_v22, %v2675_v41  ;;  %v2454_v43 = vld [vmem:[#allocation2 + $0xf8] sm:$0xff]  ;;  %v2455_v22 = vld [vmem:[#allocation2 + $0x100] sm:$0x3] }
 0x319   : > { %v2567_v42 = vsel %vm438_vm0, %v2565_v29, %v2566_v54  ;;  %v2569_v14 = vsel %vm438_vm0, %v2566_v54, %v2568_v60  ;;  %v8137_v0 = vpack.c.bf16 %v2676_v46, %v2674_v18  ;;  %v8139_v1 = vpack.c.bf16 %v2451_v12, %v2450_v33 }
 0x31a   : > { %v8142_v37 = vpack.c.bf16 %v2569_v14, %v2567_v42  ;;  %v2571_v61 = vrot.slane %v2451_v12, 1  ;;  %v2573_v16 = vrot.slane %v2452_v30, 1  ;;  %v2679_v7 = vsel %vm551_vm1, %v2677_v34, %v2678_v47 }
 0x31b   : > { %v2681_v38 = vsel %vm551_vm1, %v2678_v47, %v2680_v52  ;;  %v2682_v41 = vrot.slane %v2450_v33, 2  ;;  %v2683_v29 = vrot.slane %v2451_v12, 2  ;;  %v8153_v54 = vpack.c.bf16 %v2454_v43, %v2453_v2  ;;  %v2456_v12 = vld [vmem:[#allocation2 + $0x108] sm:$0xff]  ;;  %v2457_v47 = vld [vmem:[#allocation2 + $0x110] sm:$0xff] }
 0x31c   : > { %v2572_v4 = vsel %vm438_vm0, %v2570_v31, %v2571_v61  ;;  %v2574_v8 = vsel %vm438_vm0, %v2571_v61, %v2573_v16  ;;  %v8151_v21 = vpack.c.bf16 %v2681_v38, %v2679_v7  ;;  %v2685_v60 = vrot.slane %v2452_v30, 2  ;;  %v2458_v61 = vld [vmem:[#allocation2 + $0x118] sm:$0x3] }
 0x31d   : > { %v8156_v18 = vpack.c.bf16 %v2574_v8, %v2572_v4  ;;  %v2575_v46 = vrot.slane %v2453_v2, 1  ;;  %v2576_v42 = vrot.slane %v2454_v43, 1  ;;  %v2578_v14 = vrot.slane %v2455_v22, 1 }
 0x31e   : > { %3654 = vmatmul.mubr.bf16.gmra.mrb[180].mxu0 %v8094_v17  ;;  %v2684_v34 = vsel %vm551_vm1, %v2682_v41, %v2683_v29  ;;  %v2686_v33 = vsel %vm551_vm1, %v2683_v29, %v2685_v60  ;;  %v2687_v16 = vrot.slane %v2453_v2, 2  ;;  %v2688_v7 = vrot.slane %v2454_v43, 2  ;;  %v2459_v43 = vld [vmem:[#allocation2 + $0x120] sm:$0xff] }
 0x31f   : > { %3493 = vmatmul.mubr.bf16.gmra.mrb[148].mxu1 %v7991_v3  ;;  %3661 = vmatprep.mubr.bf16.mxu0 %v8096_v55  ;;  %v2577_v30 = vsel %vm438_vm0, %v2575_v46, %v2576_v42  ;;  %v2579_v52 = vsel %vm438_vm0, %v2576_v42, %v2578_v14  ;;  %v8165_v31 = vpack.c.bf16 %v2686_v33, %v2684_v34  ;;  %v2690_v4 = vrot.slane %v2455_v22, 2  ;;  %v2460_v42 = vld [vmem:[#allocation2 + $0x128] sm:$0xff]  ;;  %v2461_v33 = vld [vmem:[#allocation2 + $0x130] sm:$0x3] }
 0x320   : > { %3500 = vmatprep.mubr.bf16.mxu1 %v8109_v5  ;;  %v8167_v38 = vpack.c.bf16 %v2457_v47, %v2456_v12  ;;  %v8170_v8 = vpack.c.bf16 %v2579_v52, %v2577_v30  ;;  %v2580_v41 = vrot.slane %v2456_v12, 1  ;;  %v2581_v29 = vrot.slane %v2457_v47, 1 }
 0x321   : > { %v2583_v60 = vrot.slane %v2458_v61, 1  ;;  %v2689_v46 = vsel %vm551_vm1, %v2687_v16, %v2688_v7  ;;  %v2691_v2 = vsel %vm551_vm1, %v2688_v7, %v2690_v4  ;;  %v2692_v30 = vrot.slane %v2456_v12, 2 }
 0x322   : > { %v2582_v22 = vsel %vm438_vm0, %v2580_v41, %v2581_v29  ;;  %v8179_v34 = vpack.c.bf16 %v2691_v2, %v2689_v46  ;;  %v2693_v52 = vrot.slane %v2457_v47, 2  ;;  %v8181_v23 = vpack.c.bf16 %v2460_v42, %v2459_v43  ;;  %v2462_v47 = vld [vmem:[#allocation2 + $0x138] sm:$0xff]  ;;  %v2464_v2 = vld [vmem:[#allocation2 + $0x148] sm:$0x3] }
 0x323   : > { %v2584_v14 = vsel %vm438_vm0, %v2581_v29, %v2583_v60  ;;  %v2695_v35 = vrot.slane %v2458_v61, 2  ;;  %v2585_v16 = vrot.slane %v2459_v43, 1  ;;  %v2586_v7 = vrot.slane %v2460_v42, 1  ;;  %v2463_v29 = vld [vmem:[#allocation2 + $0x140] sm:$0xff] }
 0x324   : > { %v8184_v62 = vpack.c.bf16 %v2584_v14, %v2582_v22  ;;  %v2588_v4 = vrot.slane %v2461_v33, 1  ;;  %v2694_v41 = vsel %vm551_vm1, %v2692_v30, %v2693_v52  ;;  %v2697_v22 = vrot.slane %v2459_v43, 2 }
 0x325   : > { %v2696_v12 = vsel %vm551_vm1, %v2693_v52, %v2695_v35  ;;  %v2587_v61 = vsel %vm438_vm0, %v2585_v16, %v2586_v7  ;;  %v2698_v14 = vrot.slane %v2460_v42, 2  ;;  %v8195_v19 = vpack.c.bf16 %v2463_v29, %v2462_v47  ;;  %v2465_v42 = vld [vmem:[#allocation2 + $0x150] sm:$0xff] }
 0x326   : > { %3662 = vmatmul.mubr.bf16.gmra.mrb[184].mxu0 %v8123_v27  ;;  %v2589_v60 = vsel %vm438_vm0, %v2586_v7, %v2588_v4  ;;  %v8193_v46 = vpack.c.bf16 %v2696_v12, %v2694_v41  ;;  %v2700_v39 = vrot.slane %v2461_v33, 2  ;;  %v2590_v35 = vrot.slane %v2462_v47, 1  ;;  %v2466_v7 = vld [vmem:[#allocation2 + $0x158] sm:$0xff]  ;;  %v2467_v12 = vld [vmem:[#allocation2 + $0x160] sm:$0x3] }
 0x327   : > { %3501 = vmatmul.mubr.bf16.gmra.mrb[152].mxu1 %v8051_v26  ;;  %3669 = vmatprep.mubr.bf16.mxu0 %v8125_v11  ;;  %v8198_v40 = vpack.c.bf16 %v2589_v60, %v2587_v61  ;;  %v2591_v30 = vrot.slane %v2463_v29, 1  ;;  %v2593_v52 = vrot.slane %v2464_v2, 1  ;;  %v2699_v16 = vsel %vm551_vm1, %v2697_v22, %v2698_v14 }
 0x328   : > { %3508 = vmatprep.mubr.bf16.mxu1 %v8128_v25  ;;  %v2701_v43 = vsel %vm551_vm1, %v2698_v14, %v2700_v39  ;;  %v2702_v61 = vrot.slane %v2462_v47, 2  ;;  %v2703_v60 = vrot.slane %v2463_v29, 2  ;;  %v8209_v44 = vpack.c.bf16 %v2466_v7, %v2465_v42 }
 0x329   : > { %v2592_v33 = vsel %vm438_vm0, %v2590_v35, %v2591_v30  ;;  %v2594_v4 = vsel %vm438_vm0, %v2591_v30, %v2593_v52  ;;  %v8207_v41 = vpack.c.bf16 %v2701_v43, %v2699_v16  ;;  %v2705_v32 = vrot.slane %v2464_v2, 2 }
 0x32a   : > { %v8212_v59 = vpack.c.bf16 %v2594_v4, %v2592_v33  ;;  %v2595_v39 = vrot.slane %v2465_v42, 1  ;;  %v2596_v22 = vrot.slane %v2466_v7, 1  ;;  %v2598_v14 = vrot.slane %v2467_v12, 1 }
 0x32b   : > { %v2704_v35 = vsel %vm551_vm1, %v2702_v61, %v2703_v60  ;;  %v2706_v47 = vsel %vm551_vm1, %v2703_v60, %v2705_v32  ;;  %v2707_v52 = vrot.slane %v2465_v42, 2  ;;  %v2708_v16 = vrot.slane %v2466_v7, 2 }
 0x32c   : > { %v2597_v29 = vsel %vm438_vm0, %v2595_v39, %v2596_v22  ;;  %v2599_v2 = vsel %vm438_vm0, %v2596_v22, %v2598_v14  ;;  %v8221_v30 = vpack.c.bf16 %v2706_v47, %v2704_v35  ;;  %v2710_v43 = vrot.slane %v2467_v12, 2 }
 0x32d   : > { %v8224_v33 = vpack.c.bf16 %v2599_v2, %v2597_v29  ;;  %v2709_v32 = vsel %vm551_vm1, %v2707_v52, %v2708_v16  ;;  %v8235_v42 = vpack.c.bf16 %v8036_v56, %v8034_v45  ;;  %v5917_v45 = vld [vmem:[%s8933_s3 + $0x208] sm:$0xff]   ;;  %v5918_v56 = vld [vmem:[%s8933_s3 + $0x210] sm:$0xff]  }
 0x32e   : > { %3670 = vmatmul.mubr.bf16.gmra.mrb[188].mxu0 %v8137_v0  ;;  %v2711_v4 = vsel %vm551_vm1, %v2708_v16, %v2710_v43 }
 0x32f   : > { %3509 = vmatmul.mubr.bf16.gmra.mrb[156].mxu1 %v8096_v55  ;;  %3677 = vmatprep.mubr.bf16.mxu0 %v8139_v1  ;;  %v8231_v61 = vpack.c.bf16 %v2711_v4, %v2709_v32 }
 0x330   : > { %3516 = vmatprep.mubr.bf16.mxu1 %v8142_v37 }
 0x336   : > { %3678 = vmatmul.mubr.bf16.gmra.mrb[192].mxu0 %v8151_v21 }
 0x337   : > { %3517 = vmatmul.mubr.bf16.gmra.mrb[160].mxu1 %v8125_v11  ;;  %3685 = vmatprep.mubr.bf16.mxu0 %v8153_v54 }
 0x338   : > { %3524 = vmatprep.mubr.bf16.mxu1 %v8156_v18 }
 0x33e   : > { %3686 = vmatmul.mubr.bf16.gmra.mrb[196].mxu0 %v8165_v31 }
 0x33f   : > { %3525 = vmatmul.mubr.bf16.gmra.mrb[164].mxu1 %v8139_v1  ;;  %3693 = vmatprep.mubr.bf16.mxu0 %v8167_v38 }
 0x340   : > { %3532 = vmatprep.mubr.bf16.mxu1 %v8170_v8 }
 0x346   : > { %3694 = vmatmul.mubr.bf16.gmra.mrb[200].mxu0 %v8179_v34 }
 0x347   : > { %3533 = vmatmul.mubr.bf16.gmra.mrb[168].mxu1 %v8153_v54  ;;  %3701 = vmatprep.mubr.bf16.mxu0 %v8181_v23 }
 0x348   : > { %3540 = vmatprep.mubr.bf16.mxu1 %v8184_v62 }
 0x34e   : > { %3702 = vmatmul.mubr.bf16.gmra.mrb[204].mxu0 %v8193_v46 }
 0x34f   : > { %3541 = vmatmul.mubr.bf16.gmra.mrb[172].mxu1 %v8167_v38  ;;  %3709 = vmatprep.mubr.bf16.mxu0 %v8195_v19 }
 0x350   : > { %3548 = vmatprep.mubr.bf16.mxu1 %v8198_v40 }
 0x356   : > { %3710 = vmatmul.mubr.bf16.gmra.mrb[208].mxu0 %v8207_v41 }
 0x357   : > { %3549 = vmatmul.mubr.bf16.gmra.mrb[176].mxu1 %v8181_v23  ;;  %3717 = vmatprep.mubr.bf16.mxu0 %v8209_v44 }
 0x358   : > { %3556 = vmatprep.mubr.bf16.mxu1 %v8212_v59 }
 0x35e   : > { %3718 = vmatmul.mubr.bf16.gmra.mrb[212].mxu0 %v8221_v30 }
 0x35f   : > { %3557 = vmatmul.mubr.bf16.gmra.mrb[180].mxu1 %v8195_v19  ;;  %3725 = vmatprep.mubr.bf16.mxu0 %v8046_v50 }
 0x360   : > { %3564 = vmatprep.mubr.bf16.mxu1 %v8224_v33 }
 0x366   : > { %3726 = vmatmul.mubr.bf16.gmra.mrb[216].mxu0 %v8231_v61 }
 0x367   : > { %3565 = vmatmul.mubr.bf16.gmra.mrb[184].mxu1 %v8209_v44  ;;  %3733 = vmatprep.mubr.bf16.mxu0 %v8235_v42 }
 0x368   : > { %3572 = vmatprep.mubr.bf16.mxu1 %v8082_v9 }
 0x36e   : > { %3734 = vmatmul.mubr.bf16.gmra.mrb[220].mxu0 %v8088_v51 }
 0x36f   : > { %3573 = vmatmul.mubr.bf16.gmra.mrb[188].mxu1 %v8046_v50  ;;  %3935 = vmatprep.mubr.bf16.mxu0 %v7898_v6 }
 0x370   : > { %3774 = vmatprep.mubr.bf16.mxu1 %v7882_v24  ;;  %v5919_v24 = vld [vmem:[%s8933_s3 + $0x218] sm:$0xff]  }
 0x376   : > { %3936 = vmatmul.mubr.bf16.vlgmr.msra.gmra.mrb[224].mxu0 %v7844_v13  ;;  %v5920_v13 = vld [vmem:[%s8933_s3 + $0x220] sm:$0xff]  }
 0x377   : > { %3775 = vmatmul.mubr.bf16.vlgmr.msra.gmra.mrb[192].mxu1 %v7852_v48  ;;  %3943 = vmatprep.mubr.bf16.mxu0 %v7949_v49  ;;  %v5921_v48 = vld [vmem:[%s8933_s3 + $0x228] sm:$0xff]  }
 0x378   : > { %3782 = vmatprep.mubr.bf16.mxu1 %v7929_v57  ;;  %5692 = vmatpush3.bf16.msra.mxu1 %v8020_v53  ;;  %v8314_v53 = vld [vmem:[%s8934_s4] ss:$0 sm:$0xff] }
 0x379   : > { %5693 = vmatprep.subr.bf16.mxu1 %v5917_v45 }
 0x37c   : > { %5694 = vmatpush3.bf16.msra.mxu1 %v5917_v45 }
 0x37d   : > { %5695 = vmatprep.subr.bf16.mxu1 %v5918_v56 }
 0x37e   : > { %3944 = vmatmul.mubr.bf16.gmra.mrb[228].mxu0 %v7889_v28  ;;  %v5922_v28 = vld [vmem:[%s8933_s3 + $0x230] sm:$0xff]  }
 0x37f   : > { %3783 = vmatmul.mubr.bf16.gmra.mrb[196].mxu1 %v7898_v6  ;;  %3951 = vmatprep.mubr.bf16.mxu0 %v7998_v58  ;;  %v5923_v6 = vld [vmem:[%s8933_s3 + $0x238] sm:$0xff]  }
 0x380   : > { %3790 = vmatprep.mubr.bf16.mxu1 %v7980_v10  ;;  %5696 = vmatpush3.bf16.msra.mxu1 %v5918_v56 }
 0x381   : > { %5697 = vmatprep.subr.bf16.mxu1 %v5919_v24 }
 0x384   : > { %5698 = vmatpush3.bf16.msra.mxu1 %v5919_v24 }
 0x385   : > { %5699 = vmatprep.subr.bf16.mxu1 %v5920_v13 }
 0x386   : > { %3952 = vmatmul.mubr.bf16.gmra.mrb[232].mxu0 %v7940_v15 }
 0x387   : > { %3791 = vmatmul.mubr.bf16.gmra.mrb[200].mxu1 %v7949_v49  ;;  %3959 = vmatprep.mubr.bf16.mxu0 %v8060_v63 }
 0x388   : > { %3798 = vmatprep.mubr.bf16.mxu1 %v8038_v36  ;;  %5700 = vmatpush3.bf16.msra.mxu1 %v5920_v13 }
 0x389   : > { %5701 = vmatprep.subr.bf16.mxu1 %v5921_v48 }
 0x38c   : > { %5702 = vmatpush3.bf16.msra.mxu1 %v5921_v48 }
 0x38d   : > { %5703 = vmatprep.subr.bf16.mxu1 %v5922_v28 }
 0x38e   : > { %3960 = vmatmul.mubr.bf16.gmra.mrb[236].mxu0 %v7991_v3 }
 0x38f   : > { %3799 = vmatmul.mubr.bf16.gmra.mrb[204].mxu1 %v7998_v58  ;;  %3967 = vmatprep.mubr.bf16.mxu0 %v8109_v5 }
 0x390   : > { %3806 = vmatprep.mubr.bf16.mxu1 %v8094_v17  ;;  %5704 = vmatpush3.bf16.msra.mxu1 %v5922_v28 }
 0x391   : > { %5705 = vmatprep.subr.bf16.mxu1 %v5923_v6 }
 0x394   : > { %5706 = vmatpush3.bf16.msra.mxu1 %v5923_v6 }
 0x396   : > { %3968 = vmatmul.mubr.bf16.gmra.mrb[240].mxu0 %v8051_v26 }
 0x397   : > { %3807 = vmatmul.mubr.bf16.gmra.mrb[208].mxu1 %v8060_v63  ;;  %3975 = vmatprep.mubr.bf16.mxu0 %v8128_v25 }
 0x398   : > { %3814 = vmatprep.mubr.bf16.mxu1 %v8123_v27 }
 0x39e   : > { %3976 = vmatmul.mubr.bf16.gmra.mrb[244].mxu0 %v8096_v55 }
 0x39f   : > { %3815 = vmatmul.mubr.bf16.gmra.mrb[212].mxu1 %v8109_v5  ;;  %3983 = vmatprep.mubr.bf16.mxu0 %v8142_v37 }
 0x3a0   : > { %3822 = vmatprep.mubr.bf16.mxu1 %v8137_v0 }
 0x3a6   : > { %3984 = vmatmul.mubr.bf16.gmra.mrb[248].mxu0 %v8125_v11 }
 0x3a7   : > { %3823 = vmatmul.mubr.bf16.gmra.mrb[216].mxu1 %v8128_v25  ;;  %3991 = vmatprep.mubr.bf16.mxu0 %v8156_v18 }
 0x3a8   : > { %3830 = vmatprep.mubr.bf16.mxu1 %v8151_v21 }
 0x3ae   : > { %3992 = vmatmul.mubr.bf16.gmra.mrb[252].mxu0 %v8139_v1 }
 0x3af   : > { %3831 = vmatmul.mubr.bf16.gmra.mrb[220].mxu1 %v8142_v37  ;;  %3999 = vmatprep.mubr.bf16.mxu0 %v8170_v8 }
 0x3b0   : > { %3838 = vmatprep.mubr.bf16.mxu1 %v8165_v31 }
 0x3b6   : > { %4000 = vmatmul.mubr.bf16.gmra.mrb[0].mxu0 %v8153_v54 }
 0x3b7   : > { %3839 = vmatmul.mubr.bf16.gmra.mrb[224].mxu1 %v8156_v18  ;;  %4007 = vmatprep.mubr.bf16.mxu0 %v8184_v62 }
 0x3b8   : > { %3846 = vmatprep.mubr.bf16.mxu1 %v8179_v34 }
 0x3be   : > { %4008 = vmatmul.mubr.bf16.gmra.mrb[4].mxu0 %v8167_v38 }
 0x3bf   : > { %3847 = vmatmul.mubr.bf16.gmra.mrb[228].mxu1 %v8170_v8  ;;  %4015 = vmatprep.mubr.bf16.mxu0 %v8198_v40 }
 0x3c0   : > { %3854 = vmatprep.mubr.bf16.mxu1 %v8193_v46 }
 0x3c6   : > { %4016 = vmatmul.mubr.bf16.gmra.mrb[8].mxu0 %v8181_v23 }
 0x3c7   : > { %3855 = vmatmul.mubr.bf16.gmra.mrb[232].mxu1 %v8184_v62  ;;  %4023 = vmatprep.mubr.bf16.mxu0 %v8212_v59 }
 0x3c8   : > { %3862 = vmatprep.mubr.bf16.mxu1 %v8207_v41 }
 0x3c9   : > { %v5299_v15 = vpop.f32.mrb[160].mxu0 }
 0x3ca   : > { %v5187_v49 = vpop.f32.mrb[128].mxu1  ;;  %v5300_v3 = vpop.f32.mrb[161].mxu0 }
 0x3cb   : > { %v5301_v58 = vadd.f32 %v5300_v3, %v5299_v15  ;;  %v5188_v26 = vpop.f32.mrb[129].mxu1  ;;  %v5302_v63 = vpop.f32.mrb[162].mxu0  ;;  %v9079_v3 = vld [vmem:[#allocation39_spill] sm:$0xff] }
 0x3cc   : > { %v5189_v55 = vadd.f32 %v5188_v26, %v5187_v49  ;;  %v5190_v5 = vpop.f32.mrb[130].mxu1  ;;  %v5303_v23 = vpop.f32.mrb[163].mxu0  ;;  %v2769_v49 = vrot.slane %v8077_v20, 1  ;;  %v9080_v26 = vld [vmem:[#allocation40_spill] sm:$0xff] }
 0x3cd   : > { %v5304_v11 = vadd.f32 %v5303_v23, %v5302_v63  ;;  %v5191_v62 = vpop.f32.mrb[131].mxu1 }
 0x3ce   : > { %v3455_v25 = vadd.f32 %v5189_v55, %v8314_v53  ;;  %v5192_v1 = vadd.f32 %v5191_v62, %v5190_v5  ;;  %4024 = vmatmul.mubr.bf16.gmra.mrb[12].mxu0 %v8195_v19  ;;  %v9081_v62 = vld [vmem:[#allocation38_spill] sm:$0xff] }
 0x3cf   : > { %3863 = vmatmul.mubr.bf16.gmra.mrb[236].mxu1 %v8198_v40  ;;  %4031 = vmatprep.mubr.bf16.mxu0 %v8224_v33 }
 0x3d0   : > { %v3458_v37 = vadd.f32 %v5192_v1, %v8314_v53  ;;  %3870 = vmatprep.mubr.bf16.mxu1 %v8221_v30  ;;  %v8322_v54 = vadd.f32 %v5301_v58, %v3455_v25  ;;  %v2772_v58 = vrot.slane %v9079_v3, 1 }
 0x3d1   : > { %v5305_v18 = vpop.f32.mrb[164].mxu0 }
 0x3d2   : > { %v5193_v38 = vpop.f32.mrb[132].mxu1  ;;  %v5306_v8 = vpop.f32.mrb[165].mxu0  ;;  %v8324_v7 = vadd.f32 %v5304_v11, %v3458_v37  ;;  %v2773_v25 = vsel %vm438_vm0, %v9081_v62, %v2772_v58 }
 0x3d3   : > { %v5307_v12 = vadd.f32 %v5306_v8, %v5305_v18  ;;  %v5194_v60 = vpop.f32.mrb[133].mxu1  ;;  %v5308_v39 = vpop.f32.mrb[166].mxu0 }
 0x3d4   : > { %v5195_v22 = vadd.f32 %v5194_v60, %v5193_v38  ;;  %v5196_v19 = vpop.f32.mrb[134].mxu1  ;;  %v5309_v14 = vpop.f32.mrb[167].mxu0 }
 0x3d5   : > { %v5310_v40 = vadd.f32 %v5309_v14, %v5308_v39  ;;  %v5197_v35 = vpop.f32.mrb[135].mxu1 }
 0x3d6   : > { %v3463_v47 = vadd.f32 %v5195_v22, %v8314_v53  ;;  %v5198_v29 = vadd.f32 %v5197_v35, %v5196_v19  ;;  %4032 = vmatmul.mubr.bf16.gmra.mrb[16].mxu0 %v8209_v44  ;;  %v9082_v35 = vld [vmem:[#allocation43_spill] sm:$0xff] }
 0x3d7   : > { %3871 = vmatmul.mubr.bf16.gmra.mrb[240].mxu1 %v8212_v59  ;;  %4039 = vmatprep.mubr.bf16.mxu0 %v8082_v9 }
 0x3d8   : > { %v3466_v2 = vadd.f32 %v5198_v29, %v8314_v53  ;;  %3878 = vmatprep.mubr.bf16.mxu1 %v8231_v61  ;;  %v8332_v52 = vadd.f32 %v5307_v12, %v3463_v47 }
 0x3d9   : > { %v5311_v16 = vpop.f32.mrb[168].mxu0 }
 0x3da   : > { %v5199_v43 = vpop.f32.mrb[136].mxu1  ;;  %v5312_v32 = vpop.f32.mrb[169].mxu0  ;;  %v8334_v4 = vadd.f32 %v5310_v40, %v3466_v2 }
 0x3db   : > { %v5313_v45 = vadd.f32 %v5312_v32, %v5311_v16  ;;  %v5200_v56 = vpop.f32.mrb[137].mxu1  ;;  %v5314_v24 = vpop.f32.mrb[170].mxu0 }
 0x3dc   : > { %v5201_v13 = vadd.f32 %v5200_v56, %v5199_v43  ;;  %v5202_v44 = vpop.f32.mrb[138].mxu1  ;;  %v5315_v48 = vpop.f32.mrb[171].mxu0 }
 0x3dd   : > { %v5316_v59 = vadd.f32 %v5315_v48, %v5314_v24  ;;  %v5203_v28 = vpop.f32.mrb[139].mxu1  ;;  %v5928_v24 = vld [vmem:[#allocation2 + $0x1a0] sm:$0xff] }
 0x3de   : > { %v3471_v6 = vadd.f32 %v5201_v13, %v8314_v53  ;;  %v5204_v15 = vadd.f32 %v5203_v28, %v5202_v44  ;;  %4040 = vmatmul.mubr.bf16.gmra.mrb[20].mxu0 %v8046_v50  ;;  %v2771_v50 = vsel %vm438_vm0, %v2769_v49, %v9081_v62 }
 0x3df   : > { %3879 = vmatmul.mubr.bf16.gmra.mrb[244].mxu1 %v8224_v33  ;;  %4047 = vmatprep.mubr.bf16.mxu0 %v9080_v26  ;;  %v2835_v22 = vpack.c.bf16 %v2773_v25, %v2771_v50 }
 0x3e0   : > { %v3474_v63 = vadd.f32 %v5204_v15, %v8314_v53  ;;  %3886 = vmatprep.mubr.bf16.mxu1 %v8088_v51  ;;  %v8344_v55 = vadd.f32 %v5313_v45, %v3471_v6 }
 0x3e1   : > { %v5317_v5 = vpop.f32.mrb[172].mxu0 }
 0x3e2   : > { %v5205_v23 = vpop.f32.mrb[140].mxu1  ;;  %v5318_v11 = vpop.f32.mrb[173].mxu0  ;;  %v8350_v1 = vadd.f32 %v5316_v59, %v3474_v63 }
 0x3e3   : > { %v5319_v33 = vadd.f32 %v5318_v11, %v5317_v5  ;;  %v5206_v37 = vpop.f32.mrb[141].mxu1  ;;  %v5320_v18 = vpop.f32.mrb[174].mxu0 }
 0x3e4   : > { %v5207_v38 = vadd.f32 %v5206_v37, %v5205_v23  ;;  %v5208_v8 = vpop.f32.mrb[142].mxu1  ;;  %v5321_v12 = vpop.f32.mrb[175].mxu0 }
 0x3e5   : > { %v5322_v60 = vadd.f32 %v5321_v12, %v5320_v18  ;;  %v5209_v39 = vpop.f32.mrb[143].mxu1 }
 0x3e6   : > { %v3479_v19 = vadd.f32 %v5207_v38, %v8314_v53  ;;  %v5210_v14 = vadd.f32 %v5209_v39, %v5208_v8  ;;  %4048 = vmatmul.mubr.bf16.gmra.mrb[24].mxu0 %v8235_v42  ;;  %v2834_v42 = vpack.c.bf16 %v5928_v24, %v8077_v20 }
 0x3e7   : > { %3887 = vmatmul.mubr.bf16.gmra.mrb[248].mxu1 %v8082_v9  ;;  %4055 = vmatprep.mubr.bf16.mxu0 %v2835_v22 }
 0x3e8   : > { %v3482_v40 = vadd.f32 %v5210_v14, %v8314_v53  ;;  %3894 = vmatprep.mubr.bf16.mxu1 %v9082_v35  ;;  %v8357_v47 = vadd.f32 %v5319_v33, %v3479_v19 }
 0x3e9   : > { %v5323_v29 = vpop.f32.mrb[176].mxu0 }
 0x3ea   : > { %v5211_v2 = vpop.f32.mrb[144].mxu1  ;;  %v5324_v16 = vpop.f32.mrb[177].mxu0  ;;  %v8359_v43 = vadd.f32 %v5322_v60, %v3482_v40 }
 0x3eb   : > { %v5325_v32 = vadd.f32 %v5324_v16, %v5323_v29  ;;  %v5212_v45 = vpop.f32.mrb[145].mxu1  ;;  %v5326_v56 = vpop.f32.mrb[178].mxu0 }
 0x3ec   : > { %v5213_v13 = vadd.f32 %v5212_v45, %v5211_v2  ;;  %v5214_v9 = vpop.f32.mrb[146].mxu1  ;;  %v5327_v44 = vpop.f32.mrb[179].mxu0 }
 0x3ed   : > { %v5328_v48 = vadd.f32 %v5327_v44, %v5326_v56  ;;  %v5215_v59 = vpop.f32.mrb[147].mxu1 }
 0x3ee   : > { %v3487_v28 = vadd.f32 %v5213_v13, %v8314_v53  ;;  %v5216_v6 = vadd.f32 %v5215_v59, %v5214_v9  ;;  %4056 = vmatmul.mubr.bf16.gmra.mrb[28].mxu0 %v2834_v42 }
 0x3ef   : > { %3895 = vmatmul.mubr.bf16.gmra.mrb[252].mxu1 %v9080_v26 }
 0x3f0   : > { %v3490_v15 = vadd.f32 %v5216_v6, %v8314_v53  ;;  %5707 = vmatprep.mubr.bf16.mxu1 %v7929_v57  ;;  %v8366_v49 = vadd.f32 %v5325_v32, %v3487_v28 }
 0x3f1   : > { %v5329_v3 = vpop.f32.mrb[180].mxu0 }
 0x3f2   : > { %v5217_v58 = vpop.f32.mrb[148].mxu1  ;;  %v5330_v20 = vpop.f32.mrb[181].mxu0  ;;  %v8368_v63 = vadd.f32 %v5328_v48, %v3490_v15 }
 0x3f3   : > { %v5331_v5 = vadd.f32 %v5330_v20, %v5329_v3  ;;  %v5218_v23 = vpop.f32.mrb[149].mxu1  ;;  %v5332_v11 = vpop.f32.mrb[182].mxu0 }
 0x3f4   : > { %v5219_v62 = vadd.f32 %v5218_v23, %v5217_v58  ;;  %v5220_v50 = vpop.f32.mrb[150].mxu1  ;;  %v5333_v25 = vpop.f32.mrb[183].mxu0 }
 0x3f5   : > { %v5334_v33 = vadd.f32 %v5333_v25, %v5332_v11  ;;  %v5221_v37 = vpop.f32.mrb[151].mxu1 }
 0x3f6   : > { %v3495_v26 = vadd.f32 %v5219_v62, %v8314_v53  ;;  %v5222_v18 = vadd.f32 %v5221_v37, %v5220_v50 }
 0x3f7   : > { %5708 = vmatmul.mubr.bf16.vlgmr.msra.gmra.mrb[0].mxu1 %v7980_v10 }
 0x3f8   : > { %v3498_v57 = vadd.f32 %v5222_v18, %v8314_v53  ;;  %5711 = vmatprep.mubr.bf16.mxu1 %v8038_v36  ;;  %v8374_v38 = vadd.f32 %v5331_v5, %v3495_v26 }
 0x3f9   : > { %v5335_v8 = vpop.f32.mrb[184].mxu0 }
 0x3fa   : > { %v5223_v12 = vpop.f32.mrb[152].mxu1  ;;  %v5336_v60 = vpop.f32.mrb[185].mxu0  ;;  %v8376_v39 = vadd.f32 %v5334_v33, %v3498_v57 }
 0x3fb   : > { %v5337_v22 = vadd.f32 %v5336_v60, %v5335_v8  ;;  %v5224_v19 = vpop.f32.mrb[153].mxu1  ;;  %v5338_v14 = vpop.f32.mrb[186].mxu0 }
 0x3fc   : > { %v5225_v40 = vadd.f32 %v5224_v19, %v5223_v12  ;;  %v5226_v29 = vpop.f32.mrb[154].mxu1  ;;  %v5339_v2 = vpop.f32.mrb[187].mxu0 }
 0x3fd   : > { %v5340_v16 = vadd.f32 %v5339_v2, %v5338_v14  ;;  %v5227_v32 = vpop.f32.mrb[155].mxu1 }
 0x3fe   : > { %v3503_v10 = vadd.f32 %v5225_v40, %v8314_v53  ;;  %v5228_v45 = vadd.f32 %v5227_v32, %v5226_v29 }
 0x3ff   : > { %5712 = vmatmul.mubr.bf16.gmra.mrb[4].mxu1 %v8094_v17 }
 0x400   : > { %v3506_v36 = vadd.f32 %v5228_v45, %v8314_v53  ;;  %5715 = vmatprep.mubr.bf16.mxu1 %v8123_v27  ;;  %v8382_v56 = vadd.f32 %v5337_v22, %v3503_v10 }
 0x401   : > { %v5341_v24 = vpop.f32.mrb[188].mxu0 }
 0x402   : > { %v5229_v42 = vpop.f32.mrb[156].mxu1  ;;  %v5342_v13 = vpop.f32.mrb[189].mxu0  ;;  %v8384_v9 = vadd.f32 %v5340_v16, %v3506_v36 }
 0x403   : > { %v5343_v44 = vadd.f32 %v5342_v13, %v5341_v24  ;;  %v5230_v48 = vpop.f32.mrb[157].mxu1  ;;  %v5344_v59 = vpop.f32.mrb[190].mxu0 }
 0x404   : > { %v5231_v28 = vadd.f32 %v5230_v48, %v5229_v42  ;;  %v5232_v6 = vpop.f32.mrb[158].mxu1  ;;  %v5345_v15 = vpop.f32.mrb[191].mxu0 }
 0x405   : > { %v5346_v3 = vadd.f32 %v5345_v15, %v5344_v59  ;;  %v5233_v58 = vpop.f32.mrb[159].mxu1 }
 0x406   : > { %v3511_v17 = vadd.f32 %v5231_v28, %v8314_v53  ;;  %v5234_v20 = vadd.f32 %v5233_v58, %v5232_v6 }
 0x407   : > { %5716 = vmatmul.mubr.bf16.gmra.mrb[8].mxu1 %v8137_v0 }
 0x408   : > { %v3514_v27 = vadd.f32 %v5234_v20, %v8314_v53  ;;  %5719 = vmatprep.mubr.bf16.mxu1 %v8151_v21  ;;  %v8390_v5 = vadd.f32 %v5343_v44, %v3511_v17 }
 0x409   : > { %v5347_v23 = vpop.f32.mrb[192].mxu0 }
 0x40a   : > { %v5235_v11 = vpop.f32.mrb[160].mxu1  ;;  %v5348_v62 = vpop.f32.mrb[193].mxu0  ;;  %v8392_v50 = vadd.f32 %v5346_v3, %v3514_v27 }
 0x40b   : > { %v5349_v25 = vadd.f32 %v5348_v62, %v5347_v23  ;;  %v5236_v33 = vpop.f32.mrb[161].mxu1  ;;  %v5350_v37 = vpop.f32.mrb[194].mxu0 }
 0x40c   : > { %v5237_v26 = vadd.f32 %v5236_v33, %v5235_v11  ;;  %v5238_v18 = vpop.f32.mrb[162].mxu1  ;;  %v5351_v57 = vpop.f32.mrb[195].mxu0 }
 0x40d   : > { %v5352_v8 = vadd.f32 %v5351_v57, %v5350_v37  ;;  %v5239_v12 = vpop.f32.mrb[163].mxu1 }
 0x40e   : > { %v3519_v0 = vadd.f32 %v5237_v26, %v8314_v53  ;;  %v5240_v60 = vadd.f32 %v5239_v12, %v5238_v18 }
 0x40f   : > { %5720 = vmatmul.mubr.bf16.gmra.mrb[12].mxu1 %v8165_v31 }
 0x410   : > { %v3522_v21 = vadd.f32 %v5240_v60, %v8314_v53  ;;  %5723 = vmatprep.mubr.bf16.mxu1 %v8179_v34  ;;  %v8398_v22 = vadd.f32 %v5349_v25, %v3519_v0 }
 0x411   : > { %v5353_v19 = vpop.f32.mrb[196].mxu0 }
 0x412   : > { %v5241_v14 = vpop.f32.mrb[164].mxu1  ;;  %v5354_v40 = vpop.f32.mrb[197].mxu0  ;;  %v8400_v29 = vadd.f32 %v5352_v8, %v3522_v21 }
 0x413   : > { %v5355_v2 = vadd.f32 %v5354_v40, %v5353_v19  ;;  %v5242_v16 = vpop.f32.mrb[165].mxu1  ;;  %v5356_v32 = vpop.f32.mrb[198].mxu0 }
 0x414   : > { %v5243_v10 = vadd.f32 %v5242_v16, %v5241_v14  ;;  %v5244_v45 = vpop.f32.mrb[166].mxu1  ;;  %v5357_v36 = vpop.f32.mrb[199].mxu0 }
 0x415   : > { %v5358_v24 = vadd.f32 %v5357_v36, %v5356_v32  ;;  %v5245_v42 = vpop.f32.mrb[167].mxu1 }
 0x416   : > { %v3527_v31 = vadd.f32 %v5243_v10, %v8314_v53  ;;  %v5246_v13 = vadd.f32 %v5245_v42, %v5244_v45 }
 0x417   : > { %5724 = vmatmul.mubr.bf16.gmra.mrb[16].mxu1 %v8193_v46 }
 0x418   : > { %v3530_v34 = vadd.f32 %v5246_v13, %v8314_v53  ;;  %5727 = vmatprep.mubr.bf16.mxu1 %v8207_v41  ;;  %v8406_v44 = vadd.f32 %v5355_v2, %v3527_v31 }
 0x419   : > { %v5359_v48 = vpop.f32.mrb[200].mxu0 }
 0x41a   : > { %v5247_v59 = vpop.f32.mrb[168].mxu1  ;;  %v5360_v28 = vpop.f32.mrb[201].mxu0  ;;  %v8408_v6 = vadd.f32 %v5358_v24, %v3530_v34 }
 0x41b   : > { %v5361_v15 = vadd.f32 %v5360_v28, %v5359_v48  ;;  %v5248_v3 = vpop.f32.mrb[169].mxu1  ;;  %v5362_v58 = vpop.f32.mrb[202].mxu0 }
 0x41c   : > { %v5249_v17 = vadd.f32 %v5248_v3, %v5247_v59  ;;  %v5250_v20 = vpop.f32.mrb[170].mxu1  ;;  %v5363_v27 = vpop.f32.mrb[203].mxu0 }
 0x41d   : > { %v5364_v23 = vadd.f32 %v5363_v27, %v5362_v58  ;;  %v5251_v11 = vpop.f32.mrb[171].mxu1 }
 0x41e   : > { %v3535_v46 = vadd.f32 %v5249_v17, %v8314_v53  ;;  %v5252_v62 = vadd.f32 %v5251_v11, %v5250_v20 }
 0x41f   : > { %5728 = vmatmul.mubr.bf16.gmra.mrb[20].mxu1 %v8221_v30 }
 0x420   : > { %v3538_v41 = vadd.f32 %v5252_v62, %v8314_v53  ;;  %5731 = vmatprep.mubr.bf16.mxu1 %v8231_v61  ;;  %v8414_v25 = vadd.f32 %v5361_v15, %v3535_v46  ;;  %v9083_v15 = vld [vmem:[#allocation42_spill] sm:$0xff] }
 0x421   : > { %v5365_v33 = vpop.f32.mrb[204].mxu0 }
 0x422   : > { %v5253_v37 = vpop.f32.mrb[172].mxu1  ;;  %v5366_v26 = vpop.f32.mrb[205].mxu0  ;;  %v8416_v18 = vadd.f32 %v5364_v23, %v3538_v41 }
 0x423   : > { %v5367_v57 = vadd.f32 %v5366_v26, %v5365_v33  ;;  %v5254_v8 = vpop.f32.mrb[173].mxu1  ;;  %v5368_v12 = vpop.f32.mrb[206].mxu0 }
 0x424   : > { %v5255_v0 = vadd.f32 %v5254_v8, %v5253_v37  ;;  %v5256_v60 = vpop.f32.mrb[174].mxu1  ;;  %v5369_v21 = vpop.f32.mrb[207].mxu0 }
 0x425   : > { %v5370_v19 = vadd.f32 %v5369_v21, %v5368_v12  ;;  %v5257_v14 = vpop.f32.mrb[175].mxu1 }
 0x426   : > { %v3543_v30 = vadd.f32 %v5255_v0, %v8314_v53  ;;  %v5258_v40 = vadd.f32 %v5257_v14, %v5256_v60 }
 0x427   : > { %5732 = vmatmul.mubr.bf16.gmra.mrb[24].mxu1 %v8088_v51 }
 0x428   : > { %v3546_v61 = vadd.f32 %v5258_v40, %v8314_v53  ;;  %5735 = vmatprep.mubr.bf16.mxu1 %v9082_v35  ;;  %v8422_v2 = vadd.f32 %v5367_v57, %v3543_v30  ;;  %v9084_v35 = vld [vmem:[#allocation41_spill] sm:$0xff] }
 0x429   : > { %v5371_v16 = vpop.f32.mrb[208].mxu0  ;;  %v9085_v3 = vpack.c.bf16 %v9083_v15, %v9084_v35 }
 0x42a   : > { %v5259_v32 = vpop.f32.mrb[176].mxu1  ;;  %v5372_v10 = vpop.f32.mrb[209].mxu0  ;;  %v8424_v45 = vadd.f32 %v5370_v19, %v3546_v61 }
 0x42b   : > { %v5373_v36 = vadd.f32 %v5372_v10, %v5371_v16  ;;  %v5260_v24 = vpop.f32.mrb[177].mxu1  ;;  %v5374_v42 = vpop.f32.mrb[210].mxu0 }
 0x42c   : > { %v5261_v31 = vadd.f32 %v5260_v24, %v5259_v32  ;;  %v5262_v13 = vpop.f32.mrb[178].mxu1  ;;  %v5375_v34 = vpop.f32.mrb[211].mxu0 }
 0x42d   : > { %v5376_v48 = vadd.f32 %v5375_v34, %v5374_v42  ;;  %v5263_v59 = vpop.f32.mrb[179].mxu1 }
 0x42e   : > { %v3551_v51 = vadd.f32 %v5261_v31, %v8314_v53  ;;  %v5264_v28 = vadd.f32 %v5263_v59, %v5262_v13 }
 0x42f   : > { %5736 = vmatmul.mubr.bf16.gmra.mrb[28].mxu1 %v9085_v3 }
 0x430   : > { %v3554_v58 = vadd.f32 %v5264_v28, %v8314_v53  ;;  %v8431_v17 = vadd.f32 %v5373_v36, %v3551_v51 }
 0x431   : > { %v5377_v20 = vpop.f32.mrb[212].mxu0 }
 0x432   : > { %v5265_v27 = vpop.f32.mrb[180].mxu1  ;;  %v5378_v23 = vpop.f32.mrb[213].mxu0  ;;  %v8433_v11 = vadd.f32 %v5376_v48, %v3554_v58 }
 0x433   : > { %v5379_v46 = vadd.f32 %v5378_v23, %v5377_v20  ;;  %v5266_v62 = vpop.f32.mrb[181].mxu1  ;;  %v5380_v41 = vpop.f32.mrb[214].mxu0 }
 0x434   : > { %v5267_v33 = vadd.f32 %v5266_v62, %v5265_v27  ;;  %v5268_v37 = vpop.f32.mrb[182].mxu1  ;;  %v5381_v26 = vpop.f32.mrb[215].mxu0 }
 0x435   : > { %v5382_v57 = vadd.f32 %v5381_v26, %v5380_v41  ;;  %v5269_v8 = vpop.f32.mrb[183].mxu1 }
 0x436   : > { %v3559_v12 = vadd.f32 %v5267_v33, %v8314_v53  ;;  %v5270_v0 = vadd.f32 %v5269_v8, %v5268_v37 }
 0x438   : > { %v3562_v60 = vadd.f32 %v5270_v0, %v8314_v53  ;;  %v8437_v21 = vadd.f32 %v5379_v46, %v3559_v12 }
 0x439   : > { %v5383_v19 = vpop.f32.mrb[216].mxu0 }
 0x43a   : > { %v5271_v14 = vpop.f32.mrb[184].mxu1  ;;  %v5384_v30 = vpop.f32.mrb[217].mxu0  ;;  %v8439_v40 = vadd.f32 %v5382_v57, %v3562_v60 }
 0x43b   : > { %v5385_v61 = vadd.f32 %v5384_v30, %v5383_v19  ;;  %v5272_v16 = vpop.f32.mrb[185].mxu1  ;;  %v5386_v32 = vpop.f32.mrb[218].mxu0 }
 0x43c   : > { %v5273_v10 = vadd.f32 %v5272_v16, %v5271_v14  ;;  %v5274_v36 = vpop.f32.mrb[186].mxu1  ;;  %v5387_v24 = vpop.f32.mrb[219].mxu0 }
 0x43d   : > { %v5388_v42 = vadd.f32 %v5387_v24, %v5386_v32  ;;  %v5275_v31 = vpop.f32.mrb[187].mxu1 }
 0x43e   : > { %v3567_v13 = vadd.f32 %v5273_v10, %v8314_v53  ;;  %v5276_v34 = vadd.f32 %v5275_v31, %v5274_v36 }
 0x440   : > { %v3570_v48 = vadd.f32 %v5276_v34, %v8314_v53  ;;  %v8443_v59 = vadd.f32 %v5385_v61, %v3567_v13 }
 0x441   : > { %v5389_v51 = vpop.f32.mrb[220].mxu0 }
 0x442   : > { %v5277_v28 = vpop.f32.mrb[188].mxu1  ;;  %v5390_v15 = vpop.f32.mrb[221].mxu0  ;;  %v8445_v35 = vadd.f32 %v5388_v42, %v3570_v48 }
 0x443   : > { %v5391_v3 = vadd.f32 %v5390_v15, %v5389_v51  ;;  %v5278_v58 = vpop.f32.mrb[189].mxu1  ;;  %v5392_v20 = vpop.f32.mrb[222].mxu0 }
 0x444   : > { %v5279_v27 = vadd.f32 %v5278_v58, %v5277_v28  ;;  %v5280_v23 = vpop.f32.mrb[190].mxu1  ;;  %v5393_v46 = vpop.f32.mrb[223].mxu0 }
 0x445   : > { %v5394_v62 = vadd.f32 %v5393_v46, %v5392_v20  ;;  %v5281_v41 = vpop.f32.mrb[191].mxu1 }
 0x446   : > { %v3575_v33 = vadd.f32 %v5279_v27, %v8314_v53  ;;  %v5282_v37 = vadd.f32 %v5281_v41, %v5280_v23 }
 0x448   : > { %v3578_v26 = vadd.f32 %v5282_v37, %v8314_v53  ;;  %v8449_v57 = vadd.f32 %v5391_v3, %v3575_v33 }
 0x449   : > { %v5523_v8 = vpop.f32.mrb[224].mxu0 }
 0x44a   : > { %v5411_v12 = vpop.f32.mrb[192].mxu1  ;;  %v5524_v0 = vpop.f32.mrb[225].mxu0  ;;  %v8451_v60 = vadd.f32 %v5394_v62, %v3578_v26 }
 0x44b   : > { %v5525_v19 = vadd.f32 %v5524_v0, %v5523_v8  ;;  %v5412_v14 = vpop.f32.mrb[193].mxu1  ;;  %v5526_v30 = vpop.f32.mrb[226].mxu0 }
 0x44c   : > { %v5413_v61 = vadd.f32 %v5412_v14, %v5411_v12  ;;  %v5414_v16 = vpop.f32.mrb[194].mxu1  ;;  %v5527_v32 = vpop.f32.mrb[227].mxu0 }
 0x44d   : > { %v5528_v10 = vadd.f32 %v5527_v32, %v5526_v30  ;;  %v5415_v36 = vpop.f32.mrb[195].mxu1 }
 0x44e   : > { %v3777_v24 = vadd.f32 %v5413_v61, %v8322_v54  ;;  %v5416_v42 = vadd.f32 %v5415_v36, %v5414_v16 }
 0x450   : > { %v3780_v53 = vadd.f32 %v5416_v42, %v8324_v7  ;;  %v8455_v31 = vadd.f32 %v5525_v19, %v3777_v24 }
 0x451   : > { %v5529_v13 = vpop.f32.mrb[228].mxu0 }
 0x452   : > { %v5417_v34 = vpop.f32.mrb[196].mxu1  ;;  %v5530_v48 = vpop.f32.mrb[229].mxu0  ;;  %v8457_v51 = vadd.f32 %v5528_v10, %v3780_v53 }
 0x453   : > { %v5531_v28 = vadd.f32 %v5530_v48, %v5529_v13  ;;  %v5418_v15 = vpop.f32.mrb[197].mxu1  ;;  %v5532_v3 = vpop.f32.mrb[230].mxu0 }
 0x454   : > { %v5419_v58 = vadd.f32 %v5418_v15, %v5417_v34  ;;  %v5420_v20 = vpop.f32.mrb[198].mxu1  ;;  %v5533_v27 = vpop.f32.mrb[231].mxu0 }
 0x455   : > { %v5534_v23 = vadd.f32 %v5533_v27, %v5532_v3  ;;  %v5421_v46 = vpop.f32.mrb[199].mxu1 }
 0x456   : > { %v3785_v54 = vadd.f32 %v5419_v58, %v8332_v52  ;;  %v5422_v62 = vadd.f32 %v5421_v46, %v5420_v20 }
 0x458   : > { %v3788_v7 = vadd.f32 %v5422_v62, %v8334_v4  ;;  %v8461_v41 = vadd.f32 %v5531_v28, %v3785_v54 }
 0x459   : > { %v5535_v33 = vpop.f32.mrb[232].mxu0 }
 0x45a   : > { %v5423_v37 = vpop.f32.mrb[200].mxu1  ;;  %v5536_v26 = vpop.f32.mrb[233].mxu0  ;;  %v8463_v8 = vadd.f32 %v5534_v23, %v3788_v7 }
 0x45b   : > { %v5537_v12 = vadd.f32 %v5536_v26, %v5535_v33  ;;  %v5424_v0 = vpop.f32.mrb[201].mxu1  ;;  %v5538_v19 = vpop.f32.mrb[234].mxu0 }
 0x45c   : > { %v5425_v14 = vadd.f32 %v5424_v0, %v5423_v37  ;;  %v5426_v30 = vpop.f32.mrb[202].mxu1  ;;  %v5539_v61 = vpop.f32.mrb[235].mxu0 }
 0x45d   : > { %v5540_v16 = vadd.f32 %v5539_v61, %v5538_v19  ;;  %v5427_v32 = vpop.f32.mrb[203].mxu1 }
 0x45e   : > { %v3793_v52 = vadd.f32 %v5425_v14, %v8344_v55  ;;  %v5428_v10 = vadd.f32 %v5427_v32, %v5426_v30 }
 0x460   : > { %v3796_v4 = vadd.f32 %v5428_v10, %v8350_v1  ;;  %v8467_v36 = vadd.f32 %v5537_v12, %v3793_v52 }
 0x461   : > { %v5541_v24 = vpop.f32.mrb[236].mxu0 }
 0x462   : > { %v5429_v42 = vpop.f32.mrb[204].mxu1  ;;  %v5542_v53 = vpop.f32.mrb[237].mxu0  ;;  %v8469_v13 = vadd.f32 %v5540_v16, %v3796_v4 }
 0x463   : > { %v5543_v34 = vadd.f32 %v5542_v53, %v5541_v24  ;;  %v5430_v48 = vpop.f32.mrb[205].mxu1  ;;  %v5544_v28 = vpop.f32.mrb[238].mxu0 }
 0x464   : > { %v5431_v15 = vadd.f32 %v5430_v48, %v5429_v42  ;;  %v5432_v3 = vpop.f32.mrb[206].mxu1  ;;  %v5545_v58 = vpop.f32.mrb[239].mxu0 }
 0x465   : > { %v5546_v20 = vadd.f32 %v5545_v58, %v5544_v28  ;;  %v5433_v27 = vpop.f32.mrb[207].mxu1 }
 0x466   : > { %v3801_v55 = vadd.f32 %v5431_v15, %v8357_v47  ;;  %v5434_v23 = vadd.f32 %v5433_v27, %v5432_v3 }
 0x468   : > { %v3804_v1 = vadd.f32 %v5434_v23, %v8359_v43  ;;  %v8473_v46 = vadd.f32 %v5543_v34, %v3801_v55 }
 0x469   : > { %v5547_v54 = vpop.f32.mrb[240].mxu0 }
 0x46a   : > { %v5435_v62 = vpop.f32.mrb[208].mxu1  ;;  %v5548_v7 = vpop.f32.mrb[241].mxu0  ;;  %v8475_v33 = vadd.f32 %v5546_v20, %v3804_v1 }
 0x46b   : > { %v5549_v37 = vadd.f32 %v5548_v7, %v5547_v54  ;;  %v5436_v26 = vpop.f32.mrb[209].mxu1  ;;  %v5550_v12 = vpop.f32.mrb[242].mxu0 }
 0x46c   : > { %v5437_v0 = vadd.f32 %v5436_v26, %v5435_v62  ;;  %v5438_v19 = vpop.f32.mrb[210].mxu1  ;;  %v5551_v14 = vpop.f32.mrb[243].mxu0 }
 0x46d   : > { %v5552_v30 = vadd.f32 %v5551_v14, %v5550_v12  ;;  %v5439_v61 = vpop.f32.mrb[211].mxu1 }
 0x46e   : > { %v3809_v47 = vadd.f32 %v5437_v0, %v8366_v49  ;;  %v5440_v16 = vadd.f32 %v5439_v61, %v5438_v19 }
 0x470   : > { %v3812_v43 = vadd.f32 %v5440_v16, %v8368_v63  ;;  %v8479_v32 = vadd.f32 %v5549_v37, %v3809_v47 }
 0x471   : > { %v5553_v52 = vpop.f32.mrb[244].mxu0 }
 0x472   : > { %v5441_v10 = vpop.f32.mrb[212].mxu1  ;;  %v5554_v4 = vpop.f32.mrb[245].mxu0  ;;  %v8481_v24 = vadd.f32 %v5552_v30, %v3812_v43 }
 0x473   : > { %v5555_v42 = vadd.f32 %v5554_v4, %v5553_v52  ;;  %v5442_v53 = vpop.f32.mrb[213].mxu1  ;;  %v5556_v34 = vpop.f32.mrb[246].mxu0 }
 0x474   : > { %v5443_v48 = vadd.f32 %v5442_v53, %v5441_v10  ;;  %v5444_v28 = vpop.f32.mrb[214].mxu1  ;;  %v5557_v15 = vpop.f32.mrb[247].mxu0 }
 0x475   : > { %v5558_v3 = vadd.f32 %v5557_v15, %v5556_v34  ;;  %v5445_v58 = vpop.f32.mrb[215].mxu1 }
 0x476   : > { %v3817_v49 = vadd.f32 %v5443_v48, %v8374_v38  ;;  %v5446_v20 = vadd.f32 %v5445_v58, %v5444_v28 }
 0x478   : > { %v3820_v63 = vadd.f32 %v5446_v20, %v8376_v39  ;;  %v8485_v27 = vadd.f32 %v5555_v42, %v3817_v49 }
 0x479   : > { %v5559_v55 = vpop.f32.mrb[248].mxu0 }
 0x47a   : > { %v5447_v23 = vpop.f32.mrb[216].mxu1  ;;  %v5560_v1 = vpop.f32.mrb[249].mxu0  ;;  %v8487_v54 = vadd.f32 %v5558_v3, %v3820_v63 }
 0x47b   : > { %v5561_v62 = vadd.f32 %v5560_v1, %v5559_v55  ;;  %v5448_v7 = vpop.f32.mrb[217].mxu1  ;;  %v5562_v37 = vpop.f32.mrb[250].mxu0 }
 0x47c   : > { %v5449_v26 = vadd.f32 %v5448_v7, %v5447_v23  ;;  %v5450_v12 = vpop.f32.mrb[218].mxu1  ;;  %v5563_v0 = vpop.f32.mrb[251].mxu0 }
 0x47d   : > { %v5564_v19 = vadd.f32 %v5563_v0, %v5562_v37  ;;  %v5451_v14 = vpop.f32.mrb[219].mxu1 }
 0x47e   : > { %v3825_v38 = vadd.f32 %v5449_v26, %v8382_v56  ;;  %v5452_v30 = vadd.f32 %v5451_v14, %v5450_v12 }
 0x480   : > { %v3828_v39 = vadd.f32 %v5452_v30, %v8384_v9  ;;  %v8491_v61 = vadd.f32 %v5561_v62, %v3825_v38 }
 0x481   : > { %v5565_v47 = vpop.f32.mrb[252].mxu0 }
 0x482   : > { %v5453_v16 = vpop.f32.mrb[220].mxu1  ;;  %v5566_v43 = vpop.f32.mrb[253].mxu0  ;;  %v8493_v52 = vadd.f32 %v5564_v19, %v3828_v39 }
 0x483   : > { %v5567_v10 = vadd.f32 %v5566_v43, %v5565_v47  ;;  %v5454_v4 = vpop.f32.mrb[221].mxu1  ;;  %v5568_v42 = vpop.f32.mrb[254].mxu0 }
 0x484   : > { %v5455_v53 = vadd.f32 %v5454_v4, %v5453_v16  ;;  %v5456_v34 = vpop.f32.mrb[222].mxu1  ;;  %v5569_v48 = vpop.f32.mrb[255].mxu0 }
 0x485   : > { %v5570_v28 = vadd.f32 %v5569_v48, %v5568_v42  ;;  %v5457_v15 = vpop.f32.mrb[223].mxu1 }
 0x486   : > { %v3833_v56 = vadd.f32 %v5455_v53, %v8390_v5  ;;  %v5458_v3 = vadd.f32 %v5457_v15, %v5456_v34 }
 0x488   : > { %v3836_v9 = vadd.f32 %v5458_v3, %v8392_v50  ;;  %v8497_v58 = vadd.f32 %v5567_v10, %v3833_v56 }
 0x489   : > { %v5571_v49 = vpop.f32.mrb[0].mxu0 }
 0x48a   : > { %v5459_v20 = vpop.f32.mrb[224].mxu1  ;;  %v5572_v63 = vpop.f32.mrb[1].mxu0  ;;  %v8499_v55 = vadd.f32 %v5570_v28, %v3836_v9 }
 0x48b   : > { %v5573_v23 = vadd.f32 %v5572_v63, %v5571_v49  ;;  %v5460_v1 = vpop.f32.mrb[225].mxu1  ;;  %v5574_v62 = vpop.f32.mrb[2].mxu0 }
 0x48c   : > { %v5461_v7 = vadd.f32 %v5460_v1, %v5459_v20  ;;  %v5462_v37 = vpop.f32.mrb[226].mxu1  ;;  %v5575_v26 = vpop.f32.mrb[3].mxu0 }
 0x48d   : > { %v5576_v12 = vadd.f32 %v5575_v26, %v5574_v62  ;;  %v5463_v0 = vpop.f32.mrb[227].mxu1 }
 0x48e   : > { %v3841_v5 = vadd.f32 %v5461_v7, %v8398_v22  ;;  %v5464_v19 = vadd.f32 %v5463_v0, %v5462_v37 }
 0x490   : > { %v3844_v50 = vadd.f32 %v5464_v19, %v8400_v29  ;;  %v8503_v14 = vadd.f32 %v5573_v23, %v3841_v5 }
 0x491   : > { %v5577_v38 = vpop.f32.mrb[4].mxu0 }
 0x492   : > { %v5465_v30 = vpop.f32.mrb[228].mxu1  ;;  %v5578_v39 = vpop.f32.mrb[5].mxu0  ;;  %v8505_v47 = vadd.f32 %v5576_v12, %v3844_v50 }
 0x493   : > { %v5579_v16 = vadd.f32 %v5578_v39, %v5577_v38  ;;  %v5466_v43 = vpop.f32.mrb[229].mxu1  ;;  %v5580_v10 = vpop.f32.mrb[6].mxu0 }
 0x494   : > { %v5467_v4 = vadd.f32 %v5466_v43, %v5465_v30  ;;  %v5468_v42 = vpop.f32.mrb[230].mxu1  ;;  %v5581_v53 = vpop.f32.mrb[7].mxu0 }
 0x495   : > { %v5582_v34 = vadd.f32 %v5581_v53, %v5580_v10  ;;  %v5469_v48 = vpop.f32.mrb[231].mxu1 }
 0x496   : > { %v3849_v22 = vadd.f32 %v5467_v4, %v8406_v44  ;;  %v5470_v28 = vadd.f32 %v5469_v48, %v5468_v42 }
 0x498   : > { %v3852_v29 = vadd.f32 %v5470_v28, %v8408_v6  ;;  %v8509_v15 = vadd.f32 %v5579_v16, %v3849_v22 }
 0x499   : > { %v5583_v56 = vpop.f32.mrb[8].mxu0 }
 0x49a   : > { %v5471_v3 = vpop.f32.mrb[232].mxu1  ;;  %v5584_v9 = vpop.f32.mrb[9].mxu0  ;;  %v8511_v49 = vadd.f32 %v5582_v34, %v3852_v29 }
 0x49b   : > { %v5585_v20 = vadd.f32 %v5584_v9, %v5583_v56  ;;  %v5472_v63 = vpop.f32.mrb[233].mxu1  ;;  %v5586_v23 = vpop.f32.mrb[10].mxu0 }
 0x49c   : > { %v5473_v1 = vadd.f32 %v5472_v63, %v5471_v3  ;;  %v5474_v62 = vpop.f32.mrb[234].mxu1  ;;  %v5587_v7 = vpop.f32.mrb[11].mxu0 }
 0x49d   : > { %v5588_v37 = vadd.f32 %v5587_v7, %v5586_v23  ;;  %v5475_v26 = vpop.f32.mrb[235].mxu1 }
 0x49e   : > { %v3857_v44 = vadd.f32 %v5473_v1, %v8414_v25  ;;  %v5476_v12 = vadd.f32 %v5475_v26, %v5474_v62 }
 0x4a0   : > { %v3860_v6 = vadd.f32 %v5476_v12, %v8416_v18  ;;  %v8515_v0 = vadd.f32 %v5585_v20, %v3857_v44 }
 0x4a1   : > { %v5589_v5 = vpop.f32.mrb[12].mxu0 }
 0x4a2   : > { %v5477_v19 = vpop.f32.mrb[236].mxu1  ;;  %v5590_v50 = vpop.f32.mrb[13].mxu0  ;;  %v8517_v38 = vadd.f32 %v5588_v37, %v3860_v6 }
 0x4a3   : > { %v5591_v30 = vadd.f32 %v5590_v50, %v5589_v5  ;;  %v5478_v39 = vpop.f32.mrb[237].mxu1  ;;  %v5592_v16 = vpop.f32.mrb[14].mxu0 }
 0x4a4   : > { %v5479_v43 = vadd.f32 %v5478_v39, %v5477_v19  ;;  %v5480_v10 = vpop.f32.mrb[238].mxu1  ;;  %v5593_v4 = vpop.f32.mrb[15].mxu0 }
 0x4a5   : > { %v5594_v42 = vadd.f32 %v5593_v4, %v5592_v16  ;;  %v5481_v53 = vpop.f32.mrb[239].mxu1 }
 0x4a6   : > { %v3865_v25 = vadd.f32 %v5479_v43, %v8422_v2  ;;  %v5482_v34 = vadd.f32 %v5481_v53, %v5480_v10 }
 0x4a8   : > { %v3868_v18 = vadd.f32 %v5482_v34, %v8424_v45  ;;  %v8521_v48 = vadd.f32 %v5591_v30, %v3865_v25 }
 0x4a9   : > { %v5595_v22 = vpop.f32.mrb[16].mxu0 }
 0x4aa   : > { %v5483_v28 = vpop.f32.mrb[240].mxu1  ;;  %v5596_v29 = vpop.f32.mrb[17].mxu0  ;;  %v8523_v56 = vadd.f32 %v5594_v42, %v3868_v18 }
 0x4ab   : > { %v5597_v3 = vadd.f32 %v5596_v29, %v5595_v22  ;;  %v5484_v9 = vpop.f32.mrb[241].mxu1  ;;  %v5598_v20 = vpop.f32.mrb[18].mxu0 }
 0x4ac   : > { %v5485_v63 = vadd.f32 %v5484_v9, %v5483_v28  ;;  %v5486_v23 = vpop.f32.mrb[242].mxu1  ;;  %v5599_v1 = vpop.f32.mrb[19].mxu0 }
 0x4ad   : > { %v5600_v62 = vadd.f32 %v5599_v1, %v5598_v20  ;;  %v5487_v7 = vpop.f32.mrb[243].mxu1 }
 0x4ae   : > { %v3873_v2 = vadd.f32 %v5485_v63, %v8431_v17  ;;  %v5488_v37 = vadd.f32 %v5487_v7, %v5486_v23 }
 0x4b0   : > { %v3876_v45 = vadd.f32 %v5488_v37, %v8433_v11  ;;  %v8527_v26 = vadd.f32 %v5597_v3, %v3873_v2 }
 0x4b1   : > { %v5601_v44 = vpop.f32.mrb[20].mxu0 }
 0x4b2   : > { %v5489_v12 = vpop.f32.mrb[244].mxu1  ;;  %v5602_v6 = vpop.f32.mrb[21].mxu0  ;;  %v8529_v5 = vadd.f32 %v5600_v62, %v3876_v45 }
 0x4b3   : > { %v5603_v19 = vadd.f32 %v5602_v6, %v5601_v44  ;;  %v5490_v50 = vpop.f32.mrb[245].mxu1  ;;  %v5604_v30 = vpop.f32.mrb[22].mxu0 }
 0x4b4   : > { %v5491_v39 = vadd.f32 %v5490_v50, %v5489_v12  ;;  %v5492_v16 = vpop.f32.mrb[246].mxu1  ;;  %v5605_v43 = vpop.f32.mrb[23].mxu0 }
 0x4b5   : > { %v5606_v10 = vadd.f32 %v5605_v43, %v5604_v30  ;;  %v5493_v4 = vpop.f32.mrb[247].mxu1 }
 0x4b6   : > { %v3881_v17 = vadd.f32 %v5491_v39, %v8437_v21  ;;  %v5494_v42 = vadd.f32 %v5493_v4, %v5492_v16 }
 0x4b8   : > { %v3884_v11 = vadd.f32 %v5494_v42, %v8439_v40  ;;  %v8533_v53 = vadd.f32 %v5603_v19, %v3881_v17 }
 0x4b9   : > { %v5607_v25 = vpop.f32.mrb[24].mxu0 }
 0x4ba   : > { %v5495_v34 = vpop.f32.mrb[248].mxu1  ;;  %v5608_v18 = vpop.f32.mrb[25].mxu0  ;;  %v8535_v22 = vadd.f32 %v5606_v10, %v3884_v11 }
 0x4bb   : > { %v5609_v28 = vadd.f32 %v5608_v18, %v5607_v25  ;;  %v5496_v29 = vpop.f32.mrb[249].mxu1  ;;  %v5610_v3 = vpop.f32.mrb[26].mxu0 }
 0x4bc   : > { %v5497_v9 = vadd.f32 %v5496_v29, %v5495_v34  ;;  %v5498_v20 = vpop.f32.mrb[250].mxu1  ;;  %v5611_v63 = vpop.f32.mrb[27].mxu0 }
 0x4bd   : > { %v5612_v23 = vadd.f32 %v5611_v63, %v5610_v3  ;;  %v5499_v1 = vpop.f32.mrb[251].mxu1 }
 0x4be   : > { %v3889_v21 = vadd.f32 %v5497_v9, %v8443_v59  ;;  %v5500_v62 = vadd.f32 %v5499_v1, %v5498_v20 }
 0x4c0   : > { %v3892_v40 = vadd.f32 %v5500_v62, %v8445_v35  ;;  %v8539_v7 = vadd.f32 %v5609_v28, %v3889_v21 }
 0x4c1   : > { %v5613_v2 = vpop.f32.mrb[28].mxu0 }
 0x4c2   : > { %v5501_v37 = vpop.f32.mrb[252].mxu1  ;;  %v5614_v45 = vpop.f32.mrb[29].mxu0  ;;  %v8541_v44 = vadd.f32 %v5612_v23, %v3892_v40 }
 0x4c3   : > { %v5615_v12 = vadd.f32 %v5614_v45, %v5613_v2  ;;  %v5502_v6 = vpop.f32.mrb[253].mxu1  ;;  %v5616_v19 = vpop.f32.mrb[30].mxu0 }
 0x4c4   : > { %v5503_v50 = vadd.f32 %v5502_v6, %v5501_v37  ;;  %v5504_v30 = vpop.f32.mrb[254].mxu1  ;;  %v5617_v39 = vpop.f32.mrb[31].mxu0 }
 0x4c5   : > { %v5618_v16 = vadd.f32 %v5617_v39, %v5616_v19  ;;  %v5505_v43 = vpop.f32.mrb[255].mxu1 }
 0x4c6   : > { %v3897_v59 = vadd.f32 %v5503_v50, %v8449_v57  ;;  %v5506_v10 = vadd.f32 %v5505_v43, %v5504_v30 }
 0x4c8   : > { %v3900_v35 = vadd.f32 %v5506_v10, %v8451_v60  ;;  %v8545_v4 = vadd.f32 %v5615_v12, %v3897_v59 }
 0x4ca   : > { %v5709_v17 = vpop.f32.mrb[0].mxu1  ;;  %v8547_v42 = vadd.f32 %v5618_v16, %v3900_v35 }
 0x4cb   : > { %v8550_v11 = vadd.f32 %v5709_v17, %v8461_v41  ;;  %v4098_v25 = vpop.f32.mrb[1].mxu1 }
 0x4cc   : > { %v8553_v34 = vadd.f32 %v4098_v25, %v8455_v31  ;;  %v5710_v18 = vpop.f32.mrb[2].mxu1 }
 0x4cd   : > { %v8556_v28 = vadd.f32 %v5710_v18, %v8463_v8  ;;  %v4101_v57 = vpop.f32.mrb[3].mxu1 }
 0x4ce   : > { %v8559_v29 = vadd.f32 %v4101_v57, %v8457_v51 }
 0x4d0   : > { %v4225_v60 = vadd.f32 %v8559_v29, %v8553_v34 }
 0x4d2   : > { %v4226_v3 = vadd.f32 %v4225_v60, %v8550_v11  ;;  %v5713_v9 = vpop.f32.mrb[4].mxu1 }
 0x4d3   : > { %v8565_v41 = vadd.f32 %v5713_v9, %v8473_v46  ;;  %v4114_v20 = vpop.f32.mrb[5].mxu1 }
 0x4d4   : > { %v8568_v31 = vadd.f32 %v4114_v20, %v8467_v36  ;;  %v4227_v8 = vadd.f32 %v4226_v3, %v8556_v28  ;;  %v5714_v63 = vpop.f32.mrb[6].mxu1 }
 0x4d5   : > { %v8572_v23 = vadd.f32 %v5714_v63, %v8475_v33  ;;  %v4117_v51 = vpop.f32.mrb[7].mxu1 }
 0x4d6   : > { %v4228_v1 = vadd.f32 %v4227_v8, %v8568_v31  ;;  %v8576_v21 = vadd.f32 %v4117_v51, %v8469_v13 }
 0x4d8   : > { %v4229_v62 = vadd.f32 %v4228_v1, %v8576_v21 }
 0x4da   : > { %v4230_v46 = vadd.f32 %v4229_v62, %v8565_v41  ;;  %v5717_v40 = vpop.f32.mrb[8].mxu1 }
 0x4db   : > { %v8581_v36 = vadd.f32 %v5717_v40, %v8485_v27  ;;  %v4130_v2 = vpop.f32.mrb[9].mxu1 }
 0x4dc   : > { %v8584_v37 = vadd.f32 %v4130_v2, %v8479_v32  ;;  %v4231_v33 = vadd.f32 %v4230_v46, %v8572_v23  ;;  %v5718_v45 = vpop.f32.mrb[10].mxu1 }
 0x4dd   : > { %v8588_v12 = vadd.f32 %v5718_v45, %v8487_v54  ;;  %v4133_v13 = vpop.f32.mrb[11].mxu1 }
 0x4de   : > { %v4232_v6 = vadd.f32 %v4231_v33, %v8584_v37  ;;  %v8592_v19 = vadd.f32 %v4133_v13, %v8481_v24 }
 0x4e0   : > { %v4233_v50 = vadd.f32 %v4232_v6, %v8592_v19 }
 0x4e2   : > { %v4234_v27 = vadd.f32 %v4233_v50, %v8581_v36  ;;  %v5721_v30 = vpop.f32.mrb[12].mxu1 }
 0x4e3   : > { %v8597_v32 = vadd.f32 %v5721_v30, %v8497_v58  ;;  %v4146_v39 = vpop.f32.mrb[13].mxu1 }
 0x4e4   : > { %v8600_v16 = vadd.f32 %v4146_v39, %v8491_v61  ;;  %v4235_v54 = vadd.f32 %v4234_v27, %v8588_v12  ;;  %v5722_v43 = vpop.f32.mrb[14].mxu1 }
 0x4e5   : > { %v8604_v59 = vadd.f32 %v5722_v43, %v8499_v55  ;;  %v4149_v24 = vpop.f32.mrb[15].mxu1 }
 0x4e6   : > { %v4236_v10 = vadd.f32 %v4235_v54, %v8600_v16  ;;  %v8608_v35 = vadd.f32 %v4149_v24, %v8493_v52 }
 0x4e8   : > { %v4237_v17 = vadd.f32 %v4236_v10, %v8608_v35 }
 0x4ea   : > { %v4238_v58 = vadd.f32 %v4237_v17, %v8597_v32  ;;  %v5725_v25 = vpop.f32.mrb[16].mxu1 }
 0x4eb   : > { %v8613_v61 = vadd.f32 %v5725_v25, %v8509_v15  ;;  %v4162_v18 = vpop.f32.mrb[17].mxu1 }
 0x4ec   : > { %v4163_v57 = vadd.f32 %v4162_v18, %v8503_v14  ;;  %v4239_v55 = vadd.f32 %v4238_v58, %v8604_v59  ;;  %v5726_v60 = vpop.f32.mrb[18].mxu1 }
 0x4ed   : > { %v4174_v3 = vadd.f32 %v5726_v60, %v8511_v49  ;;  %v4165_v9 = vpop.f32.mrb[19].mxu1 }
 0x4ee   : > { %v4240_v20 = vadd.f32 %v4239_v55, %v4163_v57  ;;  %v4166_v52 = vadd.f32 %v4165_v9, %v8505_v47 }
 0x4f0   : > { %v4241_v8 = vadd.f32 %v4240_v20, %v4166_v52 }
 0x4f2   : > { %v4242_v63 = vadd.f32 %v4241_v8, %v8613_v61  ;;  %v5729_v51 = vpop.f32.mrb[20].mxu1 }
 0x4f3   : > { %v4187_v1 = vadd.f32 %v5729_v51, %v8521_v48  ;;  %v4178_v15 = vpop.f32.mrb[21].mxu1 }
 0x4f4   : > { %v4179_v62 = vadd.f32 %v4178_v15, %v8515_v0  ;;  %v4243_v46 = vadd.f32 %v4242_v63, %v4174_v3  ;;  %v5730_v14 = vpop.f32.mrb[22].mxu1 }
 0x4f5   : > { %v4190_v40 = vadd.f32 %v5730_v14, %v8523_v56  ;;  %v4181_v2 = vpop.f32.mrb[23].mxu1 }
 0x4f6   : > { %v4244_v33 = vadd.f32 %v4243_v46, %v4179_v62  ;;  %v4182_v49 = vadd.f32 %v4181_v2, %v8517_v38 }
 0x4f8   : > { %v4245_v45 = vadd.f32 %v4244_v33, %v4182_v49 }
 0x4fa   : > { %v4246_v13 = vadd.f32 %v4245_v45, %v4187_v1  ;;  %v5733_v47 = vpop.f32.mrb[24].mxu1 }
 0x4fb   : > { %v4203_v6 = vadd.f32 %v5733_v47, %v8533_v53  ;;  %v4194_v50 = vpop.f32.mrb[25].mxu1 }
 0x4fc   : > { %v4195_v27 = vadd.f32 %v4194_v50, %v8527_v26  ;;  %v4247_v48 = vadd.f32 %v4246_v13, %v4190_v40  ;;  %v5734_v30 = vpop.f32.mrb[26].mxu1 }
 0x4fd   : > { %v4206_v0 = vadd.f32 %v5734_v30, %v8535_v22  ;;  %v4197_v39 = vpop.f32.mrb[27].mxu1 }
 0x4fe   : > { %v4248_v54 = vadd.f32 %v4247_v48, %v4195_v27  ;;  %v4198_v56 = vadd.f32 %v4197_v39, %v8529_v5 }
 0x500   : > { %v4249_v43 = vadd.f32 %v4248_v54, %v4198_v56 }
 0x502   : > { %v4250_v24 = vadd.f32 %v4249_v43, %v4203_v6  ;;  %v5737_v10 = vpop.f32.mrb[28].mxu1 }
 0x503   : > { %v4219_v38 = vadd.f32 %v5737_v10, %v8545_v4  ;;  %v4210_v17 = vpop.f32.mrb[29].mxu1 }
 0x504   : > { %v4211_v58 = vadd.f32 %v4210_v17, %v8539_v7  ;;  %v4251_v53 = vadd.f32 %v4250_v24, %v4206_v0  ;;  %v5738_v25 = vpop.f32.mrb[30].mxu1 }
 0x505   : > { %v4222_v26 = vadd.f32 %v5738_v25, %v8547_v42  ;;  %v4213_v18 = vpop.f32.mrb[31].mxu1 }
 0x506   : > { %v4252_v55 = vadd.f32 %v4251_v53, %v4211_v58  ;;  %v4214_v22 = vadd.f32 %v4213_v18, %v8541_v44 }
 0x508   : > { %v4253_v60 = vadd.f32 %v4252_v55, %v4214_v22 }
 0x50a   : > { %v4254_v9 = vadd.f32 %v4253_v60, %v4219_v38 }
 0x50c   : > { %v4255_v20 = vadd.f32 %v4254_v9, %v4222_v26 }
 0x50e   : > { %v4256_v5 = vrot.slane %v4255_v20, 4 }
 0x510   : > { %v4257_v8 = vadd.f32 %v4256_v5, %v4255_v20 }
 0x512   : > { %v4258_v63 = vrot.slane %v4257_v8, 2 }
 0x514   : > { %v4259_v51 = vadd.f32 %v4258_v63, %v4257_v8 }
 0x516   : > { %v4260_v15 = vrot.slane %v4259_v51, 1 }
 0x518   : > { %v4261_v4 = vadd.f32 %v4260_v15, %v4259_v51 }
 0x51a   : > { %v4262_v46 = vmul.f32 0.00390625, %v4261_v4 }
 0x51c   : > { %v8633_v7 = vsub.f32 %v8584_v37, %v4262_v46  ;;  %v8636_v14 = vsub.f32 %v8592_v19, %v4262_v46  ;;  %v8639_v42 = vsub.f32 %v8581_v36, %v4262_v46  ;;  %v8642_v44 = vsub.f32 %v8588_v12, %v4262_v46 }
 0x51d   : > { %v8645_v2 = vsub.f32 %v8600_v16, %v4262_v46  ;;  %v8648_v33 = vsub.f32 %v8608_v35, %v4262_v46  ;;  %v8651_v45 = vsub.f32 %v8597_v32, %v4262_v46  ;;  %v8654_v37 = vsub.f32 %v8604_v59, %v4262_v46 }
 0x51e   : > { %v8656_v19 = vsub.f32 %v4163_v57, %v4262_v46  ;;  %v8658_v13 = vsub.f32 %v4166_v52, %v4262_v46  ;;  %v8661_v36 = vsub.f32 %v8613_v61, %v4262_v46  ;;  %v8663_v12 = vsub.f32 %v4174_v3, %v4262_v46 }
 0x51f   : > { %v8665_v16 = vsub.f32 %v4179_v62, %v4262_v46  ;;  %v8667_v47 = vsub.f32 %v4182_v49, %v4262_v46  ;;  %v8669_v35 = vsub.f32 %v4187_v1, %v4262_v46  ;;  %v8671_v32 = vsub.f32 %v4190_v40, %v4262_v46 }
 0x520   : > { %v8673_v50 = vsub.f32 %v4195_v27, %v4262_v46  ;;  %v8675_v59 = vsub.f32 %v4198_v56, %v4262_v46  ;;  %v8677_v57 = vsub.f32 %v4203_v6, %v4262_v46  ;;  %v8679_v52 = vsub.f32 %v4206_v0, %v4262_v46 }
 0x521   : > { %v8681_v61 = vsub.f32 %v4211_v58, %v4262_v46  ;;  %v8683_v3 = vsub.f32 %v4214_v22, %v4262_v46  ;;  %v8685_v62 = vsub.f32 %v4219_v38, %v4262_v46  ;;  %v8687_v49 = vsub.f32 %v4222_v26, %v4262_v46 }
 0x522   : > { %v8690_v1 = vsub.f32 %v8553_v34, %v4262_v46  ;;  %v8693_v40 = vsub.f32 %v8559_v29, %v4262_v46  ;;  %v8696_v27 = vsub.f32 %v8550_v11, %v4262_v46  ;;  %v8703_v30 = vsub.f32 %v8556_v28, %v4262_v46 }
 0x523   : > { %v8706_v0 = vsub.f32 %v8568_v31, %v4262_v46  ;;  %v8711_v39 = vsub.f32 %v8576_v21, %v4262_v46  ;;  %v8716_v56 = vsub.f32 %v8565_v41, %v4262_v46  ;;  %v8721_v31 = vsub.f32 %v8572_v23, %v4262_v46 }
 0x524   : > { %v4295_v6 = vmul.f32 %v8690_v1, %v8690_v1  ;;  %v4296_v48 = vmul.f32 %v8693_v40, %v8693_v40  ;;  %v4297_v34 = vmul.f32 %v8696_v27, %v8696_v27  ;;  %v4298_v11 = vmul.f32 %v8703_v30, %v8703_v30 }
 0x525   : > { %v4299_v28 = vmul.f32 %v8706_v0, %v8706_v0  ;;  %v4300_v24 = vmul.f32 %v8711_v39, %v8711_v39  ;;  %v4301_v21 = vmul.f32 %v8716_v56, %v8716_v56  ;;  %v4302_v17 = vmul.f32 %v8721_v31, %v8721_v31 }
 0x526   : > { %v4327_v29 = vadd.f32 %v4296_v48, %v4295_v6  ;;  %v4303_v58 = vmul.f32 %v8633_v7, %v8633_v7  ;;  %v4304_v23 = vmul.f32 %v8636_v14, %v8636_v14  ;;  %v4305_v26 = vmul.f32 %v8639_v42, %v8639_v42 }
 0x527   : > { %v4306_v55 = vmul.f32 %v8642_v44, %v8642_v44  ;;  %v4307_v60 = vmul.f32 %v8645_v2, %v8645_v2  ;;  %v4308_v20 = vmul.f32 %v8648_v33, %v8648_v33  ;;  %v4309_v8 = vmul.f32 %v8651_v45, %v8651_v45 }
 0x528   : > { %v4328_v54 = vadd.f32 %v4327_v29, %v4297_v34  ;;  %v4310_v51 = vmul.f32 %v8654_v37, %v8654_v37  ;;  %v4311_v4 = vmul.f32 %v8656_v19, %v8656_v19  ;;  %v4312_v6 = vmul.f32 %v8658_v13, %v8658_v13 }
 0x529   : > { %v4313_v34 = vmul.f32 %v8661_v36, %v8661_v36 }
 0x52a   : > { %v4329_v43 = vadd.f32 %v4328_v54, %v4298_v11  ;;  %v4314_v11 = vmul.f32 %v8663_v12, %v8663_v12 }
 0x52c   : > { %v4330_v10 = vadd.f32 %v4329_v43, %v4299_v28  ;;  %v4315_v28 = vmul.f32 %v8665_v16, %v8665_v16 }
 0x52e   : > { %v4331_v38 = vadd.f32 %v4330_v10, %v4300_v24  ;;  %v4316_v24 = vmul.f32 %v8667_v47, %v8667_v47 }
 0x530   : > { %v4332_v41 = vadd.f32 %v4331_v38, %v4301_v21  ;;  %v4317_v21 = vmul.f32 %v8669_v35, %v8669_v35 }
 0x532   : > { %v4333_v53 = vadd.f32 %v4332_v41, %v4302_v17  ;;  %v4318_v17 = vmul.f32 %v8671_v32, %v8671_v32 }
 0x534   : > { %v4334_v25 = vadd.f32 %v4333_v53, %v4303_v58  ;;  %v4319_v58 = vmul.f32 %v8673_v50, %v8673_v50 }
 0x536   : > { %v4335_v18 = vadd.f32 %v4334_v25, %v4304_v23  ;;  %v4320_v23 = vmul.f32 %v8675_v59, %v8675_v59 }
 0x538   : > { %v4336_v22 = vadd.f32 %v4335_v18, %v4305_v26  ;;  %v4321_v26 = vmul.f32 %v8677_v57, %v8677_v57 }
 0x53a   : > { %v4337_v9 = vadd.f32 %v4336_v22, %v4306_v55  ;;  %v4322_v55 = vmul.f32 %v8679_v52, %v8679_v52 }
 0x53c   : > { %v4338_v5 = vadd.f32 %v4337_v9, %v4307_v60  ;;  %v4323_v60 = vmul.f32 %v8681_v61, %v8681_v61 }
 0x53e   : > { %v4339_v63 = vadd.f32 %v4338_v5, %v4308_v20  ;;  %v4324_v20 = vmul.f32 %v8683_v3, %v8683_v3 }
 0x540   : > { %v4340_v15 = vadd.f32 %v4339_v63, %v4309_v8  ;;  %v4325_v8 = vmul.f32 %v8685_v62, %v8685_v62 }
 0x542   : > { %v4341_v46 = vadd.f32 %v4340_v15, %v4310_v51  ;;  %v4326_v51 = vmul.f32 %v8687_v49, %v8687_v49 }
 0x544   : > { %v4342_v48 = vadd.f32 %v4341_v46, %v4311_v4 }
 0x546   : > { %v4343_v29 = vadd.f32 %v4342_v48, %v4312_v6 }
 0x548   : > { %v4344_v54 = vadd.f32 %v4343_v29, %v4313_v34 }
 0x54a   : > { %v4345_v43 = vadd.f32 %v4344_v54, %v4314_v11 }
 0x54c   : > { %v4346_v10 = vadd.f32 %v4345_v43, %v4315_v28 }
 0x54e   : > { %v4347_v38 = vadd.f32 %v4346_v10, %v4316_v24 }
 0x550   : > { %v4348_v41 = vadd.f32 %v4347_v38, %v4317_v21 }
 0x552   : > { %v4349_v53 = vadd.f32 %v4348_v41, %v4318_v17 }
 0x554   : > { %v4350_v25 = vadd.f32 %v4349_v53, %v4319_v58 }
 0x556   : > { %v4351_v18 = vadd.f32 %v4350_v25, %v4320_v23  ;;  %v9086_v23 = vld [vmem:[#allocation35_spill] sm:$0xff] }
 0x558   : > { %v4352_v22 = vadd.f32 %v4351_v18, %v4321_v26 }
 0x55a   : > { %v4353_v9 = vadd.f32 %v4352_v22, %v4322_v55 }
 0x55c   : > { %v4354_v5 = vadd.f32 %v4353_v9, %v4323_v60  ;;  %v9091_v60 = vld [vmem:[#allocation10_spill] sm:$0xff]  ;;  %v9092_v9 = vld [vmem:[#allocation11_spill] sm:$0xff] }
 0x55e   : > { %v4355_v63 = vadd.f32 %v4354_v5, %v4324_v20  ;;  %v9093_v20 = vld [vmem:[#allocation12_spill] sm:$0xff]  ;;  %v9094_v5 = vld [vmem:[#allocation13_spill] sm:$0xff] }
 0x560   : > { %v4356_v15 = vadd.f32 %v4355_v63, %v4325_v8  ;;  %v9095_v8 = vld [vmem:[#allocation14_spill] sm:$0xff] }
 0x562   : > { %v4357_v4 = vadd.f32 %v4356_v15, %v4326_v51  ;;  %v9096_v51 = vld [vmem:[#allocation15_spill] sm:$0xff] }
 0x564   : > { %v4358_v46 = vrot.slane %v4357_v4, 4 }
 0x566   : > { %v4359_v6 = vadd.f32 %v4358_v46, %v4357_v4  ;;  %v9097_v4 = vld [vmem:[#allocation16_spill] sm:$0xff] }
 0x568   : > { %v4360_v48 = vrot.slane %v4359_v6, 2 }
 0x56a   : > { %v4361_v34 = vadd.f32 %v4360_v48, %v4359_v6  ;;  %v9098_v6 = vld [vmem:[#allocation17_spill] sm:$0xff] }
 0x56c   : > { %v4362_v29 = vrot.slane %v4361_v34, 1 }
 0x56e   : > { %v4363_v11 = vadd.f32 %v4362_v29, %v4361_v34  ;;  %v9099_v34 = vld [vmem:[#allocation18_spill] sm:$0xff] }
 0x570   : > { %v4364_v54 = vmul.f32 0.00390625, %v4363_v11  ;;  %v9100_v11 = vld [vmem:[#allocation19_spill] sm:$0xff] }
 0x572   : > { %v4365_v28 = vadd.f32 1e-05, %v4364_v54 }
 0x574   : > { %5926 = vrsqrt.f32 %v4365_v28  ;;  %v9101_v28 = vld [vmem:[#allocation20_spill] sm:$0xff] }
 0x57e   : > { %v5927_v43 = vpop.eup %5926 }
 0x57f   : > { %v4396_v24 = vmul.f32 %v5927_v43, %v8683_v3  ;;  %v4367_v10 = vmul.f32 %v5927_v43, %v8690_v1  ;;  %v4368_v21 = vmul.f32 %v5927_v43, %v8693_v40  ;;  %v4369_v38 = vmul.f32 %v5927_v43, %v8696_v27 }
 0x580   : > { %v4370_v17 = vmul.f32 %v5927_v43, %v8703_v30  ;;  %v4371_v41 = vmul.f32 %v5927_v43, %v8706_v0  ;;  %v4372_v58 = vmul.f32 %v5927_v43, %v8711_v39  ;;  %v4373_v53 = vmul.f32 %v5927_v43, %v8716_v56 }
 0x581   : > { %v4428_v25 = vadd.f32 %v4396_v24, %v9086_v23  ;;  %v4374_v26 = vmul.f32 %v5927_v43, %v8721_v31  ;;  %v4375_v3 = vmul.f32 %v5927_v43, %v8633_v7  ;;  %v4376_v1 = vmul.f32 %v5927_v43, %v8636_v14  ;;  %v9102_v24 = vld [vmem:[#allocation21_spill] sm:$0xff] }
 0x582   : > { %v4377_v40 = vmul.f32 %v5927_v43, %v8639_v42  ;;  %v4378_v27 = vmul.f32 %v5927_v43, %v8642_v44  ;;  %v4379_v30 = vmul.f32 %v5927_v43, %v8645_v2  ;;  %v4380_v0 = vmul.f32 %v5927_v43, %v8648_v33  ;;  %v9106_v23 = vld [vmem:[#allocation25_spill] sm:$0xff] }
 0x583   : > { %4460 = vst [vmem:[%s8796_s17 + $0xe8] sm:$0xff] %v4428_v25  ;;  %v4381_v39 = vmul.f32 %v5927_v43, %v8651_v45  ;;  %v4382_v56 = vmul.f32 %v5927_v43, %v8654_v37  ;;  %v4383_v7 = vmul.f32 %v5927_v43, %v8656_v19  ;;  %v4384_v14 = vmul.f32 %v5927_v43, %v8658_v13 }
 0x584   : > { %v4385_v42 = vmul.f32 %v5927_v43, %v8661_v36  ;;  %v4386_v44 = vmul.f32 %v5927_v43, %v8663_v12  ;;  %v4387_v2 = vmul.f32 %v5927_v43, %v8665_v16  ;;  %v4388_v33 = vmul.f32 %v5927_v43, %v8667_v47  ;;  %v9087_v47 = vld [vmem:[#allocation8_spill] sm:$0xff] }
 0x585   : > { %v4389_v31 = vmul.f32 %v5927_v43, %v8669_v35  ;;  %v4390_v18 = vmul.f32 %v5927_v43, %v8671_v32  ;;  %v4391_v45 = vmul.f32 %v5927_v43, %v8673_v50  ;;  %v4392_v37 = vmul.f32 %v5927_v43, %v8675_v59  ;;  %v9088_v32 = vld [vmem:[#allocation9_spill] sm:$0xff]  ;;  %v9089_v50 = vld [vmem:[#allocation6_spill] sm:$0xff]  ;;  %v9090_v59 = vld [vmem:[#allocation7_spill] sm:$0xff] }
 0x586   : > { %v4393_v19 = vmul.f32 %v5927_v43, %v8677_v57  ;;  %v4394_v13 = vmul.f32 %v5927_v43, %v8679_v52  ;;  %v4395_v36 = vmul.f32 %v5927_v43, %v8681_v61  ;;  %v4397_v12 = vmul.f32 %v5927_v43, %v8685_v62 }
 0x587   : > { %v4398_v16 = vmul.f32 %v5927_v43, %v8687_v49  ;;  %v4399_v35 = vadd.f32 %v4367_v10, %v9087_v47  ;;  %v4400_v55 = vadd.f32 %v4368_v21, %v9088_v32  ;;  %v4401_v22 = vadd.f32 %v4369_v38, %v9089_v50  ;;  %v9103_v21 = vld [vmem:[#allocation22_spill] sm:$0xff]  ;;  %v9117_v47 = vld [vmem:[#allocation37_spill] sm:$0xff] }
 0x588   : > { %v4402_v57 = vadd.f32 %v4370_v17, %v9090_v59  ;;  %v4403_v52 = vadd.f32 %v4371_v41, %v9091_v60  ;;  %v4404_v61 = vadd.f32 %v4372_v58, %v9092_v9  ;;  %v4405_v62 = vadd.f32 %v4373_v53, %v9093_v20  ;;  %v9104_v17 = vld [vmem:[#allocation23_spill] sm:$0xff]  ;;  %v9105_v58 = vld [vmem:[#allocation24_spill] sm:$0xff] }
 0x589   : > { %v4406_v49 = vadd.f32 %v4374_v26, %v9094_v5  ;;  %v4407_v63 = vadd.f32 %v4375_v3, %v9095_v8  ;;  %v4408_v15 = vadd.f32 %v4376_v1, %v9096_v51  ;;  %v4409_v46 = vadd.f32 %v4377_v40, %v9097_v4  ;;  %4431 = vst [vmem:[%s8796_s17] sm:$0xff] %v4399_v35  ;;  %v9107_v26 = vld [vmem:[#allocation26_spill] sm:$0xff]  ;;  %v9108_v1 = vld [vmem:[#allocation27_spill] sm:$0xff] }
 0x58a   : > { %4432 = vst [vmem:[%s8796_s17 + $0x8] sm:$0xff] %v4400_v55  ;;  %4433 = vst [vmem:[%s8796_s17 + $0x10] sm:$0xff] %v4401_v22  ;;  %v4410_v48 = vadd.f32 %v4378_v27, %v9098_v6  ;;  %v4411_v29 = vadd.f32 %v4379_v30, %v9099_v34  ;;  %v4412_v54 = vadd.f32 %v4380_v0, %v9100_v11  ;;  %v9109_v27 = vld [vmem:[#allocation28_spill] sm:$0xff]  ;;  %v9110_v0 = vld [vmem:[#allocation29_spill] sm:$0xff] }
 0x58b   : > { %v4413_v43 = vadd.f32 %v4381_v39, %v9101_v28  ;;  %4434 = vst [vmem:[%s8796_s17 + $0x18] sm:$0xff] %v4402_v57  ;;  %4435 = vst [vmem:[%s8796_s17 + $0x20] sm:$0xff] %v4403_v52  ;;  %v4414_v10 = vadd.f32 %v4382_v56, %v9102_v24  ;;  %v4415_v38 = vadd.f32 %v4383_v7, %v9103_v21  ;;  %v9111_v56 = vld [vmem:[#allocation30_spill] sm:$0xff] }
 0x58c   : > { %4436 = vst [vmem:[%s8796_s17 + $0x28] sm:$0xff] %v4404_v61  ;;  %4437 = vst [vmem:[%s8796_s17 + $0x30] sm:$0xff] %v4405_v62  ;;  %v4416_v41 = vadd.f32 %v4384_v14, %v9104_v17  ;;  %v4417_v53 = vadd.f32 %v4385_v42, %v9105_v58  ;;  %v4418_v25 = vadd.f32 %v4386_v44, %v9106_v23  ;;  %v9112_v14 = vld [vmem:[#allocation31_spill] sm:$0xff]  ;;  %v9113_v44 = vld [vmem:[#allocation32_spill] sm:$0xff] }
 0x58d   : > { %4438 = vst [vmem:[%s8796_s17 + $0x38] sm:$0xff] %v4406_v49  ;;  %4439 = vst [vmem:[%s8796_s17 + $0x40] sm:$0xff] %v4407_v63  ;;  %v4419_v3 = vadd.f32 %v4387_v2, %v9107_v26  ;;  %v4420_v40 = vadd.f32 %v4388_v33, %v9108_v1  ;;  %v4421_v30 = vadd.f32 %v4389_v31, %v9109_v27  ;;  %v9114_v33 = vld [vmem:[#allocation33_spill] sm:$0xff] }
 0x58e   : > { %4440 = vst [vmem:[%s8796_s17 + $0x48] sm:$0xff] %v4408_v15  ;;  %4441 = vst [vmem:[%s8796_s17 + $0x50] sm:$0xff] %v4409_v46  ;;  %v4422_v39 = vadd.f32 %v4390_v18, %v9110_v0  ;;  %v4423_v7 = vadd.f32 %v4391_v45, %v9111_v56  ;;  %v4424_v42 = vadd.f32 %v4392_v37, %v9112_v14  ;;  %v9115_v18 = vld [vmem:[#allocation34_spill] sm:$0xff]  ;;  %v9116_v37 = vld [vmem:[#allocation36_spill] sm:$0xff] }
 0x58f   : > { %4442 = vst [vmem:[%s8796_s17 + $0x58] sm:$0xff] %v4410_v48  ;;  %4443 = vst [vmem:[%s8796_s17 + $0x60] sm:$0xff] %v4411_v29  ;;  %v4425_v2 = vadd.f32 %v4393_v19, %v9113_v44  ;;  %v4426_v31 = vadd.f32 %v4394_v13, %v9114_v33  ;;  %v4427_v45 = vadd.f32 %v4395_v36, %v9115_v18 }
 0x590   : > { %4444 = vst [vmem:[%s8796_s17 + $0x68] sm:$0xff] %v4412_v54  ;;  %4445 = vst [vmem:[%s8796_s17 + $0x70] sm:$0xff] %v4413_v43  ;;  %v4429_v19 = vadd.f32 %v4397_v12, %v9116_v37  ;;  %v4430_v35 = vadd.f32 %v4398_v16, %v9117_v47 }
 0x591   : > { %4446 = vst [vmem:[%s8796_s17 + $0x78] sm:$0xff] %v4414_v10  ;;  %4447 = vst [vmem:[%s8796_s17 + $0x80] sm:$0xff] %v4415_v38 }
 0x592   : > { %4448 = vst [vmem:[%s8796_s17 + $0x88] sm:$0xff] %v4416_v41  ;;  %4449 = vst [vmem:[%s8796_s17 + $0x90] sm:$0xff] %v4417_v53 }
 0x593   : > { %4450 = vst [vmem:[%s8796_s17 + $0x98] sm:$0xff] %v4418_v25  ;;  %4451 = vst [vmem:[%s8796_s17 + $0xa0] sm:$0xff] %v4419_v3 }
 0x594   : > { %4452 = vst [vmem:[%s8796_s17 + $0xa8] sm:$0xff] %v4420_v40  ;;  %4453 = vst [vmem:[%s8796_s17 + $0xb0] sm:$0xff] %v4421_v30 }
 0x595   : > { %4454 = vst [vmem:[%s8796_s17 + $0xb8] sm:$0xff] %v4422_v39  ;;  %4455 = vst [vmem:[%s8796_s17 + $0xc0] sm:$0xff] %v4423_v7 }
 0x596   : > { %4456 = vst [vmem:[%s8796_s17 + $0xc8] sm:$0xff] %v4424_v42  ;;  %4457 = vst [vmem:[%s8796_s17 + $0xd0] sm:$0xff] %v4425_v2 }
 0x597   : > { %4458 = vst [vmem:[%s8796_s17 + $0xd8] sm:$0xff] %v4426_v31  ;;  %4459 = vst [vmem:[%s8796_s17 + $0xe0] sm:$0xff] %v4427_v45 }
 0x598   : > { %4461 = vst [vmem:[%s8796_s17 + $0xf0] sm:$0xff] %v4429_v19  ;;  %4462 = vst [vmem:[%s8796_s17 + $0xf8] sm:$0xff] %v4430_v35 }
 0x599   : > { %5942 = shalt.err (!%p5939_p3)
}
 0x59a   : > { %s5943_s13 = scalar_lea.hbm %s8867_s26, 4096  ;;  %s5947_s16 = scalar_lea.hbm %s8935_s5, 8192 }
 0x59b   : > { %p5944_p4 = scmp.ne.s32.totalorder %s8867_s26, %s5943_s13  ;;  %p5948_p9 = scmp.lt.u32.totalorder %s8867_s26, %s8935_s5 }
 0x59c   : > { %p5949_p10 = scmp.lt.u32.totalorder %s5947_s16, %s5943_s13  ;;  %p5951_p12 = scmp.lt.u32.totalorder %s5943_s13, %s8867_s26 }
 0x59d   : > { %p5945_p7 = pnand %p5944_p4, %p6064_p5 }
 0x59e   : > { %p5950_p11 = por %p5949_p10, %p5948_p9 }
 0x59f   : > { %p5946_p8 = pneg %p5945_p7 }
 0x5a0   : > { %p5952_p13 = por %p5951_p12, %p5950_p11 }
 0x5a2   : > { %p5953_p0 = pnand %p5952_p13, %p5946_p8 }
 0x5a4   : > { %5956 = shalt.err (!%p5953_p0)
}
 0x5a5   : > { %s5994_s17 = smov 128   ;;  %s5995_s30 = smov 8  }
 0x5a6   : > { %5739 = dma.vmem_to_hbm [thread:$0]  (%p6064_p5), %s8869_s6, 4096, %s8867_s26, %s8889_s8, %s5994_s17, %s5994_s17, %s5995_s30  }
 0x5a7 PF: > { %p5745_p1 = scmp.ge.s32.totalorder %s5991_s21, 2  ;;  %s4492_s22 = sand.u32 1, %s5979_s18  }
 0x5a8   : > { %s4493_s7 = scalar_lea.sflag [#allocation4], %s4492_s22 }
 0x5a9   : > { %p5742_p2 = pnand %p5745_p1, %p6068_p6 }
 0x5ab   : > { %5974 = dma.done.wait (!%p5742_p2), %s4493_s7, 4096  }
 0x5ac   : > { %5976 = vsyncadd (!%p5742_p2), %s4493_s7, 4294963200  ;;  %p15_p3 = scmp.ge.s32.totalorder %s6051_s24, 4   ;;  %s9118_s18 = smov %s5983_s19 }
 0x5ad   : > { %s9119_s19 = smov %s5987_s20  ;;  %s9120_s20 = smov %s6062_s27 }
 0x5ae   : > { %s9121_s21 = smov %s6051_s24  ;;  %17 = sbr.rel (!%p15_p3) target bundleno = 3 (0x3), region = 79 }
 0x5b5   :  { %4498 = vsyncpa [#allocation4], 1 }
 0x5b6   :  { %4500 = vsyncpa [#allocation4 + $0x1], 1 }

</bundles_post_ra>
